<compile_context>
chip_gen: v7x
topology: tpu7x:2x2x1
jax: 0.10.0
libtpu: 0.0.40
codegen_flags: <defaults>
</compile_context>

<pallas_src>
import functools

import jax
import jax.numpy as jnp
from jax.experimental import pallas as pl
from jax.experimental.pallas import tpu as pltpu

# ---- scaled-down model dims (BERT-base analogue) -------------------------------------
BATCH = 2
SEQ = 8
H = 128            # hidden (768 in BERT-base)
N_HEADS = 4        # (12 in BERT-base)
HEAD_DIM = H // N_HEADS
FFN = 4 * H        # intermediate size (3072 in BERT-base)
VOCAB = 512        # (30522 in BERT-base)
N_LAYERS = 2       # (12 in BERT-base)
MAX_POS = 64
LN_EPS = 1e-12

_VMEM = pl.BlockSpec(memory_space=pltpu.MemorySpace.VMEM)


# ======================================================================================
# In-kernel helpers
# ======================================================================================
def _gelu_tanh(x):
    c = 0.7978845608028654  # sqrt(2/pi)
    return 0.5 * x * (1.0 + jnp.tanh(c * (x + 0.044715 * x * x * x)))


def _layernorm(x, g, b):
    mu = jnp.mean(x, axis=-1, keepdims=True)
    var = jnp.mean((x - mu) * (x - mu), axis=-1, keepdims=True)
    return (x - mu) * jax.lax.rsqrt(var + LN_EPS) * g + b


def _bf16(x):
    return x.astype(jnp.bfloat16)


# ======================================================================================
# Fused transformer-encoder stack: ONE pallas_call, grid over layers
# ======================================================================================
def _encoder_stack_kernel(x_ref, eg_ref, eb_ref,
                          wqkv_ref, bqkv_ref, wo_ref, bo_ref,
                          ln1g_ref, ln1b_ref, w1_ref, b1_ref, w2_ref, b2_ref,
                          ln2g_ref, ln2b_ref, o_ref,
                          *, batch, seq, n_heads, head_dim):
    hdim = n_heads * head_dim

    # layer 0: fold in the BERT embedding LayerNorm; o_ref then carries the activation
    # resident in VMEM across all layer iterations (constant output block index).
    @pl.when(pl.program_id(0) == 0)
    def _():
        o_ref[...] = _layernorm(x_ref[...], eg_ref[...], eb_ref[...])

    x = o_ref[...]                                                    # (B*S, H) f32

    # ---- fused QKV projection (1/sqrt(head_dim) folded into the Q weights at init) ----
    qkv = jnp.dot(_bf16(x), wqkv_ref[...],
                  preferred_element_type=jnp.float32) + bqkv_ref[...]       # (B*S, 3H)
    q = qkv[:, 0 * hdim:1 * hdim].reshape(batch, seq, hdim)
    k = qkv[:, 1 * hdim:2 * hdim].reshape(batch, seq, hdim)
    v = qkv[:, 2 * hdim:3 * hdim].reshape(batch, seq, hdim)

    # ---- multi-head attention; per-head output-proj accumulation (no lane concat) -----
    attn = jnp.zeros((batch * seq, hdim), jnp.float32)
    for hh in range(n_heads):
        sl = slice(hh * head_dim, (hh + 1) * head_dim)
        qh, kh, vh = _bf16(q[:, :, sl]), _bf16(k[:, :, sl]), _bf16(v[:, :, sl])
        s = jnp.einsum("bqd,bkd->bqk", qh, kh,
                       preferred_element_type=jnp.float32)                  # (B, S, S)
        s = s - jnp.max(s, axis=-1, keepdims=True)
        p = jnp.exp(s)
        p = p * pl.reciprocal(jnp.sum(p, axis=-1, keepdims=True), approx=True)
        ctx_h = jnp.einsum("bqk,bkd->bqd", _bf16(p), vh,
                           preferred_element_type=jnp.float32)              # (B, S, hd)
        # fold the output projection: ctx_h @ W_o[h*hd:(h+1)*hd, :], accumulated in f32
        attn = attn + jnp.dot(_bf16(ctx_h.reshape(batch * seq, head_dim)),
                              wo_ref[hh * head_dim:(hh + 1) * head_dim, :],
                              preferred_element_type=jnp.float32)
    attn = attn + bo_ref[...]

    # ---- residual + LN1 ----------------------------------------------------------------
    h1 = _layernorm(x + attn, ln1g_ref[...], ln1b_ref[...])

    # ---- FFN (w1 + gelu + w2) + residual + LN2 ------------------------------------------
    ffn = jnp.dot(_bf16(h1), w1_ref[...],
                  preferred_element_type=jnp.float32) + b1_ref[...]
    ffn = _gelu_tanh(ffn)
    ffn2 = jnp.dot(_bf16(ffn), w2_ref[...],
                   preferred_element_type=jnp.float32) + b2_ref[...]
    o_ref[...] = _layernorm(h1 + ffn2, ln2g_ref[...], ln2b_ref[...])


def encoder_stack(x_emb, params, *, batch, seq):
    m = batch * seq

    def stacked(shape):
        nd = len(shape)
        return pl.BlockSpec((None,) + shape, lambda l, _nd=nd: (l,) + (0,) * _nd)

    rep_row = pl.BlockSpec((m, H), lambda l: (0, 0))
    rep_vec = pl.BlockSpec((1, H), lambda l: (0, 0))

    return pl.pallas_call(
        functools.partial(_encoder_stack_kernel, batch=batch, seq=seq,
                          n_heads=N_HEADS, head_dim=HEAD_DIM),
        out_shape=jax.ShapeDtypeStruct((m, H), jnp.float32),
        grid_spec=pltpu.PrefetchScalarGridSpec(
            num_scalar_prefetch=0,
            grid=(N_LAYERS,),
            in_specs=[
                rep_row,                     # embeddings (pre-LN)
                rep_vec, rep_vec,            # embedding LN gamma/beta
                stacked((H, 3 * H)),         # wqkv
                stacked((1, 3 * H)),         # bqkv
                stacked((H, H)),             # wo
                stacked((1, H)),             # bo
                stacked((1, H)),             # ln1_g
                stacked((1, H)),             # ln1_b
                stacked((H, FFN)),           # w1
                stacked((1, FFN)),           # b1
                stacked((FFN, H)),           # w2
                stacked((1, H)),             # b2
                stacked((1, H)),             # ln2_g
                stacked((1, H)),             # ln2_b
            ],
            out_specs=pl.BlockSpec((m, H), lambda l: (0, 0)),   # resident activation carry
        ),
        compiler_params=pltpu.CompilerParams(
            dimension_semantics=("arbitrary",)),   # sequential layer carry
    )(x_emb, params["emb_ln_g"], params["emb_ln_b"],
      params["wqkv"], params["bqkv"], params["wo"], params["bo"],
      params["ln1_g"], params["ln1_b"], params["w1"], params["b1"],
      params["w2"], params["b2"], params["ln2_g"], params["ln2_b"])


# ======================================================================================
# Fused LSTM decoder + vocab projection: ONE pallas_call, time-major layout
# ======================================================================================
def _decoder_kernel(x_ref, wih_ref, whh_ref, b_ref, fcw_ref, fcb_ref, o_ref,
                    xp_ref, dec_ref, *, batch, seq, hidden):
    # x_ref is TIME-MAJOR (S*B, H): row t*B + b.
    # Input projection fused in for all timesteps: x @ W_ih + (b_ih + b_hh).
    xp_ref[...] = jnp.dot(_bf16(x_ref[...]), wih_ref[...],
                          preferred_element_type=jnp.float32) + b_ref[...]   # (S*B, 4H)

    h = jnp.zeros((batch, hidden), jnp.float32)   # initial state None -> zeros
    c = jnp.zeros((batch, hidden), jnp.float32)
    for t in range(seq):                          # unrolled recurrence (S=8)
        xp_t = xp_ref[pl.ds(t * batch, batch), :]                    # contiguous rows
        # NOTE: W_hh is read from its Ref every step (not hoisted) to avoid pinning
        #       ~32 vregs across the unrolled loop; VMEM loads are cheap (3/cycle).
        gates = xp_t + jnp.dot(_bf16(h), whh_ref[...],
                               preferred_element_type=jnp.float32)
        # PyTorch gate order: [i, f, g, o]
        i_g = jax.nn.sigmoid(gates[:, 0 * hidden:1 * hidden])
        f_g = jax.nn.sigmoid(gates[:, 1 * hidden:2 * hidden])
        g_g = jnp.tanh(gates[:, 2 * hidden:3 * hidden])
        o_g = jax.nn.sigmoid(gates[:, 3 * hidden:4 * hidden])
        c = f_g * c + i_g * g_g
        h = o_g * jnp.tanh(c)
        dec_ref[pl.ds(t * batch, batch), :] = h                      # contiguous rows

    # Final vocab projection fused on the resident decoder states (lane-dense 512 store).
    o_ref[...] = jnp.dot(_bf16(dec_ref[...]), fcw_ref[...],
                         preferred_element_type=jnp.float32) + fcb_ref[...]


def decode_and_project(x_tm, params, *, batch, seq):
    m = batch * seq
    return pl.pallas_call(
        functools.partial(_decoder_kernel, batch=batch, seq=seq, hidden=H),
        out_shape=jax.ShapeDtypeStruct((m, VOCAB), jnp.float32),
        in_specs=[_VMEM] * 6,
        out_specs=_VMEM,
        scratch_shapes=[pltpu.VMEM((m, 4 * H), jnp.float32),   # xp (time-major)
                        pltpu.VMEM((m, H), jnp.float32)],      # decoder hidden states
    )(x_tm, params["w_ih"], params["w_hh"], params["b_lstm"],
      params["fc_w"], params["fc_b"])


# ======================================================================================
# Parameters (deterministic random init; weights stored transposed so kernels do x @ W)
# ======================================================================================
def init_params(key):
    keys = iter(jax.random.split(key, 64))

    def nrm(shape, scale=0.02):
        return scale * jax.random.normal(next(keys), shape, jnp.float32)

    score_scale = 1.0 / (HEAD_DIM ** 0.5)

    per_layer = {k: [] for k in
                 ["wqkv", "bqkv", "wo", "bo", "ln1_g", "ln1_b",
                  "w1", "b1", "w2", "b2", "ln2_g", "ln2_b"]}
    for _ in range(N_LAYERS):
        wq, wk, wv = nrm((H, H)), nrm((H, H)), nrm((H, H))
        bq, bk, bv = nrm((H,)), nrm((H,)), nrm((H,))
        # fused QKV weight; 1/sqrt(head_dim) folded into the Q slice at init
        per_layer["wqkv"].append(
            jnp.concatenate([wq * score_scale, wk, wv], axis=1).astype(jnp.bfloat16))
        per_layer["bqkv"].append(
            jnp.concatenate([bq * score_scale, bk, bv]).reshape(1, 3 * H))
        per_layer["wo"].append(nrm((H, H)).astype(jnp.bfloat16))
        per_layer["bo"].append(nrm((H,)).reshape(1, H))
        per_layer["ln1_g"].append(jnp.ones((1, H), jnp.float32))
        per_layer["ln1_b"].append(jnp.zeros((1, H), jnp.float32))
        per_layer["w1"].append(nrm((H, FFN)).astype(jnp.bfloat16))
        per_layer["b1"].append(nrm((FFN,)).reshape(1, FFN))
        per_layer["w2"].append(nrm((FFN, H)).astype(jnp.bfloat16))
        per_layer["b2"].append(nrm((H,)).reshape(1, H))
        per_layer["ln2_g"].append(jnp.ones((1, H), jnp.float32))
        per_layer["ln2_b"].append(jnp.zeros((1, H), jnp.float32))

    params = {
        "word_emb": nrm((VOCAB, H)),
        "pos_emb": nrm((MAX_POS, H)),
        "type_emb": nrm((2, H)),
        "emb_ln_g": jnp.ones((1, H), jnp.float32),
        "emb_ln_b": jnp.zeros((1, H), jnp.float32),
        # LSTM(768,768): bf16 MXU weights; combined bias (b_ih + b_hh), pre-reshaped (1,4H)
        "w_ih": nrm((H, 4 * H)).astype(jnp.bfloat16),
        "w_hh": nrm((H, 4 * H)).astype(jnp.bfloat16),
        "b_lstm": (nrm((4 * H,)) + nrm((4 * H,))).reshape(1, 4 * H),
        # fc: Linear(768, 30522)
        "fc_w": nrm((H, VOCAB)).astype(jnp.bfloat16),
        "fc_b": jnp.zeros((1, VOCAB), jnp.float32),
    }
    # stack per-layer weights -> (N_LAYERS, ...) so the encoder grid can stream them
    for k, v in per_layer.items():
        params[k] = jnp.stack(v, axis=0)
    return params


# ======================================================================================
# Forward pass (mirrors Seq2SeqModel.forward)
# ======================================================================================
def seq2seq_forward(params, input_ids, decoder_input):
    # NOTE: decoder_input is accepted but unused, exactly like the PyTorch forward.
    del decoder_input
    b, s = input_ids.shape

    # ---- BERT embeddings (gather + adds in XLA); the embedding LN is fused into the
    #      first iteration of the encoder kernel.
    emb = (jnp.take(params["word_emb"], input_ids, axis=0)
           + params["pos_emb"][:s][None, :, :]
           + params["type_emb"][0][None, None, :])

    # ---- transformer encoder: ONE fused pallas_call, grid over layers -------------------
    x = encoder_stack(emb.reshape(b * s, H), params, batch=b, seq=s)    # (B*S, H)

    # ---- LSTM decoder + vocab projection (one fused kernel), time-major layout ----------
    x_tm = x.reshape(b, s, H).transpose(1, 0, 2).reshape(s * b, H)      # (S*B, H), XLA
    logits_tm = decode_and_project(x_tm, params, batch=b, seq=s)        # (S*B, VOCAB)
    return logits_tm.reshape(s, b, VOCAB).transpose(1, 0, 2)            # (B, S, VOCAB)


if __name__ == "__main__":
    key = jax.random.PRNGKey(0)
    pkey, ikey, dkey = jax.random.split(key, 3)

    params = init_params(pkey)
    input_ids = jax.random.randint(ikey, (BATCH, SEQ), 0, VOCAB, dtype=jnp.int32)
    decoder_input = jax.random.randint(dkey, (BATCH, SEQ), 0, VOCAB, dtype=jnp.int32)

    out = jax.jit(seq2seq_forward)(params, input_ids, decoder_input)
    out = jax.block_until_ready(out)
    assert out.shape == (BATCH, SEQ, VOCAB) and out.dtype == jnp.float32
    print("KERNEL_OK")
</pallas_src>

<mosaic_0001>
module attributes {stable_mosaic.version = 11 : i64} {
  func.func @_decoder_kernel(%arg0: memref<16x128xf32, #tpu.memory_space<vmem>>, %arg1: memref<128x512xbf16, #tpu.memory_space<vmem>>, %arg2: memref<128x512xbf16, #tpu.memory_space<vmem>>, %arg3: memref<1x512xf32, #tpu.memory_space<vmem>>, %arg4: memref<128x512xbf16, #tpu.memory_space<vmem>>, %arg5: memref<1x512xf32, #tpu.memory_space<vmem>>, %arg6: memref<16x512xf32, #tpu.memory_space<vmem>>, %arg7: memref<16x512xf32, #tpu.memory_space<vmem>>, %arg8: memref<16x128xf32, #tpu.memory_space<vmem>>) attributes {dimension_semantics = [], scalar_prefetch = 0 : i64, scratch_operands = 2 : i64, tpu.core_type = #tpu.core_type<tc>} {
    %c0 = arith.constant 0 : index
    %c0_0 = arith.constant 0 : index
    %0 = vector.load %arg0[%c0, %c0_0] : memref<16x128xf32, #tpu.memory_space<vmem>>, vector<16x128xf32>
    %1 = arith.truncf %0 : vector<16x128xf32> to vector<16x128xbf16>
    %c0_1 = arith.constant 0 : index
    %c0_2 = arith.constant 0 : index
    %2 = vector.load %arg1[%c0_1, %c0_2] : memref<128x512xbf16, #tpu.memory_space<vmem>>, vector<128x512xbf16>
    %cst = arith.constant dense<0.000000e+00> : vector<16x512xf32>
    %3 = tpu.matmul %1, %2, %cst {dimension_numbers = #tpu.dot_dimension_numbers<[1], [0], [0], [1], [0, 0, 1, 1], [], []>} : vector<16x128xbf16>, vector<128x512xbf16>, vector<16x512xf32> -> vector<16x512xf32>
    %c0_3 = arith.constant 0 : index
    %c0_4 = arith.constant 0 : index
    %4 = vector.load %arg3[%c0_3, %c0_4] : memref<1x512xf32, #tpu.memory_space<vmem>>, vector<1x512xf32>
    %5 = vector.broadcast %4 : vector<1x512xf32> to vector<16x512xf32>
    %6 = arith.addf %3, %5 : vector<16x512xf32>
    %c0_5 = arith.constant 0 : index
    %c0_6 = arith.constant 0 : index
    %7 = vector.load %arg7[%c0_5, %c0_6] : memref<16x512xf32, #tpu.memory_space<vmem>>, vector<16x512xf32>
    tpu.vector_store %arg7[%c0_5, %c0_6], %6 {strides = array<i32>} : memref<16x512xf32, #tpu.memory_space<vmem>>, vector<16x512xf32>,
    %cst_7 = arith.constant 0.000000e+00 : f32
    %8 = vector.broadcast %cst_7 : f32 to vector<2x128xf32>
    %cst_8 = arith.constant 0.000000e+00 : f32
    %9 = vector.broadcast %cst_8 : f32 to vector<2x128xf32>
    %c0_9 = arith.constant 0 : index
    %c0_10 = arith.constant 0 : index
    %10 = vector.load %arg7[%c0_9, %c0_10] : memref<16x512xf32, #tpu.memory_space<vmem>>, vector<2x512xf32>
    %11 = arith.truncf %8 : vector<2x128xf32> to vector<2x128xbf16>
    %c0_11 = arith.constant 0 : index
    %c0_12 = arith.constant 0 : index
    %12 = vector.load %arg2[%c0_11, %c0_12] : memref<128x512xbf16, #tpu.memory_space<vmem>>, vector<128x512xbf16>
    %cst_13 = arith.constant dense<0.000000e+00> : vector<2x512xf32>
    %13 = tpu.matmul %11, %12, %cst_13 {dimension_numbers = #tpu.dot_dimension_numbers<[1], [0], [0], [1], [0, 0, 1, 1], [], []>} : vector<2x128xbf16>, vector<128x512xbf16>, vector<2x512xf32> -> vector<2x512xf32>
    %14 = arith.addf %10, %13 : vector<2x512xf32>
    %15 = vector.extract_strided_slice %14 {offsets = [0, 0], sizes = [2, 128], strides = [1, 1]} : vector<2x512xf32> to vector<2x128xf32>
    %16 = arith.negf %15 : vector<2x128xf32>
    %17 = math.exp %16 : vector<2x128xf32>
    %cst_14 = arith.constant 1.000000e+00 : f32
    %18 = vector.broadcast %cst_14 : f32 to vector<2x128xf32>
    %19 = arith.addf %18, %17 : vector<2x128xf32>
    %20 = arith.divf %18, %19 : vector<2x128xf32>
    %21 = vector.extract_strided_slice %14 {offsets = [0, 128], sizes = [2, 128], strides = [1, 1]} : vector<2x512xf32> to vector<2x128xf32>
    %22 = arith.negf %21 : vector<2x128xf32>
    %23 = math.exp %22 : vector<2x128xf32>
    %cst_15 = arith.constant 1.000000e+00 : f32
    %24 = vector.broadcast %cst_15 : f32 to vector<2x128xf32>
    %25 = arith.addf %24, %23 : vector<2x128xf32>
    %26 = arith.divf %24, %25 : vector<2x128xf32>
    %27 = vector.extract_strided_slice %14 {offsets = [0, 256], sizes = [2, 128], strides = [1, 1]} : vector<2x512xf32> to vector<2x128xf32>
    %28 = math.tanh %27 : vector<2x128xf32>
    %29 = vector.extract_strided_slice %14 {offsets = [0, 384], sizes = [2, 128], strides = [1, 1]} : vector<2x512xf32> to vector<2x128xf32>
    %30 = arith.negf %29 : vector<2x128xf32>
    %31 = math.exp %30 : vector<2x128xf32>
    %cst_16 = arith.constant 1.000000e+00 : f32
    %32 = vector.broadcast %cst_16 : f32 to vector<2x128xf32>
    %33 = arith.addf %32, %31 : vector<2x128xf32>
    %34 = arith.divf %32, %33 : vector<2x128xf32>
    %35 = arith.mulf %26, %9 : vector<2x128xf32>
    %36 = arith.mulf %20, %28 : vector<2x128xf32>
    %37 = arith.addf %35, %36 : vector<2x128xf32>
    %38 = math.tanh %37 : vector<2x128xf32>
    %39 = arith.mulf %34, %38 : vector<2x128xf32>
    %c0_17 = arith.constant 0 : index
    %c0_18 = arith.constant 0 : index
    %40 = vector.load %arg8[%c0_17, %c0_18] : memref<16x128xf32, #tpu.memory_space<vmem>>, vector<2x128xf32>
    tpu.vector_store %arg8[%c0_17, %c0_18], %39 {strides = array<i32>} : memref<16x128xf32, #tpu.memory_space<vmem>>, vector<2x128xf32>,
    %c2 = arith.constant 2 : index
    %c0_19 = arith.constant 0 : index
    %41 = vector.load %arg7[%c2, %c0_19] : memref<16x512xf32, #tpu.memory_space<vmem>>, vector<2x512xf32>
    %42 = arith.truncf %39 : vector<2x128xf32> to vector<2x128xbf16>
    %c0_20 = arith.constant 0 : index
    %c0_21 = arith.constant 0 : index
    %43 = vector.load %arg2[%c0_20, %c0_21] : memref<128x512xbf16, #tpu.memory_space<vmem>>, vector<128x512xbf16>
    %cst_22 = arith.constant dense<0.000000e+00> : vector<2x512xf32>
    %44 = tpu.matmul %42, %43, %cst_22 {dimension_numbers = #tpu.dot_dimension_numbers<[1], [0], [0], [1], [0, 0, 1, 1], [], []>} : vector<2x128xbf16>, vector<128x512xbf16>, vector<2x512xf32> -> vector<2x512xf32>
    %45 = arith.addf %41, %44 : vector<2x512xf32>
    %46 = vector.extract_strided_slice %45 {offsets = [0, 0], sizes = [2, 128], strides = [1, 1]} : vector<2x512xf32> to vector<2x128xf32>
    %47 = arith.negf %46 : vector<2x128xf32>
    %48 = math.exp %47 : vector<2x128xf32>
    %cst_23 = arith.constant 1.000000e+00 : f32
    %49 = vector.broadcast %cst_23 : f32 to vector<2x128xf32>
    %50 = arith.addf %49, %48 : vector<2x128xf32>
    %51 = arith.divf %49, %50 : vector<2x128xf32>
    %52 = vector.extract_strided_slice %45 {offsets = [0, 128], sizes = [2, 128], strides = [1, 1]} : vector<2x512xf32> to vector<2x128xf32>
    %53 = arith.negf %52 : vector<2x128xf32>
    %54 = math.exp %53 : vector<2x128xf32>
    %cst_24 = arith.constant 1.000000e+00 : f32
    %55 = vector.broadcast %cst_24 : f32 to vector<2x128xf32>
    %56 = arith.addf %55, %54 : vector<2x128xf32>
    %57 = arith.divf %55, %56 : vector<2x128xf32>
    %58 = vector.extract_strided_slice %45 {offsets = [0, 256], sizes = [2, 128], strides = [1, 1]} : vector<2x512xf32> to vector<2x128xf32>
    %59 = math.tanh %58 : vector<2x128xf32>
    %60 = vector.extract_strided_slice %45 {offsets = [0, 384], sizes = [2, 128], strides = [1, 1]} : vector<2x512xf32> to vector<2x128xf32>
    %61 = arith.negf %60 : vector<2x128xf32>
    %62 = math.exp %61 : vector<2x128xf32>
    %cst_25 = arith.constant 1.000000e+00 : f32
    %63 = vector.broadcast %cst_25 : f32 to vector<2x128xf32>
    %64 = arith.addf %63, %62 : vector<2x128xf32>
    %65 = arith.divf %63, %64 : vector<2x128xf32>
    %66 = arith.mulf %57, %37 : vector<2x128xf32>
    %67 = arith.mulf %51, %59 : vector<2x128xf32>
    %68 = arith.addf %66, %67 : vector<2x128xf32>
    %69 = math.tanh %68 : vector<2x128xf32>
    %70 = arith.mulf %65, %69 : vector<2x128xf32>
    %c2_26 = arith.constant 2 : index
    %c0_27 = arith.constant 0 : index
    %71 = vector.load %arg8[%c2_26, %c0_27] : memref<16x128xf32, #tpu.memory_space<vmem>>, vector<2x128xf32>
    tpu.vector_store %arg8[%c2_26, %c0_27], %70 {strides = array<i32>} : memref<16x128xf32, #tpu.memory_space<vmem>>, vector<2x128xf32>,
    %c4 = arith.constant 4 : index
    %c0_28 = arith.constant 0 : index
    %72 = vector.load %arg7[%c4, %c0_28] : memref<16x512xf32, #tpu.memory_space<vmem>>, vector<2x512xf32>
    %73 = arith.truncf %70 : vector<2x128xf32> to vector<2x128xbf16>
    %c0_29 = arith.constant 0 : index
    %c0_30 = arith.constant 0 : index
    %74 = vector.load %arg2[%c0_29, %c0_30] : memref<128x512xbf16, #tpu.memory_space<vmem>>, vector<128x512xbf16>
    %cst_31 = arith.constant dense<0.000000e+00> : vector<2x512xf32>
    %75 = tpu.matmul %73, %74, %cst_31 {dimension_numbers = #tpu.dot_dimension_numbers<[1], [0], [0], [1], [0, 0, 1, 1], [], []>} : vector<2x128xbf16>, vector<128x512xbf16>, vector<2x512xf32> -> vector<2x512xf32>
    %76 = arith.addf %72, %75 : vector<2x512xf32>
    %77 = vector.extract_strided_slice %76 {offsets = [0, 0], sizes = [2, 128], strides = [1, 1]} : vector<2x512xf32> to vector<2x128xf32>
    %78 = arith.negf %77 : vector<2x128xf32>
    %79 = math.exp %78 : vector<2x128xf32>
    %cst_32 = arith.constant 1.000000e+00 : f32
    %80 = vector.broadcast %cst_32 : f32 to vector<2x128xf32>
    %81 = arith.addf %80, %79 : vector<2x128xf32>
    %82 = arith.divf %80, %81 : vector<2x128xf32>
    %83 = vector.extract_strided_slice %76 {offsets = [0, 128], sizes = [2, 128], strides = [1, 1]} : vector<2x512xf32> to vector<2x128xf32>
    %84 = arith.negf %83 : vector<2x128xf32>
    %85 = math.exp %84 : vector<2x128xf32>
    %cst_33 = arith.constant 1.000000e+00 : f32
    %86 = vector.broadcast %cst_33 : f32 to vector<2x128xf32>
    %87 = arith.addf %86, %85 : vector<2x128xf32>
    %88 = arith.divf %86, %87 : vector<2x128xf32>
    %89 = vector.extract_strided_slice %76 {offsets = [0, 256], sizes = [2, 128], strides = [1, 1]} : vector<2x512xf32> to vector<2x128xf32>
    %90 = math.tanh %89 : vector<2x128xf32>
    %91 = vector.extract_strided_slice %76 {offsets = [0, 384], sizes = [2, 128], strides = [1, 1]} : vector<2x512xf32> to vector<2x128xf32>
    %92 = arith.negf %91 : vector<2x128xf32>
    %93 = math.exp %92 : vector<2x128xf32>
    %cst_34 = arith.constant 1.000000e+00 : f32
    %94 = vector.broadcast %cst_34 : f32 to vector<2x128xf32>
    %95 = arith.addf %94, %93 : vector<2x128xf32>
    %96 = arith.divf %94, %95 : vector<2x128xf32>
    %97 = arith.mulf %88, %68 : vector<2x128xf32>
    %98 = arith.mulf %82, %90 : vector<2x128xf32>
    %99 = arith.addf %97, %98 : vector<2x128xf32>
    %100 = math.tanh %99 : vector<2x128xf32>
    %101 = arith.mulf %96, %100 : vector<2x128xf32>
    %c4_35 = arith.constant 4 : index
    %c0_36 = arith.constant 0 : index
    %102 = vector.load %arg8[%c4_35, %c0_36] : memref<16x128xf32, #tpu.memory_space<vmem>>, vector<2x128xf32>
    tpu.vector_store %arg8[%c4_35, %c0_36], %101 {strides = array<i32>} : memref<16x128xf32, #tpu.memory_space<vmem>>, vector<2x128xf32>,
    %c6 = arith.constant 6 : index
    %c0_37 = arith.constant 0 : index
    %103 = vector.load %arg7[%c6, %c0_37] : memref<16x512xf32, #tpu.memory_space<vmem>>, vector<2x512xf32>
    %104 = arith.truncf %101 : vector<2x128xf32> to vector<2x128xbf16>
    %c0_38 = arith.constant 0 : index
    %c0_39 = arith.constant 0 : index
    %105 = vector.load %arg2[%c0_38, %c0_39] : memref<128x512xbf16, #tpu.memory_space<vmem>>, vector<128x512xbf16>
    %cst_40 = arith.constant dense<0.000000e+00> : vector<2x512xf32>
    %106 = tpu.matmul %104, %105, %cst_40 {dimension_numbers = #tpu.dot_dimension_numbers<[1], [0], [0], [1], [0, 0, 1, 1], [], []>} : vector<2x128xbf16>, vector<128x512xbf16>, vector<2x512xf32> -> vector<2x512xf32>
    %107 = arith.addf %103, %106 : vector<2x512xf32>
    %108 = vector.extract_strided_slice %107 {offsets = [0, 0], sizes = [2, 128], strides = [1, 1]} : vector<2x512xf32> to vector<2x128xf32>
    %109 = arith.negf %108 : vector<2x128xf32>
    %110 = math.exp %109 : vector<2x128xf32>
    %cst_41 = arith.constant 1.000000e+00 : f32
    %111 = vector.broadcast %cst_41 : f32 to vector<2x128xf32>
    %112 = arith.addf %111, %110 : vector<2x128xf32>
    %113 = arith.divf %111, %112 : vector<2x128xf32>
    %114 = vector.extract_strided_slice %107 {offsets = [0, 128], sizes = [2, 128], strides = [1, 1]} : vector<2x512xf32> to vector<2x128xf32>
    %115 = arith.negf %114 : vector<2x128xf32>
    %116 = math.exp %115 : vector<2x128xf32>
    %cst_42 = arith.constant 1.000000e+00 : f32
    %117 = vector.broadcast %cst_42 : f32 to vector<2x128xf32>
    %118 = arith.addf %117, %116 : vector<2x128xf32>
    %119 = arith.divf %117, %118 : vector<2x128xf32>
    %120 = vector.extract_strided_slice %107 {offsets = [0, 256], sizes = [2, 128], strides = [1, 1]} : vector<2x512xf32> to vector<2x128xf32>
    %121 = math.tanh %120 : vector<2x128xf32>
    %122 = vector.extract_strided_slice %107 {offsets = [0, 384], sizes = [2, 128], strides = [1, 1]} : vector<2x512xf32> to vector<2x128xf32>
    %123 = arith.negf %122 : vector<2x128xf32>
    %124 = math.exp %123 : vector<2x128xf32>
    %cst_43 = arith.constant 1.000000e+00 : f32
    %125 = vector.broadcast %cst_43 : f32 to vector<2x128xf32>
    %126 = arith.addf %125, %124 : vector<2x128xf32>
    %127 = arith.divf %125, %126 : vector<2x128xf32>
    %128 = arith.mulf %119, %99 : vector<2x128xf32>
    %129 = arith.mulf %113, %121 : vector<2x128xf32>
    %130 = arith.addf %128, %129 : vector<2x128xf32>
    %131 = math.tanh %130 : vector<2x128xf32>
    %132 = arith.mulf %127, %131 : vector<2x128xf32>
    %c6_44 = arith.constant 6 : index
    %c0_45 = arith.constant 0 : index
    %133 = vector.load %arg8[%c6_44, %c0_45] : memref<16x128xf32, #tpu.memory_space<vmem>>, vector<2x128xf32>
    tpu.vector_store %arg8[%c6_44, %c0_45], %132 {strides = array<i32>} : memref<16x128xf32, #tpu.memory_space<vmem>>, vector<2x128xf32>,
    %c8 = arith.constant 8 : index
    %c0_46 = arith.constant 0 : index
    %134 = vector.load %arg7[%c8, %c0_46] : memref<16x512xf32, #tpu.memory_space<vmem>>, vector<2x512xf32>
    %135 = arith.truncf %132 : vector<2x128xf32> to vector<2x128xbf16>
    %c0_47 = arith.constant 0 : index
    %c0_48 = arith.constant 0 : index
    %136 = vector.load %arg2[%c0_47, %c0_48] : memref<128x512xbf16, #tpu.memory_space<vmem>>, vector<128x512xbf16>
    %cst_49 = arith.constant dense<0.000000e+00> : vector<2x512xf32>
    %137 = tpu.matmul %135, %136, %cst_49 {dimension_numbers = #tpu.dot_dimension_numbers<[1], [0], [0], [1], [0, 0, 1, 1], [], []>} : vector<2x128xbf16>, vector<128x512xbf16>, vector<2x512xf32> -> vector<2x512xf32>
    %138 = arith.addf %134, %137 : vector<2x512xf32>
    %139 = vector.extract_strided_slice %138 {offsets = [0, 0], sizes = [2, 128], strides = [1, 1]} : vector<2x512xf32> to vector<2x128xf32>
    %140 = arith.negf %139 : vector<2x128xf32>
    %141 = math.exp %140 : vector<2x128xf32>
    %cst_50 = arith.constant 1.000000e+00 : f32
    %142 = vector.broadcast %cst_50 : f32 to vector<2x128xf32>
    %143 = arith.addf %142, %141 : vector<2x128xf32>
    %144 = arith.divf %142, %143 : vector<2x128xf32>
    %145 = vector.extract_strided_slice %138 {offsets = [0, 128], sizes = [2, 128], strides = [1, 1]} : vector<2x512xf32> to vector<2x128xf32>
    %146 = arith.negf %145 : vector<2x128xf32>
    %147 = math.exp %146 : vector<2x128xf32>
    %cst_51 = arith.constant 1.000000e+00 : f32
    %148 = vector.broadcast %cst_51 : f32 to vector<2x128xf32>
    %149 = arith.addf %148, %147 : vector<2x128xf32>
    %150 = arith.divf %148, %149 : vector<2x128xf32>
    %151 = vector.extract_strided_slice %138 {offsets = [0, 256], sizes = [2, 128], strides = [1, 1]} : vector<2x512xf32> to vector<2x128xf32>
    %152 = math.tanh %151 : vector<2x128xf32>
    %153 = vector.extract_strided_slice %138 {offsets = [0, 384], sizes = [2, 128], strides = [1, 1]} : vector<2x512xf32> to vector<2x128xf32>
    %154 = arith.negf %153 : vector<2x128xf32>
    %155 = math.exp %154 : vector<2x128xf32>
    %cst_52 = arith.constant 1.000000e+00 : f32
    %156 = vector.broadcast %cst_52 : f32 to vector<2x128xf32>
    %157 = arith.addf %156, %155 : vector<2x128xf32>
    %158 = arith.divf %156, %157 : vector<2x128xf32>
    %159 = arith.mulf %150, %130 : vector<2x128xf32>
    %160 = arith.mulf %144, %152 : vector<2x128xf32>
    %161 = arith.addf %159, %160 : vector<2x128xf32>
    %162 = math.tanh %161 : vector<2x128xf32>
    %163 = arith.mulf %158, %162 : vector<2x128xf32>
    %c8_53 = arith.constant 8 : index
    %c0_54 = arith.constant 0 : index
    %164 = vector.load %arg8[%c8_53, %c0_54] : memref<16x128xf32, #tpu.memory_space<vmem>>, vector<2x128xf32>
    tpu.vector_store %arg8[%c8_53, %c0_54], %163 {strides = array<i32>} : memref<16x128xf32, #tpu.memory_space<vmem>>, vector<2x128xf32>,
    %c10 = arith.constant 10 : index
    %c0_55 = arith.constant 0 : index
    %165 = vector.load %arg7[%c10, %c0_55] : memref<16x512xf32, #tpu.memory_space<vmem>>, vector<2x512xf32>
    %166 = arith.truncf %163 : vector<2x128xf32> to vector<2x128xbf16>
    %c0_56 = arith.constant 0 : index
    %c0_57 = arith.constant 0 : index
    %167 = vector.load %arg2[%c0_56, %c0_57] : memref<128x512xbf16, #tpu.memory_space<vmem>>, vector<128x512xbf16>
    %cst_58 = arith.constant dense<0.000000e+00> : vector<2x512xf32>
    %168 = tpu.matmul %166, %167, %cst_58 {dimension_numbers = #tpu.dot_dimension_numbers<[1], [0], [0], [1], [0, 0, 1, 1], [], []>} : vector<2x128xbf16>, vector<128x512xbf16>, vector<2x512xf32> -> vector<2x512xf32>
    %169 = arith.addf %165, %168 : vector<2x512xf32>
    %170 = vector.extract_strided_slice %169 {offsets = [0, 0], sizes = [2, 128], strides = [1, 1]} : vector<2x512xf32> to vector<2x128xf32>
    %171 = arith.negf %170 : vector<2x128xf32>
    %172 = math.exp %171 : vector<2x128xf32>
    %cst_59 = arith.constant 1.000000e+00 : f32
    %173 = vector.broadcast %cst_59 : f32 to vector<2x128xf32>
    %174 = arith.addf %173, %172 : vector<2x128xf32>
    %175 = arith.divf %173, %174 : vector<2x128xf32>
    %176 = vector.extract_strided_slice %169 {offsets = [0, 128], sizes = [2, 128], strides = [1, 1]} : vector<2x512xf32> to vector<2x128xf32>
    %177 = arith.negf %176 : vector<2x128xf32>
    %178 = math.exp %177 : vector<2x128xf32>
    %cst_60 = arith.constant 1.000000e+00 : f32
    %179 = vector.broadcast %cst_60 : f32 to vector<2x128xf32>
    %180 = arith.addf %179, %178 : vector<2x128xf32>
    %181 = arith.divf %179, %180 : vector<2x128xf32>
    %182 = vector.extract_strided_slice %169 {offsets = [0, 256], sizes = [2, 128], strides = [1, 1]} : vector<2x512xf32> to vector<2x128xf32>
    %183 = math.tanh %182 : vector<2x128xf32>
    %184 = vector.extract_strided_slice %169 {offsets = [0, 384], sizes = [2, 128], strides = [1, 1]} : vector<2x512xf32> to vector<2x128xf32>
    %185 = arith.negf %184 : vector<2x128xf32>
    %186 = math.exp %185 : vector<2x128xf32>
    %cst_61 = arith.constant 1.000000e+00 : f32
    %187 = vector.broadcast %cst_61 : f32 to vector<2x128xf32>
    %188 = arith.addf %187, %186 : vector<2x128xf32>
    %189 = arith.divf %187, %188 : vector<2x128xf32>
    %190 = arith.mulf %181, %161 : vector<2x128xf32>
    %191 = arith.mulf %175, %183 : vector<2x128xf32>
    %192 = arith.addf %190, %191 : vector<2x128xf32>
    %193 = math.tanh %192 : vector<2x128xf32>
    %194 = arith.mulf %189, %193 : vector<2x128xf32>
    %c10_62 = arith.constant 10 : index
    %c0_63 = arith.constant 0 : index
    %195 = vector.load %arg8[%c10_62, %c0_63] : memref<16x128xf32, #tpu.memory_space<vmem>>, vector<2x128xf32>
    tpu.vector_store %arg8[%c10_62, %c0_63], %194 {strides = array<i32>} : memref<16x128xf32, #tpu.memory_space<vmem>>, vector<2x128xf32>,
    %c12 = arith.constant 12 : index
    %c0_64 = arith.constant 0 : index
    %196 = vector.load %arg7[%c12, %c0_64] : memref<16x512xf32, #tpu.memory_space<vmem>>, vector<2x512xf32>
    %197 = arith.truncf %194 : vector<2x128xf32> to vector<2x128xbf16>
    %c0_65 = arith.constant 0 : index
    %c0_66 = arith.constant 0 : index
    %198 = vector.load %arg2[%c0_65, %c0_66] : memref<128x512xbf16, #tpu.memory_space<vmem>>, vector<128x512xbf16>
    %cst_67 = arith.constant dense<0.000000e+00> : vector<2x512xf32>
    %199 = tpu.matmul %197, %198, %cst_67 {dimension_numbers = #tpu.dot_dimension_numbers<[1], [0], [0], [1], [0, 0, 1, 1], [], []>} : vector<2x128xbf16>, vector<128x512xbf16>, vector<2x512xf32> -> vector<2x512xf32>
    %200 = arith.addf %196, %199 : vector<2x512xf32>
    %201 = vector.extract_strided_slice %200 {offsets = [0, 0], sizes = [2, 128], strides = [1, 1]} : vector<2x512xf32> to vector<2x128xf32>
    %202 = arith.negf %201 : vector<2x128xf32>
    %203 = math.exp %202 : vector<2x128xf32>
    %cst_68 = arith.constant 1.000000e+00 : f32
    %204 = vector.broadcast %cst_68 : f32 to vector<2x128xf32>
    %205 = arith.addf %204, %203 : vector<2x128xf32>
    %206 = arith.divf %204, %205 : vector<2x128xf32>
    %207 = vector.extract_strided_slice %200 {offsets = [0, 128], sizes = [2, 128], strides = [1, 1]} : vector<2x512xf32> to vector<2x128xf32>
    %208 = arith.negf %207 : vector<2x128xf32>
    %209 = math.exp %208 : vector<2x128xf32>
    %cst_69 = arith.constant 1.000000e+00 : f32
    %210 = vector.broadcast %cst_69 : f32 to vector<2x128xf32>
    %211 = arith.addf %210, %209 : vector<2x128xf32>
    %212 = arith.divf %210, %211 : vector<2x128xf32>
    %213 = vector.extract_strided_slice %200 {offsets = [0, 256], sizes = [2, 128], strides = [1, 1]} : vector<2x512xf32> to vector<2x128xf32>
    %214 = math.tanh %213 : vector<2x128xf32>
    %215 = vector.extract_strided_slice %200 {offsets = [0, 384], sizes = [2, 128], strides = [1, 1]} : vector<2x512xf32> to vector<2x128xf32>
    %216 = arith.negf %215 : vector<2x128xf32>
    %217 = math.exp %216 : vector<2x128xf32>
    %cst_70 = arith.constant 1.000000e+00 : f32
    %218 = vector.broadcast %cst_70 : f32 to vector<2x128xf32>
    %219 = arith.addf %218, %217 : vector<2x128xf32>
    %220 = arith.divf %218, %219 : vector<2x128xf32>
    %221 = arith.mulf %212, %192 : vector<2x128xf32>
    %222 = arith.mulf %206, %214 : vector<2x128xf32>
    %223 = arith.addf %221, %222 : vector<2x128xf32>
    %224 = math.tanh %223 : vector<2x128xf32>
    %225 = arith.mulf %220, %224 : vector<2x128xf32>
    %c12_71 = arith.constant 12 : index
    %c0_72 = arith.constant 0 : index
    %226 = vector.load %arg8[%c12_71, %c0_72] : memref<16x128xf32, #tpu.memory_space<vmem>>, vector<2x128xf32>
    tpu.vector_store %arg8[%c12_71, %c0_72], %225 {strides = array<i32>} : memref<16x128xf32, #tpu.memory_space<vmem>>, vector<2x128xf32>,
    %c14 = arith.constant 14 : index
    %c0_73 = arith.constant 0 : index
    %227 = vector.load %arg7[%c14, %c0_73] : memref<16x512xf32, #tpu.memory_space<vmem>>, vector<2x512xf32>
    %228 = arith.truncf %225 : vector<2x128xf32> to vector<2x128xbf16>
    %c0_74 = arith.constant 0 : index
    %c0_75 = arith.constant 0 : index
    %229 = vector.load %arg2[%c0_74, %c0_75] : memref<128x512xbf16, #tpu.memory_space<vmem>>, vector<128x512xbf16>
    %cst_76 = arith.constant dense<0.000000e+00> : vector<2x512xf32>
    %230 = tpu.matmul %228, %229, %cst_76 {dimension_numbers = #tpu.dot_dimension_numbers<[1], [0], [0], [1], [0, 0, 1, 1], [], []>} : vector<2x128xbf16>, vector<128x512xbf16>, vector<2x512xf32> -> vector<2x512xf32>
    %231 = arith.addf %227, %230 : vector<2x512xf32>
    %232 = vector.extract_strided_slice %231 {offsets = [0, 0], sizes = [2, 128], strides = [1, 1]} : vector<2x512xf32> to vector<2x128xf32>
    %233 = arith.negf %232 : vector<2x128xf32>
    %234 = math.exp %233 : vector<2x128xf32>
    %cst_77 = arith.constant 1.000000e+00 : f32
    %235 = vector.broadcast %cst_77 : f32 to vector<2x128xf32>
    %236 = arith.addf %235, %234 : vector<2x128xf32>
    %237 = arith.divf %235, %236 : vector<2x128xf32>
    %238 = vector.extract_strided_slice %231 {offsets = [0, 128], sizes = [2, 128], strides = [1, 1]} : vector<2x512xf32> to vector<2x128xf32>
    %239 = arith.negf %238 : vector<2x128xf32>
    %240 = math.exp %239 : vector<2x128xf32>
    %cst_78 = arith.constant 1.000000e+00 : f32
    %241 = vector.broadcast %cst_78 : f32 to vector<2x128xf32>
    %242 = arith.addf %241, %240 : vector<2x128xf32>
    %243 = arith.divf %241, %242 : vector<2x128xf32>
    %244 = vector.extract_strided_slice %231 {offsets = [0, 256], sizes = [2, 128], strides = [1, 1]} : vector<2x512xf32> to vector<2x128xf32>
    %245 = math.tanh %244 : vector<2x128xf32>
    %246 = vector.extract_strided_slice %231 {offsets = [0, 384], sizes = [2, 128], strides = [1, 1]} : vector<2x512xf32> to vector<2x128xf32>
    %247 = arith.negf %246 : vector<2x128xf32>
    %248 = math.exp %247 : vector<2x128xf32>
    %cst_79 = arith.constant 1.000000e+00 : f32
    %249 = vector.broadcast %cst_79 : f32 to vector<2x128xf32>
    %250 = arith.addf %249, %248 : vector<2x128xf32>
    %251 = arith.divf %249, %250 : vector<2x128xf32>
    %252 = arith.mulf %243, %223 : vector<2x128xf32>
    %253 = arith.mulf %237, %245 : vector<2x128xf32>
    %254 = arith.addf %252, %253 : vector<2x128xf32>
    %255 = math.tanh %254 : vector<2x128xf32>
    %256 = arith.mulf %251, %255 : vector<2x128xf32>
    %c14_80 = arith.constant 14 : index
    %c0_81 = arith.constant 0 : index
    %257 = vector.load %arg8[%c14_80, %c0_81] : memref<16x128xf32, #tpu.memory_space<vmem>>, vector<2x128xf32>
    tpu.vector_store %arg8[%c14_80, %c0_81], %256 {strides = array<i32>} : memref<16x128xf32, #tpu.memory_space<vmem>>, vector<2x128xf32>,
    %c0_82 = arith.constant 0 : index
    %c0_83 = arith.constant 0 : index
    %258 = vector.load %arg8[%c0_82, %c0_83] : memref<16x128xf32, #tpu.memory_space<vmem>>, vector<16x128xf32>
    %259 = arith.truncf %258 : vector<16x128xf32> to vector<16x128xbf16>
    %c0_84 = arith.constant 0 : index
    %c0_85 = arith.constant 0 : index
    %260 = vector.load %arg4[%c0_84, %c0_85] : memref<128x512xbf16, #tpu.memory_space<vmem>>, vector<128x512xbf16>
    %cst_86 = arith.constant dense<0.000000e+00> : vector<16x512xf32>
    %261 = tpu.matmul %259, %260, %cst_86 {dimension_numbers = #tpu.dot_dimension_numbers<[1], [0], [0], [1], [0, 0, 1, 1], [], []>} : vector<16x128xbf16>, vector<128x512xbf16>, vector<16x512xf32> -> vector<16x512xf32>
    %c0_87 = arith.constant 0 : index
    %c0_88 = arith.constant 0 : index
    %262 = vector.load %arg5[%c0_87, %c0_88] : memref<1x512xf32, #tpu.memory_space<vmem>>, vector<1x512xf32>
    %263 = vector.broadcast %262 : vector<1x512xf32> to vector<16x512xf32>
    %264 = arith.addf %261, %263 : vector<16x512xf32>
    %c0_89 = arith.constant 0 : index
    %c0_90 = arith.constant 0 : index
    %265 = vector.load %arg6[%c0_89, %c0_90] : memref<16x512xf32, #tpu.memory_space<vmem>>, vector<16x512xf32>
    tpu.vector_store %arg6[%c0_89, %c0_90], %264 {strides = array<i32>} : memref<16x512xf32, #tpu.memory_space<vmem>>, vector<16x512xf32>,
    return
  }
}

module attributes {stable_mosaic.version = 11 : i64} {
  func.func @_encoder_stack_kernel(%arg0: i32, %arg1: memref<16x128xf32, #tpu.memory_space<vmem>>, %arg2: memref<1x128xf32, #tpu.memory_space<vmem>>, %arg3: memref<1x128xf32, #tpu.memory_space<vmem>>, %arg4: memref<1x128x384xbf16, #tpu.memory_space<vmem>>, %arg5: memref<1x1x384xf32, #tpu.memory_space<vmem>>, %arg6: memref<1x128x128xbf16, #tpu.memory_space<vmem>>, %arg7: memref<1x1x128xf32, #tpu.memory_space<vmem>>, %arg8: memref<1x1x128xf32, #tpu.memory_space<vmem>>, %arg9: memref<1x1x128xf32, #tpu.memory_space<vmem>>, %arg10: memref<1x128x512xbf16, #tpu.memory_space<vmem>>, %arg11: memref<1x1x512xf32, #tpu.memory_space<vmem>>, %arg12: memref<1x512x128xbf16, #tpu.memory_space<vmem>>, %arg13: memref<1x1x128xf32, #tpu.memory_space<vmem>>, %arg14: memref<1x1x128xf32, #tpu.memory_space<vmem>>, %arg15: memref<1x1x128xf32, #tpu.memory_space<vmem>>, %arg16: memref<16x128xf32, #tpu.memory_space<vmem>>) attributes {dimension_semantics = [#tpu.dimension_semantics<arbitrary>], iteration_bounds = array<i64: 2>, scalar_prefetch = 0 : i64, scratch_operands = 0 : i64, tpu.core_type = #tpu.core_type<tc>, window_params = [{pipeline_mode = #tpu.pipeline_mode<synchronous>, transform_indices = @transform_0, window_bounds = array<i64: 16, 128>}, {pipeline_mode = #tpu.pipeline_mode<synchronous>, transform_indices = @transform_1, window_bounds = array<i64: 1, 128>}, {pipeline_mode = #tpu.pipeline_mode<synchronous>, transform_indices = @transform_2, window_bounds = array<i64: 1, 128>}, {transform_indices = @transform_3, window_bounds = array<i64: 1, 128, 384>}, {transform_indices = @transform_4, window_bounds = array<i64: 1, 1, 384>}, {transform_indices = @transform_5, window_bounds = array<i64: 1, 128, 128>}, {transform_indices = @transform_6, window_bounds = array<i64: 1, 1, 128>}, {transform_indices = @transform_7, window_bounds = array<i64: 1, 1, 128>}, {transform_indices = @transform_8, window_bounds = array<i64: 1, 1, 128>}, {transform_indices = @transform_9, window_bounds = array<i64: 1, 128, 512>}, {transform_indices = @transform_10, window_bounds = array<i64: 1, 1, 512>}, {transform_indices = @transform_11, window_bounds = array<i64: 1, 512, 128>}, {transform_indices = @transform_12, window_bounds = array<i64: 1, 1, 128>}, {transform_indices = @transform_13, window_bounds = array<i64: 1, 1, 128>}, {transform_indices = @transform_14, window_bounds = array<i64: 1, 1, 128>}, {pipeline_mode = #tpu.pipeline_mode<synchronous>, transform_indices = @transform_15, window_bounds = array<i64: 16, 128>}]} {
    %c0_i32 = arith.constant 0 : i32
    %0 = arith.cmpi eq, %arg0, %c0_i32 : i32
    %1 = arith.extui %0 : i1 to i32
    %c0_i32_0 = arith.constant 0 : i32
    %2 = arith.cmpi ne, %1, %c0_i32_0 : i32
    scf.if %2 {
      %c0_83 = arith.constant 0 : index
      %c0_84 = arith.constant 0 : index
      %211 = vector.load %arg1[%c0_83, %c0_84] : memref<16x128xf32, #tpu.memory_space<vmem>>, vector<16x128xf32>
      %c0_85 = arith.constant 0 : index
      %c0_86 = arith.constant 0 : index
      %212 = vector.load %arg2[%c0_85, %c0_86] : memref<1x128xf32, #tpu.memory_space<vmem>>, vector<1x128xf32>
      %c0_87 = arith.constant 0 : index
      %c0_88 = arith.constant 0 : index
      %213 = vector.load %arg3[%c0_87, %c0_88] : memref<1x128xf32, #tpu.memory_space<vmem>>, vector<1x128xf32>
      %cst_89 = arith.constant dense<0.000000e+00> : vector<16xf32>
      %214 = vector.multi_reduction <add>, %211, %cst_89 [1] : vector<16x128xf32> to vector<16xf32>
      %215 = vector.shape_cast %214 : vector<16xf32> to vector<16x1xf32>
      %cst_90 = arith.constant 1.280000e+02 : f32
      %216 = vector.broadcast %cst_90 : f32 to vector<16x1xf32>
      %217 = arith.divf %215, %216 : vector<16x1xf32>
      %218 = vector.broadcast %217 : vector<16x1xf32> to vector<16x128xf32>
      %219 = arith.subf %211, %218 : vector<16x128xf32>
      %220 = vector.broadcast %217 : vector<16x1xf32> to vector<16x128xf32>
      %221 = arith.subf %211, %220 : vector<16x128xf32>
      %222 = arith.mulf %219, %221 : vector<16x128xf32>
      %cst_91 = arith.constant dense<0.000000e+00> : vector<16xf32>
      %223 = vector.multi_reduction <add>, %222, %cst_91 [1] : vector<16x128xf32> to vector<16xf32>
      %224 = vector.shape_cast %223 : vector<16xf32> to vector<16x1xf32>
      %cst_92 = arith.constant 1.280000e+02 : f32
      %225 = vector.broadcast %cst_92 : f32 to vector<16x1xf32>
      %226 = arith.divf %224, %225 : vector<16x1xf32>
      %227 = vector.broadcast %217 : vector<16x1xf32> to vector<16x128xf32>
      %228 = arith.subf %211, %227 : vector<16x128xf32>
      %cst_93 = arith.constant 9.99999996E-13 : f32
      %229 = vector.broadcast %cst_93 : f32 to vector<16x1xf32>
      %230 = arith.addf %226, %229 : vector<16x1xf32>
      %231 = math.rsqrt %230 : vector<16x1xf32>
      %232 = vector.broadcast %231 : vector<16x1xf32> to vector<16x128xf32>
      %233 = arith.mulf %228, %232 : vector<16x128xf32>
      %234 = vector.broadcast %212 : vector<1x128xf32> to vector<16x128xf32>
      %235 = arith.mulf %233, %234 : vector<16x128xf32>
      %236 = vector.broadcast %213 : vector<1x128xf32> to vector<16x128xf32>
      %237 = arith.addf %235, %236 : vector<16x128xf32>
      %c0_94 = arith.constant 0 : index
      %c0_95 = arith.constant 0 : index
      %238 = vector.load %arg16[%c0_94, %c0_95] : memref<16x128xf32, #tpu.memory_space<vmem>>, vector<16x128xf32>
      tpu.vector_store %arg16[%c0_94, %c0_95], %237 {strides = array<i32>} : memref<16x128xf32, #tpu.memory_space<vmem>>, vector<16x128xf32>,
    } else {
    }
    %c0 = arith.constant 0 : index
    %c0_1 = arith.constant 0 : index
    %3 = vector.load %arg16[%c0, %c0_1] : memref<16x128xf32, #tpu.memory_space<vmem>>, vector<16x128xf32>
    %4 = arith.truncf %3 : vector<16x128xf32> to vector<16x128xbf16>
    %c0_2 = arith.constant 0 : index
    %c0_3 = arith.constant 0 : index
    %c0_4 = arith.constant 0 : index
    %5 = vector.load %arg4[%c0_2, %c0_3, %c0_4] : memref<1x128x384xbf16, #tpu.memory_space<vmem>>, vector<1x128x384xbf16>
    %6 = vector.shape_cast %5 : vector<1x128x384xbf16> to vector<128x384xbf16>
    %cst = arith.constant dense<0.000000e+00> : vector<16x384xf32>
    %7 = tpu.matmul %4, %6, %cst {dimension_numbers = #tpu.dot_dimension_numbers<[1], [0], [0], [1], [0, 0, 1, 1], [], []>} : vector<16x128xbf16>, vector<128x384xbf16>, vector<16x384xf32> -> vector<16x384xf32>
    %c0_5 = arith.constant 0 : index
    %c0_6 = arith.constant 0 : index
    %c0_7 = arith.constant 0 : index
    %8 = vector.load %arg5[%c0_5, %c0_6, %c0_7] : memref<1x1x384xf32, #tpu.memory_space<vmem>>, vector<1x1x384xf32>
    %9 = vector.shape_cast %8 : vector<1x1x384xf32> to vector<1x384xf32>
    %10 = vector.broadcast %9 : vector<1x384xf32> to vector<16x384xf32>
    %11 = arith.addf %7, %10 : vector<16x384xf32>
    %12 = vector.extract_strided_slice %11 {offsets = [0, 0], sizes = [16, 128], strides = [1, 1]} : vector<16x384xf32> to vector<16x128xf32>
    %13 = vector.shape_cast %12 : vector<16x128xf32> to vector<2x8x128xf32>
    %14 = vector.extract_strided_slice %11 {offsets = [0, 128], sizes = [16, 128], strides = [1, 1]} : vector<16x384xf32> to vector<16x128xf32>
    %15 = vector.shape_cast %14 : vector<16x128xf32> to vector<2x8x128xf32>
    %16 = vector.extract_strided_slice %11 {offsets = [0, 256], sizes = [16, 128], strides = [1, 1]} : vector<16x384xf32> to vector<16x128xf32>
    %17 = vector.shape_cast %16 : vector<16x128xf32> to vector<2x8x128xf32>
    %cst_8 = arith.constant 0.000000e+00 : f32
    %18 = vector.broadcast %cst_8 : f32 to vector<16x128xf32>
    %19 = vector.extract_strided_slice %13 {offsets = [0, 0, 0], sizes = [2, 8, 32], strides = [1, 1, 1]} : vector<2x8x128xf32> to vector<2x8x32xf32>
    %20 = arith.truncf %19 : vector<2x8x32xf32> to vector<2x8x32xbf16>
    %21 = vector.extract_strided_slice %15 {offsets = [0, 0, 0], sizes = [2, 8, 32], strides = [1, 1, 1]} : vector<2x8x128xf32> to vector<2x8x32xf32>
    %22 = arith.truncf %21 : vector<2x8x32xf32> to vector<2x8x32xbf16>
    %23 = vector.extract_strided_slice %17 {offsets = [0, 0, 0], sizes = [2, 8, 32], strides = [1, 1, 1]} : vector<2x8x128xf32> to vector<2x8x32xf32>
    %24 = arith.truncf %23 : vector<2x8x32xf32> to vector<2x8x32xbf16>
    "tpu.trace_start"() <{level = 10 : i32, message = "bqd,bkd->bqk"}> : () -> ()
    %cst_9 = arith.constant dense<0.000000e+00> : vector<2x8x8xf32>
    %25 = tpu.matmul %20, %22, %cst_9 {dimension_numbers = #tpu.dot_dimension_numbers<[2], [2], [1], [1], [0, 0, 0, 1, 1, 1], [0], [0]>} : vector<2x8x32xbf16>, vector<2x8x32xbf16>, vector<2x8x8xf32> -> vector<2x8x8xf32>
    "tpu.trace_stop"() : () -> ()
    %cst_10 = arith.constant dense<0xFF800000> : vector<2x8xf32>
    %26 = vector.multi_reduction <maximumf>, %25, %cst_10 [2] : vector<2x8x8xf32> to vector<2x8xf32>
    %27 = vector.shape_cast %26 : vector<2x8xf32> to vector<2x8x1xf32>
    %28 = vector.broadcast %27 : vector<2x8x1xf32> to vector<2x8x8xf32>
    %29 = arith.subf %25, %28 : vector<2x8x8xf32>
    %30 = math.exp %29 : vector<2x8x8xf32>
    %cst_11 = arith.constant dense<0.000000e+00> : vector<2x8xf32>
    %31 = vector.multi_reduction <add>, %30, %cst_11 [2] : vector<2x8x8xf32> to vector<2x8xf32>
    %32 = vector.shape_cast %31 : vector<2x8xf32> to vector<2x8x1xf32>
    %33 = tpu.reciprocal %32 {approx = true} : vector<2x8x1xf32> -> vector<2x8x1xf32>
    %34 = vector.broadcast %33 : vector<2x8x1xf32> to vector<2x8x8xf32>
    %35 = arith.mulf %30, %34 : vector<2x8x8xf32>
    %36 = arith.truncf %35 : vector<2x8x8xf32> to vector<2x8x8xbf16>
    "tpu.trace_start"() <{level = 10 : i32, message = "bqk,bkd->bqd"}> : () -> ()
    %cst_12 = arith.constant dense<0.000000e+00> : vector<2x8x32xf32>
    %37 = tpu.matmul %36, %24, %cst_12 {dimension_numbers = #tpu.dot_dimension_numbers<[2], [1], [1], [2], [0, 0, 0, 1, 1, 2], [0], [0]>} : vector<2x8x8xbf16>, vector<2x8x32xbf16>, vector<2x8x32xf32> -> vector<2x8x32xf32>
    "tpu.trace_stop"() : () -> ()
    %38 = vector.shape_cast %37 : vector<2x8x32xf32> to vector<16x32xf32>
    %39 = arith.truncf %38 : vector<16x32xf32> to vector<16x32xbf16>
    %c0_13 = arith.constant 0 : index
    %c0_14 = arith.constant 0 : index
    %c0_15 = arith.constant 0 : index
    %40 = vector.load %arg6[%c0_13, %c0_14, %c0_15] : memref<1x128x128xbf16, #tpu.memory_space<vmem>>, vector<1x32x128xbf16>
    %41 = vector.shape_cast %40 : vector<1x32x128xbf16> to vector<32x128xbf16>
    %cst_16 = arith.constant dense<0.000000e+00> : vector<16x128xf32>
    %42 = tpu.matmul %39, %41, %cst_16 {dimension_numbers = #tpu.dot_dimension_numbers<[1], [0], [0], [1], [0, 0, 1, 1], [], []>} : vector<16x32xbf16>, vector<32x128xbf16>, vector<16x128xf32> -> vector<16x128xf32>
    %43 = arith.addf %18, %42 : vector<16x128xf32>
    %44 = vector.extract_strided_slice %13 {offsets = [0, 0, 32], sizes = [2, 8, 32], strides = [1, 1, 1]} : vector<2x8x128xf32> to vector<2x8x32xf32>
    %45 = arith.truncf %44 : vector<2x8x32xf32> to vector<2x8x32xbf16>
    %46 = vector.extract_strided_slice %15 {offsets = [0, 0, 32], sizes = [2, 8, 32], strides = [1, 1, 1]} : vector<2x8x128xf32> to vector<2x8x32xf32>
    %47 = arith.truncf %46 : vector<2x8x32xf32> to vector<2x8x32xbf16>
    %48 = vector.extract_strided_slice %17 {offsets = [0, 0, 32], sizes = [2, 8, 32], strides = [1, 1, 1]} : vector<2x8x128xf32> to vector<2x8x32xf32>
    %49 = arith.truncf %48 : vector<2x8x32xf32> to vector<2x8x32xbf16>
    "tpu.trace_start"() <{level = 10 : i32, message = "bqd,bkd->bqk"}> : () -> ()
    %cst_17 = arith.constant dense<0.000000e+00> : vector<2x8x8xf32>
    %50 = tpu.matmul %45, %47, %cst_17 {dimension_numbers = #tpu.dot_dimension_numbers<[2], [2], [1], [1], [0, 0, 0, 1, 1, 1], [0], [0]>} : vector<2x8x32xbf16>, vector<2x8x32xbf16>, vector<2x8x8xf32> -> vector<2x8x8xf32>
    "tpu.trace_stop"() : () -> ()
    %cst_18 = arith.constant dense<0xFF800000> : vector<2x8xf32>
    %51 = vector.multi_reduction <maximumf>, %50, %cst_18 [2] : vector<2x8x8xf32> to vector<2x8xf32>
    %52 = vector.shape_cast %51 : vector<2x8xf32> to vector<2x8x1xf32>
    %53 = vector.broadcast %52 : vector<2x8x1xf32> to vector<2x8x8xf32>
    %54 = arith.subf %50, %53 : vector<2x8x8xf32>
    %55 = math.exp %54 : vector<2x8x8xf32>
    %cst_19 = arith.constant dense<0.000000e+00> : vector<2x8xf32>
    %56 = vector.multi_reduction <add>, %55, %cst_19 [2] : vector<2x8x8xf32> to vector<2x8xf32>
    %57 = vector.shape_cast %56 : vector<2x8xf32> to vector<2x8x1xf32>
    %58 = tpu.reciprocal %57 {approx = true} : vector<2x8x1xf32> -> vector<2x8x1xf32>
    %59 = vector.broadcast %58 : vector<2x8x1xf32> to vector<2x8x8xf32>
    %60 = arith.mulf %55, %59 : vector<2x8x8xf32>
    %61 = arith.truncf %60 : vector<2x8x8xf32> to vector<2x8x8xbf16>
    "tpu.trace_start"() <{level = 10 : i32, message = "bqk,bkd->bqd"}> : () -> ()
    %cst_20 = arith.constant dense<0.000000e+00> : vector<2x8x32xf32>
    %62 = tpu.matmul %61, %49, %cst_20 {dimension_numbers = #tpu.dot_dimension_numbers<[2], [1], [1], [2], [0, 0, 0, 1, 1, 2], [0], [0]>} : vector<2x8x8xbf16>, vector<2x8x32xbf16>, vector<2x8x32xf32> -> vector<2x8x32xf32>
    "tpu.trace_stop"() : () -> ()
    %63 = vector.shape_cast %62 : vector<2x8x32xf32> to vector<16x32xf32>
    %64 = arith.truncf %63 : vector<16x32xf32> to vector<16x32xbf16>
    %c0_21 = arith.constant 0 : index
    %c32 = arith.constant 32 : index
    %c0_22 = arith.constant 0 : index
    %65 = vector.load %arg6[%c0_21, %c32, %c0_22] : memref<1x128x128xbf16, #tpu.memory_space<vmem>>, vector<1x32x128xbf16>
    %66 = vector.shape_cast %65 : vector<1x32x128xbf16> to vector<32x128xbf16>
    %cst_23 = arith.constant dense<0.000000e+00> : vector<16x128xf32>
    %67 = tpu.matmul %64, %66, %cst_23 {dimension_numbers = #tpu.dot_dimension_numbers<[1], [0], [0], [1], [0, 0, 1, 1], [], []>} : vector<16x32xbf16>, vector<32x128xbf16>, vector<16x128xf32> -> vector<16x128xf32>
    %68 = arith.addf %43, %67 : vector<16x128xf32>
    %69 = vector.extract_strided_slice %13 {offsets = [0, 0, 64], sizes = [2, 8, 32], strides = [1, 1, 1]} : vector<2x8x128xf32> to vector<2x8x32xf32>
    %70 = arith.truncf %69 : vector<2x8x32xf32> to vector<2x8x32xbf16>
    %71 = vector.extract_strided_slice %15 {offsets = [0, 0, 64], sizes = [2, 8, 32], strides = [1, 1, 1]} : vector<2x8x128xf32> to vector<2x8x32xf32>
    %72 = arith.truncf %71 : vector<2x8x32xf32> to vector<2x8x32xbf16>
    %73 = vector.extract_strided_slice %17 {offsets = [0, 0, 64], sizes = [2, 8, 32], strides = [1, 1, 1]} : vector<2x8x128xf32> to vector<2x8x32xf32>
    %74 = arith.truncf %73 : vector<2x8x32xf32> to vector<2x8x32xbf16>
    "tpu.trace_start"() <{level = 10 : i32, message = "bqd,bkd->bqk"}> : () -> ()
    %cst_24 = arith.constant dense<0.000000e+00> : vector<2x8x8xf32>
    %75 = tpu.matmul %70, %72, %cst_24 {dimension_numbers = #tpu.dot_dimension_numbers<[2], [2], [1], [1], [0, 0, 0, 1, 1, 1], [0], [0]>} : vector<2x8x32xbf16>, vector<2x8x32xbf16>, vector<2x8x8xf32> -> vector<2x8x8xf32>
    "tpu.trace_stop"() : () -> ()
    %cst_25 = arith.constant dense<0xFF800000> : vector<2x8xf32>
    %76 = vector.multi_reduction <maximumf>, %75, %cst_25 [2] : vector<2x8x8xf32> to vector<2x8xf32>
    %77 = vector.shape_cast %76 : vector<2x8xf32> to vector<2x8x1xf32>
    %78 = vector.broadcast %77 : vector<2x8x1xf32> to vector<2x8x8xf32>
    %79 = arith.subf %75, %78 : vector<2x8x8xf32>
    %80 = math.exp %79 : vector<2x8x8xf32>
    %cst_26 = arith.constant dense<0.000000e+00> : vector<2x8xf32>
    %81 = vector.multi_reduction <add>, %80, %cst_26 [2] : vector<2x8x8xf32> to vector<2x8xf32>
    %82 = vector.shape_cast %81 : vector<2x8xf32> to vector<2x8x1xf32>
    %83 = tpu.reciprocal %82 {approx = true} : vector<2x8x1xf32> -> vector<2x8x1xf32>
    %84 = vector.broadcast %83 : vector<2x8x1xf32> to vector<2x8x8xf32>
    %85 = arith.mulf %80, %84 : vector<2x8x8xf32>
    %86 = arith.truncf %85 : vector<2x8x8xf32> to vector<2x8x8xbf16>
    "tpu.trace_start"() <{level = 10 : i32, message = "bqk,bkd->bqd"}> : () -> ()
    %cst_27 = arith.constant dense<0.000000e+00> : vector<2x8x32xf32>
    %87 = tpu.matmul %86, %74, %cst_27 {dimension_numbers = #tpu.dot_dimension_numbers<[2], [1], [1], [2], [0, 0, 0, 1, 1, 2], [0], [0]>} : vector<2x8x8xbf16>, vector<2x8x32xbf16>, vector<2x8x32xf32> -> vector<2x8x32xf32>
    "tpu.trace_stop"() : () -> ()
    %88 = vector.shape_cast %87 : vector<2x8x32xf32> to vector<16x32xf32>
    %89 = arith.truncf %88 : vector<16x32xf32> to vector<16x32xbf16>
    %c0_28 = arith.constant 0 : index
    %c64 = arith.constant 64 : index
    %c0_29 = arith.constant 0 : index
    %90 = vector.load %arg6[%c0_28, %c64, %c0_29] : memref<1x128x128xbf16, #tpu.memory_space<vmem>>, vector<1x32x128xbf16>
    %91 = vector.shape_cast %90 : vector<1x32x128xbf16> to vector<32x128xbf16>
    %cst_30 = arith.constant dense<0.000000e+00> : vector<16x128xf32>
    %92 = tpu.matmul %89, %91, %cst_30 {dimension_numbers = #tpu.dot_dimension_numbers<[1], [0], [0], [1], [0, 0, 1, 1], [], []>} : vector<16x32xbf16>, vector<32x128xbf16>, vector<16x128xf32> -> vector<16x128xf32>
    %93 = arith.addf %68, %92 : vector<16x128xf32>
    %94 = vector.extract_strided_slice %13 {offsets = [0, 0, 96], sizes = [2, 8, 32], strides = [1, 1, 1]} : vector<2x8x128xf32> to vector<2x8x32xf32>
    %95 = arith.truncf %94 : vector<2x8x32xf32> to vector<2x8x32xbf16>
    %96 = vector.extract_strided_slice %15 {offsets = [0, 0, 96], sizes = [2, 8, 32], strides = [1, 1, 1]} : vector<2x8x128xf32> to vector<2x8x32xf32>
    %97 = arith.truncf %96 : vector<2x8x32xf32> to vector<2x8x32xbf16>
    %98 = vector.extract_strided_slice %17 {offsets = [0, 0, 96], sizes = [2, 8, 32], strides = [1, 1, 1]} : vector<2x8x128xf32> to vector<2x8x32xf32>
    %99 = arith.truncf %98 : vector<2x8x32xf32> to vector<2x8x32xbf16>
    "tpu.trace_start"() <{level = 10 : i32, message = "bqd,bkd->bqk"}> : () -> ()
    %cst_31 = arith.constant dense<0.000000e+00> : vector<2x8x8xf32>
    %100 = tpu.matmul %95, %97, %cst_31 {dimension_numbers = #tpu.dot_dimension_numbers<[2], [2], [1], [1], [0, 0, 0, 1, 1, 1], [0], [0]>} : vector<2x8x32xbf16>, vector<2x8x32xbf16>, vector<2x8x8xf32> -> vector<2x8x8xf32>
    "tpu.trace_stop"() : () -> ()
    %cst_32 = arith.constant dense<0xFF800000> : vector<2x8xf32>
    %101 = vector.multi_reduction <maximumf>, %100, %cst_32 [2] : vector<2x8x8xf32> to vector<2x8xf32>
    %102 = vector.shape_cast %101 : vector<2x8xf32> to vector<2x8x1xf32>
    %103 = vector.broadcast %102 : vector<2x8x1xf32> to vector<2x8x8xf32>
    %104 = arith.subf %100, %103 : vector<2x8x8xf32>
    %105 = math.exp %104 : vector<2x8x8xf32>
    %cst_33 = arith.constant dense<0.000000e+00> : vector<2x8xf32>
    %106 = vector.multi_reduction <add>, %105, %cst_33 [2] : vector<2x8x8xf32> to vector<2x8xf32>
    %107 = vector.shape_cast %106 : vector<2x8xf32> to vector<2x8x1xf32>
    %108 = tpu.reciprocal %107 {approx = true} : vector<2x8x1xf32> -> vector<2x8x1xf32>
    %109 = vector.broadcast %108 : vector<2x8x1xf32> to vector<2x8x8xf32>
    %110 = arith.mulf %105, %109 : vector<2x8x8xf32>
    %111 = arith.truncf %110 : vector<2x8x8xf32> to vector<2x8x8xbf16>
    "tpu.trace_start"() <{level = 10 : i32, message = "bqk,bkd->bqd"}> : () -> ()
    %cst_34 = arith.constant dense<0.000000e+00> : vector<2x8x32xf32>
    %112 = tpu.matmul %111, %99, %cst_34 {dimension_numbers = #tpu.dot_dimension_numbers<[2], [1], [1], [2], [0, 0, 0, 1, 1, 2], [0], [0]>} : vector<2x8x8xbf16>, vector<2x8x32xbf16>, vector<2x8x32xf32> -> vector<2x8x32xf32>
    "tpu.trace_stop"() : () -> ()
    %113 = vector.shape_cast %112 : vector<2x8x32xf32> to vector<16x32xf32>
    %114 = arith.truncf %113 : vector<16x32xf32> to vector<16x32xbf16>
    %c0_35 = arith.constant 0 : index
    %c96 = arith.constant 96 : index
    %c0_36 = arith.constant 0 : index
    %115 = vector.load %arg6[%c0_35, %c96, %c0_36] : memref<1x128x128xbf16, #tpu.memory_space<vmem>>, vector<1x32x128xbf16>
    %116 = vector.shape_cast %115 : vector<1x32x128xbf16> to vector<32x128xbf16>
    %cst_37 = arith.constant dense<0.000000e+00> : vector<16x128xf32>
    %117 = tpu.matmul %114, %116, %cst_37 {dimension_numbers = #tpu.dot_dimension_numbers<[1], [0], [0], [1], [0, 0, 1, 1], [], []>} : vector<16x32xbf16>, vector<32x128xbf16>, vector<16x128xf32> -> vector<16x128xf32>
    %118 = arith.addf %93, %117 : vector<16x128xf32>
    %c0_38 = arith.constant 0 : index
    %c0_39 = arith.constant 0 : index
    %c0_40 = arith.constant 0 : index
    %119 = vector.load %arg7[%c0_38, %c0_39, %c0_40] : memref<1x1x128xf32, #tpu.memory_space<vmem>>, vector<1x1x128xf32>
    %120 = vector.shape_cast %119 : vector<1x1x128xf32> to vector<1x128xf32>
    %121 = vector.broadcast %120 : vector<1x128xf32> to vector<16x128xf32>
    %122 = arith.addf %118, %121 : vector<16x128xf32>
    %123 = arith.addf %3, %122 : vector<16x128xf32>
    %c0_41 = arith.constant 0 : index
    %c0_42 = arith.constant 0 : index
    %c0_43 = arith.constant 0 : index
    %124 = vector.load %arg8[%c0_41, %c0_42, %c0_43] : memref<1x1x128xf32, #tpu.memory_space<vmem>>, vector<1x1x128xf32>
    %125 = vector.shape_cast %124 : vector<1x1x128xf32> to vector<1x128xf32>
    %c0_44 = arith.constant 0 : index
    %c0_45 = arith.constant 0 : index
    %c0_46 = arith.constant 0 : index
    %126 = vector.load %arg9[%c0_44, %c0_45, %c0_46] : memref<1x1x128xf32, #tpu.memory_space<vmem>>, vector<1x1x128xf32>
    %127 = vector.shape_cast %126 : vector<1x1x128xf32> to vector<1x128xf32>
    %cst_47 = arith.constant dense<0.000000e+00> : vector<16xf32>
    %128 = vector.multi_reduction <add>, %123, %cst_47 [1] : vector<16x128xf32> to vector<16xf32>
    %129 = vector.shape_cast %128 : vector<16xf32> to vector<16x1xf32>
    %cst_48 = arith.constant 1.280000e+02 : f32
    %130 = vector.broadcast %cst_48 : f32 to vector<16x1xf32>
    %131 = arith.divf %129, %130 : vector<16x1xf32>
    %132 = vector.broadcast %131 : vector<16x1xf32> to vector<16x128xf32>
    %133 = arith.subf %123, %132 : vector<16x128xf32>
    %134 = vector.broadcast %131 : vector<16x1xf32> to vector<16x128xf32>
    %135 = arith.subf %123, %134 : vector<16x128xf32>
    %136 = arith.mulf %133, %135 : vector<16x128xf32>
    %cst_49 = arith.constant dense<0.000000e+00> : vector<16xf32>
    %137 = vector.multi_reduction <add>, %136, %cst_49 [1] : vector<16x128xf32> to vector<16xf32>
    %138 = vector.shape_cast %137 : vector<16xf32> to vector<16x1xf32>
    %cst_50 = arith.constant 1.280000e+02 : f32
    %139 = vector.broadcast %cst_50 : f32 to vector<16x1xf32>
    %140 = arith.divf %138, %139 : vector<16x1xf32>
    %141 = vector.broadcast %131 : vector<16x1xf32> to vector<16x128xf32>
    %142 = arith.subf %123, %141 : vector<16x128xf32>
    %cst_51 = arith.constant 9.99999996E-13 : f32
    %143 = vector.broadcast %cst_51 : f32 to vector<16x1xf32>
    %144 = arith.addf %140, %143 : vector<16x1xf32>
    %145 = math.rsqrt %144 : vector<16x1xf32>
    %146 = vector.broadcast %145 : vector<16x1xf32> to vector<16x128xf32>
    %147 = arith.mulf %142, %146 : vector<16x128xf32>
    %148 = vector.broadcast %125 : vector<1x128xf32> to vector<16x128xf32>
    %149 = arith.mulf %147, %148 : vector<16x128xf32>
    %150 = vector.broadcast %127 : vector<1x128xf32> to vector<16x128xf32>
    %151 = arith.addf %149, %150 : vector<16x128xf32>
    %152 = arith.truncf %151 : vector<16x128xf32> to vector<16x128xbf16>
    %c0_52 = arith.constant 0 : index
    %c0_53 = arith.constant 0 : index
    %c0_54 = arith.constant 0 : index
    %153 = vector.load %arg10[%c0_52, %c0_53, %c0_54] : memref<1x128x512xbf16, #tpu.memory_space<vmem>>, vector<1x128x512xbf16>
    %154 = vector.shape_cast %153 : vector<1x128x512xbf16> to vector<128x512xbf16>
    %cst_55 = arith.constant dense<0.000000e+00> : vector<16x512xf32>
    %155 = tpu.matmul %152, %154, %cst_55 {dimension_numbers = #tpu.dot_dimension_numbers<[1], [0], [0], [1], [0, 0, 1, 1], [], []>} : vector<16x128xbf16>, vector<128x512xbf16>, vector<16x512xf32> -> vector<16x512xf32>
    %c0_56 = arith.constant 0 : index
    %c0_57 = arith.constant 0 : index
    %c0_58 = arith.constant 0 : index
    %156 = vector.load %arg11[%c0_56, %c0_57, %c0_58] : memref<1x1x512xf32, #tpu.memory_space<vmem>>, vector<1x1x512xf32>
    %157 = vector.shape_cast %156 : vector<1x1x512xf32> to vector<1x512xf32>
    %158 = vector.broadcast %157 : vector<1x512xf32> to vector<16x512xf32>
    %159 = arith.addf %155, %158 : vector<16x512xf32>
    %cst_59 = arith.constant 5.000000e-01 : f32
    %160 = vector.broadcast %cst_59 : f32 to vector<16x512xf32>
    %161 = arith.mulf %160, %159 : vector<16x512xf32>
    %cst_60 = arith.constant 4.471500e-02 : f32
    %162 = vector.broadcast %cst_60 : f32 to vector<16x512xf32>
    %163 = arith.mulf %162, %159 : vector<16x512xf32>
    %164 = arith.mulf %163, %159 : vector<16x512xf32>
    %165 = arith.mulf %164, %159 : vector<16x512xf32>
    %166 = arith.addf %159, %165 : vector<16x512xf32>
    %cst_61 = arith.constant 0.797884583 : f32
    %167 = vector.broadcast %cst_61 : f32 to vector<16x512xf32>
    %168 = arith.mulf %167, %166 : vector<16x512xf32>
    %169 = math.tanh %168 : vector<16x512xf32>
    %cst_62 = arith.constant 1.000000e+00 : f32
    %170 = vector.broadcast %cst_62 : f32 to vector<16x512xf32>
    %171 = arith.addf %170, %169 : vector<16x512xf32>
    %172 = arith.mulf %161, %171 : vector<16x512xf32>
    %173 = arith.truncf %172 : vector<16x512xf32> to vector<16x512xbf16>
    %c0_63 = arith.constant 0 : index
    %c0_64 = arith.constant 0 : index
    %c0_65 = arith.constant 0 : index
    %174 = vector.load %arg12[%c0_63, %c0_64, %c0_65] : memref<1x512x128xbf16, #tpu.memory_space<vmem>>, vector<1x512x128xbf16>
    %175 = vector.shape_cast %174 : vector<1x512x128xbf16> to vector<512x128xbf16>
    %cst_66 = arith.constant dense<0.000000e+00> : vector<16x128xf32>
    %176 = tpu.matmul %173, %175, %cst_66 {dimension_numbers = #tpu.dot_dimension_numbers<[1], [0], [0], [1], [0, 0, 1, 1], [], []>} : vector<16x512xbf16>, vector<512x128xbf16>, vector<16x128xf32> -> vector<16x128xf32>
    %c0_67 = arith.constant 0 : index
    %c0_68 = arith.constant 0 : index
    %c0_69 = arith.constant 0 : index
    %177 = vector.load %arg13[%c0_67, %c0_68, %c0_69] : memref<1x1x128xf32, #tpu.memory_space<vmem>>, vector<1x1x128xf32>
    %178 = vector.shape_cast %177 : vector<1x1x128xf32> to vector<1x128xf32>
    %179 = vector.broadcast %178 : vector<1x128xf32> to vector<16x128xf32>
    %180 = arith.addf %176, %179 : vector<16x128xf32>
    %181 = arith.addf %151, %180 : vector<16x128xf32>
    %c0_70 = arith.constant 0 : index
    %c0_71 = arith.constant 0 : index
    %c0_72 = arith.constant 0 : index
    %182 = vector.load %arg14[%c0_70, %c0_71, %c0_72] : memref<1x1x128xf32, #tpu.memory_space<vmem>>, vector<1x1x128xf32>
    %183 = vector.shape_cast %182 : vector<1x1x128xf32> to vector<1x128xf32>
    %c0_73 = arith.constant 0 : index
    %c0_74 = arith.constant 0 : index
    %c0_75 = arith.constant 0 : index
    %184 = vector.load %arg15[%c0_73, %c0_74, %c0_75] : memref<1x1x128xf32, #tpu.memory_space<vmem>>, vector<1x1x128xf32>
    %185 = vector.shape_cast %184 : vector<1x1x128xf32> to vector<1x128xf32>
    %cst_76 = arith.constant dense<0.000000e+00> : vector<16xf32>
    %186 = vector.multi_reduction <add>, %181, %cst_76 [1] : vector<16x128xf32> to vector<16xf32>
    %187 = vector.shape_cast %186 : vector<16xf32> to vector<16x1xf32>
    %cst_77 = arith.constant 1.280000e+02 : f32
    %188 = vector.broadcast %cst_77 : f32 to vector<16x1xf32>
    %189 = arith.divf %187, %188 : vector<16x1xf32>
    %190 = vector.broadcast %189 : vector<16x1xf32> to vector<16x128xf32>
    %191 = arith.subf %181, %190 : vector<16x128xf32>
    %192 = vector.broadcast %189 : vector<16x1xf32> to vector<16x128xf32>
    %193 = arith.subf %181, %192 : vector<16x128xf32>
    %194 = arith.mulf %191, %193 : vector<16x128xf32>
    %cst_78 = arith.constant dense<0.000000e+00> : vector<16xf32>
    %195 = vector.multi_reduction <add>, %194, %cst_78 [1] : vector<16x128xf32> to vector<16xf32>
    %196 = vector.shape_cast %195 : vector<16xf32> to vector<16x1xf32>
    %cst_79 = arith.constant 1.280000e+02 : f32
    %197 = vector.broadcast %cst_79 : f32 to vector<16x1xf32>
    %198 = arith.divf %196, %197 : vector<16x1xf32>
    %199 = vector.broadcast %189 : vector<16x1xf32> to vector<16x128xf32>
    %200 = arith.subf %181, %199 : vector<16x128xf32>
    %cst_80 = arith.constant 9.99999996E-13 : f32
    %201 = vector.broadcast %cst_80 : f32 to vector<16x1xf32>
    %202 = arith.addf %198, %201 : vector<16x1xf32>
    %203 = math.rsqrt %202 : vector<16x1xf32>
    %204 = vector.broadcast %203 : vector<16x1xf32> to vector<16x128xf32>
    %205 = arith.mulf %200, %204 : vector<16x128xf32>
    %206 = vector.broadcast %183 : vector<1x128xf32> to vector<16x128xf32>
    %207 = arith.mulf %205, %206 : vector<16x128xf32>
    %208 = vector.broadcast %185 : vector<1x128xf32> to vector<16x128xf32>
    %209 = arith.addf %207, %208 : vector<16x128xf32>
    %c0_81 = arith.constant 0 : index
    %c0_82 = arith.constant 0 : index
    %210 = vector.load %arg16[%c0_81, %c0_82] : memref<16x128xf32, #tpu.memory_space<vmem>>, vector<16x128xf32>
    tpu.vector_store %arg16[%c0_81, %c0_82], %209 {strides = array<i32>} : memref<16x128xf32, #tpu.memory_space<vmem>>, vector<16x128xf32>,
    return
  }
  func.func @transform_0(%arg0: i32) -> (i32, i32) {
    %c0_i32 = arith.constant 0 : i32
    %c0_i32_0 = arith.constant 0 : i32
    %c0_i32_1 = arith.constant 0 : i32
    return %c0_i32, %c0_i32_0 : i32, i32
  }
  func.func @transform_1(%arg0: i32) -> (i32, i32) {
    %c0_i32 = arith.constant 0 : i32
    %c0_i32_0 = arith.constant 0 : i32
    %c0_i32_1 = arith.constant 0 : i32
    return %c0_i32, %c0_i32_0 : i32, i32
  }
  func.func @transform_2(%arg0: i32) -> (i32, i32) {
    %c0_i32 = arith.constant 0 : i32
    %c0_i32_0 = arith.constant 0 : i32
    %c0_i32_1 = arith.constant 0 : i32
    return %c0_i32, %c0_i32_0 : i32, i32
  }
  func.func @transform_3(%arg0: i32) -> (i32, i32, i32) {
    %c0_i32 = arith.constant 0 : i32
    %c0_i32_0 = arith.constant 0 : i32
    %c0_i32_1 = arith.constant 0 : i32
    return %arg0, %c0_i32, %c0_i32_0 : i32, i32, i32
  }
  func.func @transform_4(%arg0: i32) -> (i32, i32, i32) {
    %c0_i32 = arith.constant 0 : i32
    %c0_i32_0 = arith.constant 0 : i32
    %c0_i32_1 = arith.constant 0 : i32
    return %arg0, %c0_i32, %c0_i32_0 : i32, i32, i32
  }
  func.func @transform_5(%arg0: i32) -> (i32, i32, i32) {
    %c0_i32 = arith.constant 0 : i32
    %c0_i32_0 = arith.constant 0 : i32
    %c0_i32_1 = arith.constant 0 : i32
    return %arg0, %c0_i32, %c0_i32_0 : i32, i32, i32
  }
  func.func @transform_6(%arg0: i32) -> (i32, i32, i32) {
    %c0_i32 = arith.constant 0 : i32
    %c0_i32_0 = arith.constant 0 : i32
    %c0_i32_1 = arith.constant 0 : i32
    return %arg0, %c0_i32, %c0_i32_0 : i32, i32, i32
  }
  func.func @transform_7(%arg0: i32) -> (i32, i32, i32) {
    %c0_i32 = arith.constant 0 : i32
    %c0_i32_0 = arith.constant 0 : i32
    %c0_i32_1 = arith.constant 0 : i32
    return %arg0, %c0_i32, %c0_i32_0 : i32, i32, i32
  }
  func.func @transform_8(%arg0: i32) -> (i32, i32, i32) {
    %c0_i32 = arith.constant 0 : i32
    %c0_i32_0 = arith.constant 0 : i32
    %c0_i32_1 = arith.constant 0 : i32
    return %arg0, %c0_i32, %c0_i32_0 : i32, i32, i32
  }
  func.func @transform_9(%arg0: i32) -> (i32, i32, i32) {
    %c0_i32 = arith.constant 0 : i32
    %c0_i32_0 = arith.constant 0 : i32
    %c0_i32_1 = arith.constant 0 : i32
    return %arg0, %c0_i32, %c0_i32_0 : i32, i32, i32
  }
  func.func @transform_10(%arg0: i32) -> (i32, i32, i32) {
    %c0_i32 = arith.constant 0 : i32
    %c0_i32_0 = arith.constant 0 : i32
    %c0_i32_1 = arith.constant 0 : i32
    return %arg0, %c0_i32, %c0_i32_0 : i32, i32, i32
  }
  func.func @transform_11(%arg0: i32) -> (i32, i32, i32) {
    %c0_i32 = arith.constant 0 : i32
    %c0_i32_0 = arith.constant 0 : i32
    %c0_i32_1 = arith.constant 0 : i32
    return %arg0, %c0_i32, %c0_i32_0 : i32, i32, i32
  }
  func.func @transform_12(%arg0: i32) -> (i32, i32, i32) {
    %c0_i32 = arith.constant 0 : i32
    %c0_i32_0 = arith.constant 0 : i32
    %c0_i32_1 = arith.constant 0 : i32
    return %arg0, %c0_i32, %c0_i32_0 : i32, i32, i32
  }
  func.func @transform_13(%arg0: i32) -> (i32, i32, i32) {
    %c0_i32 = arith.constant 0 : i32
    %c0_i32_0 = arith.constant 0 : i32
    %c0_i32_1 = arith.constant 0 : i32
    return %arg0, %c0_i32, %c0_i32_0 : i32, i32, i32
  }
  func.func @transform_14(%arg0: i32) -> (i32, i32, i32) {
    %c0_i32 = arith.constant 0 : i32
    %c0_i32_0 = arith.constant 0 : i32
    %c0_i32_1 = arith.constant 0 : i32
    return %arg0, %c0_i32, %c0_i32_0 : i32, i32, i32
  }
  func.func @transform_15(%arg0: i32) -> (i32, i32) {
    %c0_i32 = arith.constant 0 : i32
    %c0_i32_0 = arith.constant 0 : i32
    %c0_i32_1 = arith.constant 0 : i32
    return %c0_i32, %c0_i32_0 : i32, i32
  }
}

</mosaic_0001>

<bundles_post_ra>
// kernel: seq2seq_forward.2
= control target key start
LH: loop header
LB: loop body
LE: loop exit
PB: predicated region body
PF: predicated region fallthrough
CT: control target
= control target key end

     0   :  { %s4694_s0 = inlined_call_operand.vmem [shape: f32[16,128], index: 0, kind: input, shape index: {}]   ;;  %s4695_s1 = inlined_call_operand.vmem [shape: f32[1,128], index: 1, kind: input, shape index: {}]   ;;  %s4696_s2 = inlined_call_operand.vmem [shape: f32[1,128], index: 2, kind: input, shape index: {}]   ;;  %s4697_s3 = inlined_call_operand.hbm [shape: bf16[2,128,384], index: 3, kind: input, shape index: {}]   ;;  %s4698_s4 = inlined_call_operand.vmem [shape: f32[2,1,384], index: 4, kind: input, shape index: {}]   ;;  %s4699_s5 = inlined_call_operand.vmem [shape: bf16[2,128,128], index: 5, kind: input, shape index: {}]   ;;  %s4700_s6 = inlined_call_operand.vmem [shape: f32[2,1,128], index: 6, kind: input, shape index: {}]   ;;  %s4701_s7 = inlined_call_operand.vmem [shape: f32[2,1,128], index: 7, kind: input, shape index: {}]   ;;  %s4702_s8 = inlined_call_operand.vmem [shape: f32[2,1,128], index: 8, kind: input, shape index: {}]   ;;  %s4703_s9 = inlined_call_operand.hbm [shape: bf16[2,128,512], index: 9, kind: input, shape index: {}]   ;;  %s4704_s10 = inlined_call_operand.vmem [shape: f32[2,1,512], index: 10, kind: input, shape index: {}]   ;;  %s4705_s11 = inlined_call_operand.hbm [shape: bf16[2,512,128], index: 11, kind: input, shape index: {}]   ;;  %s4706_s12 = inlined_call_operand.vmem [shape: f32[2,1,128], index: 12, kind: input, shape index: {}]   ;;  %s4707_s13 = inlined_call_operand.vmem [shape: f32[2,1,128], index: 13, kind: input, shape index: {}]   ;;  %s4708_s14 = inlined_call_operand.vmem [shape: f32[2,1,128], index: 14, kind: input, shape index: {}]   ;;  %s4709_s15 = inlined_call_operand.vmem [shape: f32[16,128], index: 15, kind: output, shape index: {}]  }
   0x1   :  { %4719 = sst [smem:[#allocation12_spill]] %s4694_s0 }
   0x2   :  { %4720 = sst [smem:[#allocation13_spill]] %s4695_s1 }
   0x3   :  { %4721 = sst [smem:[#allocation14_spill]] %s4696_s2 }
   0x4   :  { %4722 = sst [smem:[#allocation15_spill]] %s4697_s3 }
   0x5   :  { %4723 = sst [smem:[#allocation16_spill]] %s4698_s4 }
   0x6   :  { %4724 = sst [smem:[#allocation17_spill]] %s4699_s5 }
   0x7   :  { %4725 = sst [smem:[#allocation18_spill]] %s4703_s9 }
   0x8   :  { %4726 = sst [smem:[#allocation19_spill]] %s4705_s11 }
   0x9   :  { %4727 = sst [smem:[#allocation20_spill]] %s4708_s14 }
   0xa   :  { %4728 = sst [smem:[#allocation21_spill]] %s4709_s15 }
   0xb   :  { %20 = vsyncpa [#allocation3], 0 }
   0xc   :  { %22 = vsyncpa [#allocation3 + $0x1], 0 }
   0xd   :  { %23 = vsyncpa [#allocation5], 0 }
   0xe   :  { %25 = vsyncpa [#allocation5 + $0x1], 0  ;;  %s4011_s18 = smov 0   ;;  %s4013_s19 = smov 0  }
   0xf   :  { %s4015_s20 = smov 0   ;;  %s4017_s21 = smov 0  }
  0x10 LB: > { %4729 = sst [smem:[#allocation9_spill]] %s3910_s20  ;;  %s4030_s22 = sadd.s32 4294967295, %s3914_s21   ;;  %s3914_s21 = sphi %s4017_s21, %s4755_s21   ;;  %s3910_s20 = sphi %s4015_s20, %s4757_s20   ;;  %s3906_s19 = sphi %s4013_s19, %s4759_s19   ;;  %s3902_s18 = sphi %s4011_s18, %s4758_s18  }
  0x11   : > { %s4033_s23 = sadd.s32 1, %s3914_s21   ;;  %s101_s25 = sadd.s32 1, %s3910_s20 }
  0x12   : > { %4730 = sst [smem:[#allocation10_spill]] %s4033_s23  ;;  %s98_s24 = ssub.s32 %s3914_s21, %s4033_s23 }
  0x13   : > { %p99_p0 = scmp.eq.s32.totalorder %s98_s24, 0  ;;  %p108_p1 = scmp.ne.s32.totalorder %s3910_s20, %s3906_s19 }
  0x14   : > { %p109_p2 = scmp.eq.s32.totalorder %s3914_s21, 0  ;;  %p114_p3 = scmp.ne.s32.totalorder %s3906_s19, %s3902_s18 }
  0x15   : > { %s4043_s26 = scalar_select %p99_p0, %s3910_s20, %s101_s25  }
  0x16   : > { %p110_p4 = por %p109_p2, %p108_p1  ;;  %p115_p5 = scmp.eq.s32.totalorder %s4030_s22, 0 }
  0x17   : > { %4731 = sst [smem:[#allocation11_spill]] %s4043_s26  ;;  %p3561_p6 = scmp.lt.s32.totalorder %s3914_s21, 2 }
  0x18   : > { %p4047_p7 = por %p115_p5, %p114_p3  ;;  %s4052_s28 = sand.u32 1, %s3910_s20  }
  0x19   : > { %p4054_p8 = pnand %p3561_p6, %p110_p4  ;;  %s508_s30 = sand.u32 1, %s3914_s21  }
  0x1a   : > { %s4732_s27 = scalar_select %p4047_p7, 1, 0 }
  0x1b   : > { %s4715_s16 = sshll.u32 %s4052_s28, 8  ;;  %s4716_s17 = sshll.u32 %s3914_s21, 12 }
  0x1c   : > { %s512_s18 = scalar_lea.vmem [#allocation4], %s4715_s16  ;;  %s4734_s9 = sld [smem:[#allocation18_spill]] }
  0x1d   : > { %s519_s24 = sshll.u32 %s512_s18, 4  ;;  %s4072_s20 = scalar_lea.sflag [#allocation5], %s508_s30  ;;  %s4070_s24 = int_to_ptr.vmem [resolvable:$true] %s519_s24 }
  0x1e   : > { %p4078_p10 = pneg %p4054_p8 }
  0x22   : > { %s4068_s23 = scalar_lea.hbm %s4734_s9, %s4716_s17  ;;  %s3791_s25 = scalar_lea.hbm %s4734_s9, 8192 }
  0x23   : > { %s3786_s15 = scalar_lea.hbm %s4068_s23, 4096  ;;  %p3792_p13 = scmp.lt.u32.totalorder %s4068_s23, %s4734_s9 }
  0x24   : > { %p3787_p9 = scmp.ne.s32.totalorder %s4068_s23, %s3786_s15  ;;  %p3793_p0 = scmp.lt.u32.totalorder %s3791_s25, %s3786_s15 }
  0x25   : > { %p3795_p2 = scmp.lt.u32.totalorder %s3786_s15, %s4068_s23 }
  0x26   : > { %p3789_p11 = pnand %p4078_p10, %p3787_p9  ;;  %p3794_p1 = por %p3793_p0, %p3792_p13 }
  0x28   : > { %p3790_p12 = pneg %p3789_p11  ;;  %p3796_p3 = por %p3795_p2, %p3794_p1 }
  0x2a   : > { %p3797_p4 = pnand %p3796_p3, %p3790_p12 }
  0x2c   : > { %3800 = shalt.err (!%p3797_p4)
}
  0x2d   : > { %s3801_s30 = scalar_lea.vmem %s4070_s24, 4096  ;;  %s3916_s26 = smov [#allocation4]  }
  0x2e   : > { %p3802_p5 = scmp.ne.s32.totalorder %s4070_s24, %s3801_s30  ;;  %s3806_s18 = sshll.u32 %s3916_s26, 4  ;;  %s3807_s18 = int_to_ptr.vmem [resolvable:$false] %s3806_s18 }
  0x2f   : > { %s3808_s2 = scalar_lea.vmem %s3807_s18, 8192  ;;  %p3809_p11 = scmp.lt.s32.totalorder %s4070_s24, %s3807_s18 }
  0x30   : > { %p3804_p6 = pnand %p3802_p5, %p4078_p10  ;;  %p3810_p7 = scmp.lt.s32.totalorder %s3808_s2, %s3801_s30 }
  0x32   : > { %p3805_p9 = pneg %p3804_p6  ;;  %p3811_p13 = por %p3810_p7, %p3809_p11 }
  0x34   : > { %p3812_p0 = pnand %p3811_p13, %p3805_p9 }
  0x36   : > { %3815 = shalt.err (!%p3812_p0)
}
  0x37   : > { %s3917_s15 = smov 256   ;;  %s3918_s17 = smov 16  }
  0x38   : > { %3557 = dma.hbm_to_vmem [thread:$0]  (!%p4054_p8), %s4068_s23, 4096, %s4070_s24, %s4072_s20, %s3917_s15, %s3917_s15, %s3918_s17  }
  0x39   : > { %s4736_s25 = sshll.u32 %s3914_s21, 12  ;;  %s4737_s11 = sld [smem:[#allocation19_spill]] }
  0x3a   : > { %s4738_s2 = sshll.u32 %s4052_s28, 8  ;;  %p3160_p7 = scmp.ge.s32.totalorder %s3914_s21, 1 }
  0x3b   : > { %s540_s9 = scalar_lea.vmem [#allocation6], %s4738_s2  ;;  %p573_p12 = scmp.lt.s32.totalorder %s3914_s21, 3 }
  0x3c   : > { %s547_s1 = sshll.u32 %s540_s9, 4  ;;  %s3541_s0 = smul.u32 192, %s4052_s28  ;;  %s4112_s1 = int_to_ptr.vmem [resolvable:$true] %s547_s1 }
  0x3d   : > { %p4116_p1 = pnand %p3160_p7, %p573_p12  ;;  %s3542_s23 = smul.u32 3072, %s3914_s21 }
  0x3e   : > { %s4740_s3 = sld [smem:[#allocation15_spill]]  ;;  %s458_s9 = scalar_lea.vmem [#allocation2], %s3541_s0 }
  0x3f   : > { %s4107_s18 = scalar_lea.hbm %s4737_s11, %s4736_s25  ;;  %s465_s25 = sshll.u32 %s458_s9, 4  ;;  %s4126_s25 = int_to_ptr.vmem [resolvable:$true] %s465_s25 }
  0x40   : > { %s4739_s14 = scalar_select %p4116_p1, 1, 0 }
  0x41   : > { %s455_s30 = scalar_lea.sflag [#allocation3], %s4052_s28 }
  0x44   : > { %s4124_s17 = scalar_lea.hbm %s4740_s3, %s3542_s23  ;;  %s3821_s24 = scalar_lea.hbm %s4740_s3, 6144 }
  0x45   : > { %s3816_s26 = scalar_lea.hbm %s4124_s17, 3072  ;;  %p3822_p5 = scmp.lt.u32.totalorder %s4124_s17, %s4740_s3 }
  0x46   : > { %p3817_p2 = scmp.ne.s32.totalorder %s4124_s17, %s3816_s26  ;;  %p3823_p6 = scmp.lt.u32.totalorder %s3821_s24, %s3816_s26 }
  0x47   : > { %p3825_p11 = scmp.lt.u32.totalorder %s3816_s26, %s4124_s17 }
  0x48   : > { %p3819_p3 = pnand %p3817_p2, %p4078_p10  ;;  %p3824_p9 = por %p3823_p6, %p3822_p5 }
  0x4a   : > { %p3820_p4 = pneg %p3819_p3  ;;  %p3826_p13 = por %p3825_p11, %p3824_p9 }
  0x4c   : > { %p3827_p0 = pnand %p3826_p13, %p3820_p4 }
  0x4e   : > { %3830 = shalt.err (!%p3827_p0)
}
  0x4f   : > { %s3831_s0 = scalar_lea.vmem %s4126_s25, 3072  ;;  %s3919_s9 = smov [#allocation2]  }
  0x50   : > { %p3832_p7 = scmp.ne.s32.totalorder %s4126_s25, %s3831_s0  ;;  %s3836_s21 = sshll.u32 %s3919_s9, 4  ;;  %s3837_s21 = int_to_ptr.vmem [resolvable:$false] %s3836_s21 }
  0x51   : > { %s3838_s2 = scalar_lea.vmem %s3837_s21, 6144  ;;  %p3839_p3 = scmp.lt.s32.totalorder %s4126_s25, %s3837_s21 }
  0x52   : > { %p3834_p12 = pnand %p3832_p7, %p4078_p10  ;;  %p3840_p1 = scmp.lt.s32.totalorder %s3838_s2, %s3831_s0 }
  0x54   : > { %p3835_p2 = pneg %p3834_p12  ;;  %p3841_p5 = por %p3840_p1, %p3839_p3 }
  0x56   : > { %p3842_p6 = pnand %p3841_p5, %p3835_p2 }
  0x58   : > { %3845 = shalt.err (!%p3842_p6)
}
  0x59   : > { %s3920_s26 = smov 192   ;;  %s3921_s24 = smov 12  }
  0x5a   : > { %3554 = dma.hbm_to_vmem [thread:$0]  (!%p4054_p8), %s4124_s17, 3072, %s4126_s25, %s455_s30, %s3920_s26, %s3920_s26, %s3921_s24  }
  0x5b   : > { %s3846_s23 = scalar_lea.hbm %s4107_s18, 4096  ;;  %s3851_s9 = scalar_lea.hbm %s4737_s11, 8192 }
  0x5c   : > { %p3847_p4 = scmp.ne.s32.totalorder %s4107_s18, %s3846_s23  ;;  %p3852_p11 = scmp.lt.u32.totalorder %s4107_s18, %s4737_s11 }
  0x5d   : > { %p3853_p13 = scmp.lt.u32.totalorder %s3851_s9, %s3846_s23  ;;  %p3855_p7 = scmp.lt.u32.totalorder %s3846_s23, %s4107_s18 }
  0x5e   : > { %p3849_p1 = pnand %p3847_p4, %p4078_p10 }
  0x5f   : > { %p3854_p0 = por %p3853_p13, %p3852_p11 }
  0x60   : > { %p3850_p9 = pneg %p3849_p1 }
  0x61   : > { %p3856_p12 = por %p3855_p7, %p3854_p0 }
  0x63   : > { %p3857_p2 = pnand %p3856_p12, %p3850_p9 }
  0x65   : > { %3860 = shalt.err (!%p3857_p2)
}
  0x66   : > { %s3861_s28 = scalar_lea.vmem %s4112_s1, 4096  ;;  %s3922_s17 = smov [#allocation6]  }
  0x67   : > { %p3862_p3 = scmp.ne.s32.totalorder %s4112_s1, %s3861_s28  ;;  %s3866_s25 = sshll.u32 %s3922_s17, 4  ;;  %s3867_s25 = int_to_ptr.vmem [resolvable:$false] %s3866_s25 }
  0x68   : > { %s3868_s30 = scalar_lea.vmem %s3867_s25, 8192  ;;  %p3869_p4 = scmp.lt.s32.totalorder %s4112_s1, %s3867_s25 }
  0x69   : > { %p3864_p5 = pnand %p3862_p3, %p4078_p10  ;;  %p3870_p1 = scmp.lt.s32.totalorder %s3868_s30, %s3861_s28 }
  0x6b   : > { %p3865_p6 = pneg %p3864_p5  ;;  %p3871_p11 = por %p3870_p1, %p3869_p4 }
  0x6d   : > { %p3872_p13 = pnand %p3871_p11, %p3865_p6 }
  0x6f   : > { %3875 = shalt.err (!%p3872_p13)
}
  0x70   : > { %s3923_s26 = smov 64   ;;  %s3924_s24 = smov 4  }
  0x71   : > { %3560 = dma.hbm_to_vmem [thread:$0]  (!%p4054_p8), %s4107_s18, 4096, %s4112_s1, %s4072_s20, %s3923_s26, %s3923_s26, %s3924_s24  }
  0x72   : > { %p4741_p10 = scmp.ne.s32.totalorder %s4739_s14, 0 }
  0x73   : > { %s579_s16 = sand.u32 (!%p4741_p10), 1, %s3906_s19   ;;  %p4742_p9 = scmp.ne.s32.totalorder (!%p4741_p10), %s4732_s27, 0 }
  0x74   : > { %577 = sbr.rel (%p4741_p10) target bundleno = 4815 (0x12cf), region = 80  ;;  %s580_s15 = scalar_lea.sflag (!%p4741_p10), [#allocation3], %s579_s16 }
  0x75   : > { %s3543_s23 = smul.u32 (!%p4741_p10), 192, %s579_s16 }
  0x77   : > { %s4177_s0 = scalar_lea.vmem (!%p4741_p10), [#allocation2], %s3543_s23 }
  0x7b   : > { %3893 = dma.done.wait (%p4742_p9), %s580_s15, 3072  }
  0x7c   : > { %3895 = vsyncadd (%p4742_p9), %s580_s15, 4294964224  ;;  %s588_s9 = sand.u32 1, %s4030_s22   ;;  %s3161_s29 = sshll.u32 %s579_s16, 8 }
  0x7d   : > { %s589_s1 = scalar_lea.sflag [#allocation5], %s588_s9  ;;  %s4184_s20 = scalar_lea.vmem [#allocation4], %s3161_s29 }
  0x7e   : > { %3897 = dma.done.wait (%p4742_p9), %s589_s1, 8192  }
  0x7f   : > { %3899 = vsyncadd (%p4742_p9), %s589_s1, 4294959104  ;;  %p684_p8 = scmp.lt.s32.totalorder %s4030_s22, 1  ;;  %s4743_s5 = sld [smem:[#allocation17_spill]] }
  0x80   : > { %s4744_s4 = sld [smem:[#allocation16_spill]]  ;;  %s4745_s9 = sld [smem:[#allocation20_spill]] }
  0x81   : > { %s4192_s14 = scalar_select %p684_p8, %s4030_s22, 1 }
  0x82   : > { %s4236_s3 = scalar_lea.vmem [#allocation6], %s3161_s29  ;;  %p3166_p0 = scmp.ne.s32.totalorder %s4030_s22, 0 }
  0x83   : > { %s3544_s18 = smul.u32 3, %s4192_s14  ;;  %s3295_s21 = sshll.u32 %s4192_s14, 6 }
  0x84   : > { %s701_s11 = scalar_lea.vmem %s4702_s8, %s4192_s14  ;;  %s3165_s2 = sshll.u32 %s4192_s14, 2 }
  0x85   : > { %s4199_s27 = scalar_lea.vmem %s4743_s5, %s3295_s21  ;;  %s4222_s5 = scalar_lea.vmem %s4704_s10, %s3165_s2 }
  0x86   : > { %s4208_s16 = scalar_lea.vmem %s4744_s4, %s3544_s18  ;;  %s708_s26 = scalar_lea.vmem %s4706_s12, %s4192_s14 }
  0x87   : > { %s711_s30 = scalar_lea.vmem %s4707_s13, %s4192_s14  ;;  %s714_s4 = scalar_lea.vmem %s4745_s9, %s4192_s14 }
  0x88   : > { %719 = sbr.rel (%p3166_p0) target bundleno = 459 (0x1cb), region = 96  ;;  %s4746_s21 = sld [smem:[#allocation12_spill]] (!%p3166_p0) }
  0x89   : > { %s4748_s9 = sld [smem:[#allocation13_spill]] (!%p3166_p0)  ;;  %s4749_s23 = sld [smem:[#allocation14_spill]] (!%p3166_p0) }
  0x8a   : > { %s4750_s2 = sld [smem:[#allocation21_spill]] (!%p3166_p0) }
  0x8e   : > { %s4747_s28 = smov (!%p3166_p0), %s4746_s21  ;;  %v720_v0 = vld [vmem:[%s4746_s21] sm:$0xff] (!%p3166_p0) }
  0x8f   : > { %724 = vadd.xlane.f32.xlu0 %v720_v0  ;;  %v721_v1 = vld [vmem:[%s4747_s28 + $0x8] sm:$0xff]  ;;  %v3167_v17 = vld [vmem:[%s4748_s9] ss:$0 sm:$0xff] }
  0x90   : > { %v3168_v19 = vld [vmem:[%s4749_s23] ss:$0 sm:$0xff] }
  0x93   : > { %726 = vadd.xlane.f32.xlu0 %v721_v1 }
 0x11c   : > { %v725_v2 = vpop.xlane.xlu0 %724 }
 0x11d   : > { %v729_v3 = vmul.f32 0.0078125, %v725_v2 }
 0x11f   : > { %v731_v4 = vsub.f32 %v720_v0, %v729_v3 }
 0x120   : > { %v727_v5 = vpop.xlane.xlu0 %726 }
 0x121   : > { %v730_v6 = vmul.f32 0.0078125, %v727_v5  ;;  %v733_v7 = vmul.f32 %v731_v4, %v731_v4 }
 0x123   : > { %v732_v8 = vsub.f32 %v721_v1, %v730_v6  ;;  %735 = vadd.xlane.f32.xlu1 %v733_v7 }
 0x125   : > { %v734_v9 = vmul.f32 %v732_v8, %v732_v8 }
 0x127   : > { %737 = vadd.xlane.f32.xlu1 %v734_v9 }
 0x1b0   : > { %v736_v10 = vpop.xlane.xlu1 %735 }
 0x1b1   : > { %v739_v11 = vmul.f32 0.0078125, %v736_v10 }
 0x1b3   : > { %v741_v12 = vadd.f32 1e-12, %v739_v11 }
 0x1b4   : > { %v738_v13 = vpop.xlane.xlu1 %737 }
 0x1b5   : > { %3606 = vrsqrt.f32 %v741_v12  ;;  %v740_v14 = vmul.f32 0.0078125, %v738_v13 }
 0x1b7   : > { %v742_v15 = vadd.f32 1e-12, %v740_v14 }
 0x1b9   : > { %3608 = vrsqrt.f32 %v742_v15 }
 0x1bf   : > { %v3607_v16 = vpop.eup %3606 }
 0x1c0   : > { %v745_v18 = vmul.f32 %v3607_v16, %v731_v4 }
 0x1c2   : > { %v753_v20 = vmul.f32 %v3167_v17, %v745_v18 }
 0x1c3   : > { %v3609_v21 = vpop.eup %3608 }
 0x1c4   : > { %v761_v22 = vadd.f32 %v3168_v19, %v753_v20  ;;  %v746_v23 = vmul.f32 %v3609_v21, %v732_v8 }
 0x1c6   : > { %763 = vst [vmem:[%s4750_s2] sm:$0xff] %v761_v22  ;;  %v754_v24 = vmul.f32 %v3167_v17, %v746_v23 }
 0x1c8   : > { %v762_v25 = vadd.f32 %v3168_v19, %v754_v24 }
 0x1ca   : > { %764 = vst [vmem:[%s4750_s2 + $0x8] sm:$0xff] %v762_v25 }
 0x1cb PF: > { %v3610_v26 = vld [vmem:[%s4177_s0 + $0x4] ss:$12 sps:$4 sm:$0xff]   ;;  %v3612_v27 = vld [vmem:[%s4177_s0] ss:$12 sps:$4 sm:$0xff]   ;;  %v3925_v28 = vmov 0   ;;  %v3926_v29 = vmov 0.0   ;;  %v802_v55 = vlaneseq  ;;  %s4752_s15 = scalar_lea.vmem %s4700_s6, %s4192_s14 }
 0x1cc   : > { %977 = vmatprep.mubr.bf16.mxu0 %v3925_v28  ;;  %3393 = vmatprep.subr.bf16.mxu1 %v3926_v29  ;;  %v3613_v30 = vld [vmem:[%s4177_s0 + $0x1c] ss:$12 sps:$4 sm:$0xff]   ;;  %v3615_v31 = vld [vmem:[%s4177_s0 + $0x18] ss:$12 sps:$4 sm:$0xff]   ;;  %v3616_v32 = vld [vmem:[%s4177_s0 + $0x34] ss:$12 sps:$4 sm:$0xff]  }
 0x1cd   : > { %945 = vmatprep.subr.bf16.mxu0 %v3610_v26  ;;  %v3618_v33 = vld [vmem:[%s4177_s0 + $0x30] ss:$12 sps:$4 sm:$0xff]   ;;  %v3619_v34 = vld [vmem:[%s4177_s0 + $0x4c] ss:$12 sps:$4 sm:$0xff]   ;;  %v3621_v35 = vld [vmem:[%s4177_s0 + $0x48] ss:$12 sps:$4 sm:$0xff]  }
 0x1ce   : > { %946 = vmatpush1.bf16.msra.mxu0 %v3612_v27  ;;  %v3622_v36 = vld [vmem:[%s4177_s0 + $0x64] ss:$12 sps:$4 sm:$0xff]   ;;  %v3634_v37 = vld [vmem:[%s4177_s0 + $0x8] ss:$12 sps:$4 sm:$0xff]   ;;  %v3635_v38 = vld [vmem:[%s4177_s0 + $0x20] ss:$12 sps:$4 sm:$0xff]  }
 0x1cf   : > { %947 = vmatprep.subr.bf16.mxu0 %v3613_v30  ;;  %3394 = vmatpush3.bf16.msra.mxu1 %v3634_v37  ;;  %v3624_v39 = vld [vmem:[%s4177_s0 + $0x60] ss:$12 sps:$4 sm:$0xff]   ;;  %v3625_v40 = vld [vmem:[%s4177_s0 + $0x7c] ss:$12 sps:$4 sm:$0xff]   ;;  %v3627_v41 = vld [vmem:[%s4177_s0 + $0x78] ss:$12 sps:$4 sm:$0xff]  }
 0x1d0   : > { %3395 = vmatprep.subr.bf16.mxu1 %v3926_v29  ;;  %v3628_v42 = vld [vmem:[%s4177_s0 + $0x94] ss:$12 sps:$4 sm:$0xff]   ;;  %v3636_v43 = vld [vmem:[%s4177_s0 + $0x38] ss:$12 sps:$4 sm:$0xff]   ;;  %v3637_v44 = vld [vmem:[%s4177_s0 + $0x50] ss:$12 sps:$4 sm:$0xff]  }
 0x1d1   : > { %v3630_v45 = vld [vmem:[%s4177_s0 + $0x90] ss:$12 sps:$4 sm:$0xff]   ;;  %v3631_v46 = vld [vmem:[%s4177_s0 + $0xac] ss:$12 sps:$4 sm:$0xff]   ;;  %v3638_v47 = vld [vmem:[%s4177_s0 + $0x68] ss:$12 sps:$4 sm:$0xff]  }
 0x1d2   : > { %948 = vmatpush1.bf16.msra.mxu0 %v3615_v31  ;;  %v3633_v48 = vld [vmem:[%s4177_s0 + $0xa8] ss:$12 sps:$4 sm:$0xff]   ;;  %s4751_s29 = sld [smem:[#allocation21_spill]]  ;;  %v3639_v51 = vld [vmem:[%s4177_s0 + $0x80] ss:$12 sps:$4 sm:$0xff]   ;;  %vm3927_vm0 = vmmov 0  }
 0x1d3   : > { %949 = vmatprep.subr.bf16.mxu0 %v3616_v32  ;;  %3396 = vmatpush3.bf16.msra.mxu1 %v3635_v38  ;;  %v3640_v53 = vld [vmem:[%s4177_s0 + $0x98] ss:$12 sps:$4 sm:$0xff]   ;;  %v3641_v54 = vld [vmem:[%s4177_s0 + $0xb0] ss:$12 sps:$4 sm:$0xff]   ;;  %v4310_v56 = vshrl.u32 %v802_v55, 7  ;;  %vm1035_vm1 = vcmask 261120  }
 0x1d4   : > { %3397 = vmatprep.subr.bf16.mxu1 %v3926_v29  ;;  %3409 = vmatprep.mubr.msk.bf16.mxu1 %vm3927_vm0, %v3926_v29  ;;  %v800_v58 = vld [vmem:[%s4208_s16] sm:$0x7]  ;;  %s3928_s0 = smov 96   ;;  %vm1156_vm2 = vcmask 1043456   ;;  %vm1128_vm3 = vcmask 64512   ;;  %s3929_s16 = smov 64  }
 0x1d5   : > { %v808_v57 = vsub.s32 1, %v4310_v56  ;;  %v804_v60 = vsub.s32 0, %v4310_v56  ;;  %v812_v12 = vsub.s32 2, %v4310_v56  ;;  %s3930_s24 = smov 32  }
 0x1d6   : > { %950 = vmatpush1.bf16.msra.mxu0 %v3618_v33 }
 0x1d7   : > { %951 = vmatprep.subr.bf16.mxu0 %v3619_v34  ;;  %3398 = vmatpush3.bf16.msra.mxu1 %v3636_v43  ;;  %v809_v59 = vrot.slane %v800_v58, %v808_v57  ;;  %v805_v2 = vrot.slane %v800_v58, %v804_v60  ;;  %v813_v13 = vrot.slane %v800_v58, %v812_v12 }
 0x1d8   : > { %3399 = vmatprep.subr.bf16.mxu1 %v3926_v29  ;;  %v4286_v49 = vld [vmem:[%s4751_s29] sm:$0xff]  ;;  %v4291_v50 = vld [vmem:[%s4751_s29 + $0x8] sm:$0xff] }
 0x1d9   : > { %v767_v52 = vpack.c.bf16 %v4291_v50, %v4286_v49 }
 0x1da   : > { %952 = vmatpush1.bf16.msra.mxu0 %v3621_v35 }
 0x1db   : > { %953 = vmatprep.subr.bf16.mxu0 %v3622_v36  ;;  %3400 = vmatpush3.bf16.msra.mxu1 %v3637_v44 }
 0x1dc   : > { %3401 = vmatprep.subr.bf16.mxu1 %v3926_v29 }
 0x1de   : > { %954 = vmatpush1.bf16.msra.mxu0 %v3624_v39 }
 0x1df   : > { %955 = vmatprep.subr.bf16.mxu0 %v3625_v40  ;;  %3402 = vmatpush3.bf16.msra.mxu1 %v3638_v47 }
 0x1e0   : > { %3403 = vmatprep.subr.bf16.mxu1 %v3926_v29 }
 0x1e2   : > { %956 = vmatpush1.bf16.msra.mxu0 %v3627_v41 }
 0x1e3   : > { %957 = vmatprep.subr.bf16.mxu0 %v3628_v42  ;;  %3404 = vmatpush3.bf16.msra.mxu1 %v3639_v51 }
 0x1e4   : > { %3405 = vmatprep.subr.bf16.mxu1 %v3926_v29 }
 0x1e6   : > { %958 = vmatpush1.bf16.msra.mxu0 %v3630_v45 }
 0x1e7   : > { %959 = vmatprep.subr.bf16.mxu0 %v3631_v46  ;;  %3406 = vmatpush3.bf16.msra.mxu1 %v3640_v53 }
 0x1e8   : > { %3407 = vmatprep.subr.bf16.mxu1 %v3926_v29 }
 0x1ea   : > { %960 = vmatpush1.bf16.msra.mxu0 %v3633_v48 }
 0x1eb   : > { %3413 = vmatprep.subr.bf16.mxu0 %v3926_v29  ;;  %3408 = vmatpush3.bf16.msra.mxu1 %v3641_v54 }
 0x1ec   : > { %3419 = vmatprep.subr.bf16.mxu1 %v3926_v29 }
 0x1ed   : > { %978 = vmatmul.mubr.bf16.vlgmr.msra.gmra.mrb[0].mxu0 %v767_v52 }
 0x1ee   : > { %3415 = vmatprep.mubr.msk.bf16.mxu0 %vm3927_vm0, %v3926_v29  ;;  %3410 = vmatmul.mubr.bf16.vlgmr.msra.gmra.mrb[0].mxu1 %v767_v52 }
 0x1ef   : > { %3421 = vmatprep.mubr.msk.bf16.mxu1 %vm3927_vm0, %v3926_v29 }
 0x2c0   : > { %v979_v61 = vpop.f32.mrb[0].mxu0 }
 0x2c1   : > { %v981_v62 = vpop.f32.mrb[1].mxu0  ;;  %v980_v7 = vadd.f32 %v979_v61, %v805_v2  ;;  %v1022_v14 = vpop.f32.mrb[0].mxu1 }
 0x2c2   : > { %v982_v63 = vadd.f32 %v981_v62, %v809_v59  ;;  %v983_v0 = vpop.f32.mrb[2].mxu0  ;;  %v1023_v15 = vadd.f32 %v1022_v14, %v813_v13  ;;  %v3411_v16 = vpop.f32.mrb[1].mxu1 }
 0x2c3   : > { %v985_v1 = vpop.f32.mrb[3].mxu0  ;;  %v984_v9 = vadd.f32 %v983_v0, %v805_v2  ;;  %v4331_v10 = vpack.c.bf16 %v980_v7, %v980_v7  ;;  %v1025_v17 = vpop.f32.mrb[2].mxu1 }
 0x2c4   : > { %v4319_v3 = vpack.c.bf16 %v982_v63, %v982_v63  ;;  %v986_v4 = vadd.f32 %v985_v1, %v809_v59  ;;  %v1026_v18 = vadd.f32 %v1025_v17, %v813_v13  ;;  %v3412_v19 = vpop.f32.mrb[3].mxu1  ;;  %v4346_v20 = vpack.c.bf16 %v1023_v15, %v1023_v15 }
 0x2c5   : > { %v4333_v11 = vpack.c.bf16 %v984_v9, %v984_v9 }
 0x2c6   : > { %v4321_v5 = vpack.c.bf16 %v986_v4, %v986_v4  ;;  %v1040_v6 = vsel %vm1035_vm1, %v4319_v3, 0  ;;  %v4348_v21 = vpack.c.bf16 %v1026_v18, %v1026_v18  ;;  %v1158_v22 = vsel %vm1156_vm2, %v4346_v20, 0 }
 0x2c7   : > { %3414 = vmatpush3.bf16.xpose.msra.mxu0 %v1040_v6 }
 0x2c8   : > { %1307 = vrot.lane.b32.xlu1 %v4321_v5, %s3928_s0  ;;  %v1086_v8 = vsel %vm1035_vm1, %v4321_v5, 0  ;;  %3425 = vmatprep.subr.bf16.mxu0 %v3926_v29  ;;  %v1204_v23 = vsel %vm1156_vm2, %v4348_v21, 0 }
 0x2c9   : > { %3420 = vmatpush3.bf16.xpose.msra.mxu1 %v1086_v8 }
 0x2ca   : > { %3431 = vmatprep.subr.bf16.mxu1 %v3926_v29 }
 0x2ce   : > { %3416 = vmatmul.mubr.msk.bf16.vlgmr.msra.gmra.mrb[4].mxu0 %vm1035_vm1, %v4331_v10 }
 0x2cf   : > { %3427 = vmatprep.mubr.msk.bf16.mxu0 %vm3927_vm0, %v3926_v29  ;;  %3426 = vmatpush3.bf16.msra.mxu0 %v1158_v22 }
 0x2d0   : > { %3422 = vmatmul.mubr.msk.bf16.vlgmr.msra.gmra.mrb[4].mxu1 %vm1035_vm1, %v4333_v11  ;;  %3437 = vmatprep.subr.bf16.mxu0 %v3926_v29 }
 0x2d1   : > { %3433 = vmatprep.mubr.msk.bf16.mxu1 %vm3927_vm0, %v3926_v29  ;;  %3432 = vmatpush3.bf16.msra.mxu1 %v1204_v23 }
 0x2d2   : > { %3443 = vmatprep.subr.bf16.mxu1 %v3926_v29 }
 0x33a   : > { %v1308_v46 = vpop.permute.xlu1 %1307 }
 0x33b   : > { %v1313_v62 = vsel %vm1035_vm1, %v1308_v46, 0 }
 0x3a1   : > { %v1076_v24 = vpop.f32.mrb[4].mxu0 }
 0x3a2   : > { %v3417_v25 = vpop.f32.mrb[5].mxu0  ;;  %v1129_v26 = vsel %vm1128_vm3, %v1076_v24, -inf }
 0x3a3   : > { %v1122_v27 = vpop.f32.mrb[4].mxu1  ;;  %1130 = vmax.xlane.f32.xlu0 %v1129_v26  ;;  %v1079_v30 = vpop.f32.mrb[6].mxu0 }
 0x3a4   : > { %v3418_v31 = vpop.f32.mrb[7].mxu0  ;;  %v3423_v32 = vpop.f32.mrb[5].mxu1  ;;  %v1132_v35 = vsel %vm1128_vm3, %v1122_v27, -inf }
 0x3a5   : > { %v1125_v33 = vpop.f32.mrb[6].mxu1 }
 0x3a6   : > { %v3424_v34 = vpop.f32.mrb[7].mxu1 }
 0x3a7   : > { %1133 = vmax.xlane.f32.xlu0 %v1132_v35 }
 0x3bd   : > { %1255 = vrot.lane.b32.xlu0 %v4319_v3, %s3928_s0 }
 0x430   : > { %v1131_v36 = vpop.xlane.xlu0 %1130 }
 0x431   : > { %v1135_v37 = vsub.f32 %v1076_v24, %v1131_v36 }
 0x433   : > { %v1137_v38 = vmul.f32 1.442695, %v1135_v37 }
 0x434   : > { %v1134_v39 = vpop.xlane.xlu0 %1133 }
 0x435   : > { %3730 = vpow2.f32 %v1137_v38  ;;  %v1136_v40 = vsub.f32 %v1122_v27, %v1134_v39 }
 0x437   : > { %v1139_v41 = vmul.f32 1.442695, %v1136_v40 }
 0x438   : > { %v1256_v53 = vpop.permute.xlu0 %1255 }
 0x439   : > { %3732 = vpow2.f32 %v1139_v41  ;;  %v1261_v58 = vsel %vm1035_vm1, %v1256_v53, 0  ;;  %v3642_v53 = vld [vmem:[%s4199_s27] sm:$0xff]  }
 0x43f   : > { %v3731_v42 = vpop.eup %3730 }
 0x440   : > { %v1141_v43 = vsel %vm1128_vm3, %v3731_v42, 0.0 }
 0x441   : > { %1142 = vadd.xlane.f32.xlu1 %v1141_v43 }
 0x443   : > { %v3733_v44 = vpop.eup %3732 }
 0x444   : > { %v1144_v45 = vsel %vm1128_vm3, %v3733_v44, 0.0 }
 0x445   : > { %1145 = vadd.xlane.f32.xlu1 %v1144_v45 }
 0x456   : > { %1252 = vrot.lane.b32.xlu1 %v4331_v10, %s3928_s0 }
 0x45a   : > { %1304 = vrot.lane.b32.xlu1 %v4333_v11, %s3928_s0 }
 0x4ce   : > { %v1143_v47 = vpop.xlane.xlu1 %1142 }
 0x4cf   : > { %3734 = vrcp.f32 %v1143_v47  ;;  %v3644_v47 = vld [vmem:[%s4199_s27 + $0x10] sm:$0xff]  }
 0x4d2   : > { %v1146_v48 = vpop.xlane.xlu1 %1145 }
 0x4d3   : > { %3736 = vrcp.f32 %v1146_v48 }
 0x4d6   : > { %v1253_v63 = vpop.permute.xlu1 %1252 }
 0x4d9   : > { %v3735_v51 = vpop.eup %3734 }
 0x4da   : > { %v1149_v52 = vmul.f32 %v3735_v51, %v3731_v42  ;;  %v1305_v0 = vpop.permute.xlu1 %1304 }
 0x4dc   : > { %v1151_v54 = vpack.c.bf16 %v1149_v52, %v1149_v52 }
 0x4dd   : > { %v3737_v55 = vpop.eup %3736 }
 0x4de   : > { %v1150_v59 = vmul.f32 %v3737_v55, %v3733_v44  ;;  %3428 = vmatmul.mubr.msk.bf16.vlgmr.msra.gmra.mrb[8].mxu0 %vm1128_vm3, %v1151_v54  ;;  %v3645_v55 = vld [vmem:[%s4199_s27 + $0x18] sm:$0xff]  }
 0x4df   : > { %3438 = vmatpush3.bf16.xpose.msra.mxu0 %v1261_v58  ;;  %3439 = vmatprep.mubr.msk.bf16.mxu0 %vm3927_vm0, %v3926_v29  ;;  %v3643_v58 = vld [vmem:[%s4199_s27 + $0x8] sm:$0xff]  }
 0x4e0   : > { %v1152_v61 = vpack.c.bf16 %v1150_v59, %v1150_v59  ;;  %3449 = vmatprep.subr.bf16.mxu0 %v3926_v29 }
 0x4e2   : > { %3434 = vmatmul.mubr.msk.bf16.vlgmr.msra.gmra.mrb[8].mxu1 %vm1128_vm3, %v1152_v61 }
 0x4e3   : > { %3444 = vmatpush3.bf16.xpose.msra.mxu1 %v1313_v62  ;;  %3445 = vmatprep.mubr.msk.bf16.mxu1 %vm3927_vm0, %v3926_v29 }
 0x4e4   : > { %3455 = vmatprep.subr.bf16.mxu1 %v3926_v29 }
 0x4e6   : > { %3440 = vmatmul.mubr.msk.bf16.vlgmr.msra.gmra.mrb[12].mxu0 %vm1035_vm1, %v1253_v63 }
 0x4e7   : > { %3451 = vmatprep.mubr.msk.bf16.mxu0 %vm3927_vm0, %v3926_v29 }
 0x4ea   : > { %3446 = vmatmul.mubr.msk.bf16.vlgmr.msra.gmra.mrb[12].mxu1 %vm1035_vm1, %v1305_v0 }
 0x4eb   : > { %3457 = vmatprep.mubr.msk.bf16.mxu1 %vm3927_vm0, %v3926_v29 }
 0x5b1   : > { %v4382_v1 = vpop.f32.mrb[8].mxu0 }
 0x5b2   : > { %v3429_v2 = vpop.f32.mrb[9].mxu0 }
 0x5b3   : > { %v1197_v4 = vpop.f32.mrb[10].mxu0 }
 0x5b4   : > { %v3430_v6 = vpop.f32.mrb[11].mxu0 }
 0x5b5   : > { %v4384_v7 = vpop.f32.mrb[8].mxu1 }
 0x5b6   : > { %v1246_v8 = vpack.c.bf16 %v4384_v7, %v4382_v1  ;;  %v3435_v9 = vpop.f32.mrb[9].mxu1 }
 0x5b7   : > { %v1243_v13 = vpop.f32.mrb[10].mxu1 }
 0x5b8   : > { %v3436_v14 = vpop.f32.mrb[11].mxu1 }
 0x5b9   : > { %v1297_v15 = vpop.f32.mrb[12].mxu0 }
 0x5ba   : > { %v3441_v16 = vpop.f32.mrb[13].mxu0  ;;  %v1355_v17 = vsel %vm1128_vm3, %v1297_v15, -inf }
 0x5bb   : > { %1356 = vmax.xlane.f32.xlu0 %v1355_v17  ;;  %v1300_v18 = vpop.f32.mrb[14].mxu0 }
 0x5bc   : > { %v3442_v19 = vpop.f32.mrb[15].mxu0 }
 0x5bd   : > { %v1349_v22 = vpop.f32.mrb[12].mxu1 }
 0x5be   : > { %v3447_v23 = vpop.f32.mrb[13].mxu1  ;;  %v1358_v24 = vsel %vm1128_vm3, %v1349_v22, -inf }
 0x5bf   : > { %1359 = vmax.xlane.f32.xlu1 %v1358_v24  ;;  %v1352_v25 = vpop.f32.mrb[14].mxu1 }
 0x5c0   : > { %v3448_v26 = vpop.f32.mrb[15].mxu1 }
 0x5d0   : > { %1429 = vrot.lane.b32.xlu1 %v4348_v21, %s3928_s0 }
 0x5d4   : > { %1596 = vrot.lane.b32.xlu1 %v4319_v3, %s3929_s16 }
 0x5d8   : > { %1646 = vrot.lane.b32.xlu1 %v4321_v5, %s3929_s16 }
 0x5dc   : > { %1644 = vrot.lane.b32.xlu1 %v4333_v11, %s3929_s16 }
 0x648   : > { %v1357_v27 = vpop.xlane.xlu0 %1356 }
 0x649   : > { %v1361_v30 = vsub.f32 %v1297_v15, %v1357_v27 }
 0x64b   : > { %v1363_v31 = vmul.f32 1.442695, %v1361_v30 }
 0x64c   : > { %v1360_v32 = vpop.xlane.xlu1 %1359 }
 0x64d   : > { %3738 = vpow2.f32 %v1363_v31  ;;  %v1362_v33 = vsub.f32 %v1349_v22, %v1360_v32 }
 0x64f   : > { %v1365_v34 = vmul.f32 1.442695, %v1362_v33 }
 0x650   : > { %v1430_v35 = vpop.permute.xlu1 %1429 }
 0x651   : > { %3740 = vpow2.f32 %v1365_v34  ;;  %v1435_v36 = vsel %vm1156_vm2, %v1430_v35, 0 }
 0x652   : > { %3456 = vmatpush3.bf16.msra.mxu1 %v1435_v36 }
 0x653   : > { %3469 = vmatprep.subr.bf16.mxu1 %v3926_v29 }
 0x654   : > { %v1597_v59 = vpop.permute.xlu1 %1596 }
 0x655   : > { %v1602_v13 = vsel %vm1035_vm1, %v1597_v59, 0 }
 0x657   : > { %v3739_v37 = vpop.eup %3738 }
 0x658   : > { %v1367_v38 = vsel %vm1128_vm3, %v3739_v37, 0.0  ;;  %v1647_v61 = vpop.permute.xlu1 %1646 }
 0x659   : > { %1368 = vadd.xlane.f32.xlu0 %v1367_v38  ;;  %v1652_v62 = vsel %vm1035_vm1, %v1647_v61, 0 }
 0x65b   : > { %v3741_v39 = vpop.eup %3740 }
 0x65c   : > { %v1370_v40 = vsel %vm1128_vm3, %v3741_v39, 0.0  ;;  %v1645_v63 = vpop.permute.xlu1 %1644 }
 0x65d   : > { %1371 = vadd.xlane.f32.xlu0 %v1370_v40 }
 0x673   : > { %1380 = vrot.lane.b32.xlu0 %v4346_v20, %s3928_s0 }
 0x677   : > { %1594 = vrot.lane.b32.xlu0 %v4331_v10, %s3929_s16 }
 0x6e6   : > { %v1369_v41 = vpop.xlane.xlu0 %1368 }
 0x6e7   : > { %3742 = vrcp.f32 %v1369_v41 }
 0x6ea   : > { %v1372_v42 = vpop.xlane.xlu0 %1371 }
 0x6eb   : > { %3744 = vrcp.f32 %v1372_v42 }
 0x6ee   : > { %v1381_v43 = vpop.permute.xlu0 %1380 }
 0x6ef   : > { %v1386_v44 = vsel %vm1156_vm2, %v1381_v43, 0 }
 0x6f0   : > { %3450 = vmatpush3.bf16.msra.mxu0 %v1386_v44 }
 0x6f1   : > { %v3743_v45 = vpop.eup %3742  ;;  %3461 = vmatprep.subr.bf16.mxu0 %v3926_v29 }
 0x6f2   : > { %v1375_v46 = vmul.f32 %v3743_v45, %v3739_v37  ;;  %v1595_v17 = vpop.permute.xlu0 %1594 }
 0x6f4   : > { %v1377_v48 = vpack.c.bf16 %v1375_v46, %v1375_v46 }
 0x6f5   : > { %v3745_v51 = vpop.eup %3744 }
 0x6f6   : > { %v1376_v52 = vmul.f32 %v3745_v51, %v3741_v39  ;;  %3452 = vmatmul.mubr.msk.bf16.vlgmr.msra.gmra.mrb[16].mxu0 %vm1128_vm3, %v1377_v48 }
 0x6f7   : > { %3462 = vmatpush3.bf16.msra.mxu0 %v3644_v47  ;;  %3465 = vmatprep.mubr.msk.bf16.mxu0 %vm3927_vm0, %v3926_v29 }
 0x6f8   : > { %v1378_v54 = vpack.c.bf16 %v1376_v52, %v1376_v52  ;;  %3463 = vmatprep.subr.bf16.mxu0 %v3926_v29 }
 0x6fa   : > { %3458 = vmatmul.mubr.msk.bf16.vlgmr.msra.gmra.mrb[16].mxu1 %vm1128_vm3, %v1378_v54 }
 0x6fb   : > { %3470 = vmatpush3.bf16.msra.mxu1 %v3642_v53  ;;  %3473 = vmatprep.mubr.msk.bf16.mxu1 %vm3927_vm0, %v3926_v29 }
 0x6fc   : > { %3471 = vmatprep.subr.bf16.mxu1 %v3926_v29  ;;  %3464 = vmatpush3.bf16.msra.mxu0 %v3645_v55 }
 0x6fd   : > { %3477 = vmatprep.subr.bf16.mxu0 %v3926_v29 }
 0x6ff   : > { %3472 = vmatpush3.bf16.msra.mxu1 %v3643_v58 }
 0x700   : > { %3483 = vmatprep.subr.bf16.mxu1 %v3926_v29 }
 0x702   : > { %3474 = vmatmul.mubr.msk.bf16.vlgmr.msra.gmra.mrb[20].mxu1 %vm1035_vm1, %v1246_v8 }
 0x703   : > { %3485 = vmatprep.mubr.msk.bf16.mxu1 %vm3927_vm0, %v3926_v29 }
 0x708   : > { %3484 = vmatpush3.bf16.xpose.msra.mxu1 %v1652_v62 }
 0x709   : > { %3495 = vmatprep.subr.bf16.mxu1 %v3926_v29 }
 0x70f   : > { %3486 = vmatmul.mubr.msk.bf16.vlgmr.msra.gmra.mrb[24].mxu1 %vm1035_vm1, %v1645_v63 }
 0x710   : > { %3497 = vmatprep.mubr.msk.bf16.mxu1 %vm3927_vm0, %v3926_v29 }
 0x7c9   : > { %v1422_v0 = vpop.f32.mrb[16].mxu0 }
 0x7ca   : > { %v3453_v2 = vpop.f32.mrb[17].mxu0 }
 0x7cb   : > { %v1425_v1 = vpop.f32.mrb[18].mxu0 }
 0x7cc   : > { %v3454_v4 = vpop.f32.mrb[19].mxu0  ;;  %v3646_v1 = vld [vmem:[%s4199_s27 + $0x20] sm:$0xff]  }
 0x7cd   : > { %v1471_v6 = vpop.f32.mrb[16].mxu1 }
 0x7ce   : > { %v1477_v7 = vpack.c.bf16 %v1471_v6, %v1422_v0  ;;  %v3459_v8 = vpop.f32.mrb[17].mxu1 }
 0x7cf   : > { %v1474_v9 = vpop.f32.mrb[18].mxu1 }
 0x7d0   : > { %v3460_v14 = vpop.f32.mrb[19].mxu1  ;;  %3466 = vmatmul.mubr.msk.bf16.vlgmr.msra.gmra.mrb[20].mxu0 %vm1035_vm1, %v1477_v7  ;;  %v3647_v9 = vld [vmem:[%s4199_s27 + $0x28] sm:$0xff]  }
 0x7d1   : > { %3478 = vmatpush3.bf16.xpose.msra.mxu0 %v1602_v13  ;;  %3479 = vmatprep.mubr.msk.bf16.mxu0 %vm3927_vm0, %v3926_v29 }
 0x7d2   : > { %3489 = vmatprep.subr.bf16.mxu0 %v3926_v29 }
 0x7d5   : > { %v1587_v15 = vpop.f32.mrb[20].mxu1 }
 0x7d6   : > { %v3475_v16 = vpop.f32.mrb[21].mxu1 }
 0x7d7   : > { %v1590_v18 = vpop.f32.mrb[22].mxu1 }
 0x7d8   : > { %v3476_v19 = vpop.f32.mrb[23].mxu1  ;;  %3480 = vmatmul.mubr.msk.bf16.vlgmr.msra.gmra.mrb[24].mxu0 %vm1035_vm1, %v1595_v17 }
 0x7d9   : > { %3491 = vmatprep.mubr.msk.bf16.mxu0 %vm3927_vm0, %v3926_v29 }
 0x7e2   : > { %v1688_v22 = vpop.f32.mrb[24].mxu1 }
 0x7e3   : > { %v3487_v23 = vpop.f32.mrb[25].mxu1  ;;  %v1697_v24 = vsel %vm1128_vm3, %v1688_v22, -inf }
 0x7e4   : > { %1698 = vmax.xlane.f32.xlu1 %v1697_v24  ;;  %v1691_v25 = vpop.f32.mrb[26].mxu1 }
 0x7e5   : > { %v3488_v26 = vpop.f32.mrb[27].mxu1 }
 0x7f5   : > { %1766 = vrot.lane.b32.xlu1 %v4348_v21, %s3929_s16 }
 0x7f9   : > { %1879 = vrot.lane.b32.xlu1 %v4319_v3, %s3930_s24 }
 0x7fd   : > { %1929 = vrot.lane.b32.xlu1 %v4321_v5, %s3930_s24 }
 0x801   : > { %1927 = vrot.lane.b32.xlu1 %v4333_v11, %s3930_s24 }
 0x871   : > { %v1699_v27 = vpop.xlane.xlu1 %1698 }
 0x872   : > { %v1701_v32 = vsub.f32 %v1688_v22, %v1699_v27 }
 0x874   : > { %v1704_v33 = vmul.f32 1.442695, %v1701_v32 }
 0x875   : > { %v1767_v30 = vpop.permute.xlu1 %1766 }
 0x876   : > { %v1772_v31 = vsel %vm1156_vm2, %v1767_v30, 0  ;;  %3746 = vpow2.f32 %v1704_v33 }
 0x877   : > { %3496 = vmatpush3.bf16.msra.mxu1 %v1772_v31 }
 0x878   : > { %3509 = vmatprep.subr.bf16.mxu1 %v3926_v29 }
 0x879   : > { %v1880_v54 = vpop.permute.xlu1 %1879 }
 0x87a   : > { %v1885_v58 = vsel %vm1035_vm1, %v1880_v54, 0 }
 0x880   : > { %v3747_v40 = vpop.eup %3746 }
 0x881   : > { %v1709_v43 = vsel %vm1128_vm3, %v3747_v40, 0.0 }
 0x8a3   : > { %v1531_v34 = vpop.f32.mrb[20].mxu0 }
 0x8a4   : > { %v4452_v35 = vadd.f32 %v1587_v15, %v1531_v34  ;;  %v3467_v3 = vpop.f32.mrb[21].mxu0 }
 0x8a5   : > { %v1534_v36 = vpop.f32.mrb[22].mxu0 }
 0x8a6   : > { %v4454_v37 = vadd.f32 %v1590_v18, %v1534_v36  ;;  %v3468_v5 = vpop.f32.mrb[23].mxu0  ;;  %v1930_v18 = vpop.permute.xlu1 %1929 }
 0x8a7   : > { %v1935_v25 = vsel %vm1035_vm1, %v1930_v18, 0 }
 0x8aa   : > { %v1928_v27 = vpop.permute.xlu1 %1927 }
 0x8ab   : > { %v1638_v38 = vpop.f32.mrb[24].mxu0 }
 0x8ac   : > { %v3481_v11 = vpop.f32.mrb[25].mxu0  ;;  %v1694_v39 = vsel %vm1128_vm3, %v1638_v38, -inf }
 0x8ad   : > { %1695 = vmax.xlane.f32.xlu0 %v1694_v39  ;;  %v1641_v41 = vpop.f32.mrb[26].mxu0 }
 0x8ae   : > { %v3482_v42 = vpop.f32.mrb[27].mxu0 }
 0x8b1   : > { %1710 = vadd.xlane.f32.xlu0 %v1709_v43 }
 0x93a   : > { %v1696_v44 = vpop.xlane.xlu0 %1695 }
 0x93b   : > { %v1700_v45 = vsub.f32 %v1638_v38, %v1696_v44 }
 0x93d   : > { %v1702_v46 = vmul.f32 1.442695, %v1700_v45 }
 0x93e   : > { %v1711_v47 = vpop.xlane.xlu0 %1710 }
 0x93f   : > { %3748 = vpow2.f32 %v1702_v46 }
 0x940   : > { %3750 = vrcp.f32 %v1711_v47 }
 0x949   : > { %v3749_v48 = vpop.eup %3748 }
 0x94a   : > { %v3751_v51 = vpop.eup %3750  ;;  %v1706_v52 = vsel %vm1128_vm3, %v3749_v48, 0.0 }
 0x94b   : > { %v1715_v53 = vmul.f32 %v3751_v51, %v3747_v40  ;;  %1707 = vadd.xlane.f32.xlu0 %v1706_v52 }
 0x94d   : > { %v1717_v55 = vpack.c.bf16 %v1715_v53, %v1715_v53 }
 0x94f   : > { %3498 = vmatmul.mubr.msk.bf16.vlgmr.msra.gmra.mrb[28].mxu1 %vm1128_vm3, %v1717_v55 }
 0x950   : > { %3510 = vmatpush3.bf16.xpose.msra.mxu1 %v1885_v58  ;;  %3511 = vmatprep.mubr.msk.bf16.mxu1 %vm3927_vm0, %v3926_v29 }
 0x951   : > { %3521 = vmatprep.subr.bf16.mxu1 %v3926_v29 }
 0x961   : > { %1718 = vrot.lane.b32.xlu0 %v4346_v20, %s3929_s16 }
 0x965   : > { %1877 = vrot.lane.b32.xlu0 %v4331_v10, %s3930_s24 }
 0x9d8   : > { %v1708_v59 = vpop.xlane.xlu0 %1707 }
 0x9d9   : > { %3752 = vrcp.f32 %v1708_v59 }
 0x9dc   : > { %v1719_v61 = vpop.permute.xlu0 %1718 }
 0x9dd   : > { %v1724_v62 = vsel %vm1156_vm2, %v1719_v61, 0 }
 0x9de   : > { %3490 = vmatpush3.bf16.msra.mxu0 %v1724_v62 }
 0x9df   : > { %3501 = vmatprep.subr.bf16.mxu0 %v3926_v29 }
 0x9e0   : > { %v1878_v63 = vpop.permute.xlu0 %1877 }
 0x9e1   : > { %3512 = vmatmul.mubr.msk.bf16.vlgmr.msra.gmra.mrb[32].mxu1 %vm1035_vm1, %v1878_v63  ;;  %v3648_v63 = vld [vmem:[%s4199_s27 + $0x30] sm:$0xff]  }
 0x9e2   : > { %3523 = vmatprep.mubr.msk.bf16.mxu1 %vm3927_vm0, %v3926_v29 }
 0x9e3   : > { %v3753_v0 = vpop.eup %3752 }
 0x9e4   : > { %v1714_v2 = vmul.f32 %v3753_v0, %v3749_v48  ;;  %v3649_v0 = vld [vmem:[%s4199_s27 + $0x38] sm:$0xff]  }
 0x9e6   : > { %v1716_v4 = vpack.c.bf16 %v1714_v2, %v1714_v2 }
 0x9e8   : > { %3492 = vmatmul.mubr.msk.bf16.vlgmr.msra.gmra.mrb[28].mxu0 %vm1128_vm3, %v1716_v4 }
 0x9e9   : > { %3502 = vmatpush3.bf16.msra.mxu0 %v3646_v1  ;;  %3505 = vmatprep.mubr.msk.bf16.mxu0 %vm3927_vm0, %v3926_v29 }
 0x9ea   : > { %3503 = vmatprep.subr.bf16.mxu0 %v3926_v29 }
 0x9ed   : > { %3504 = vmatpush3.bf16.msra.mxu0 %v3647_v9 }
 0x9ee   : > { %3515 = vmatprep.subr.bf16.mxu0 %v3926_v29 }
 0xa22   : > { %v1808_v10 = vpop.f32.mrb[28].mxu1 }
 0xa23   : > { %v3499_v6 = vpop.f32.mrb[29].mxu1 }
 0xa24   : > { %v1811_v7 = vpop.f32.mrb[30].mxu1 }
 0xa25   : > { %v3500_v8 = vpop.f32.mrb[31].mxu1 }
 0xab4   : > { %v1921_v13 = vpop.f32.mrb[32].mxu1 }
 0xab5   : > { %v3513_v14 = vpop.f32.mrb[33].mxu1  ;;  %v1977_v15 = vsel %vm1128_vm3, %v1921_v13, -inf }
 0xab6   : > { %1978 = vmax.xlane.f32.xlu0 %v1977_v15  ;;  %v1924_v16 = vpop.f32.mrb[34].mxu1 }
 0xab7   : > { %v3514_v17 = vpop.f32.mrb[35].mxu1 }
 0xabb   : > { %v1760_v19 = vpop.f32.mrb[28].mxu0 }
 0xabc   : > { %v1814_v22 = vpack.c.bf16 %v1808_v10, %v1760_v19  ;;  %v3493_v23 = vpop.f32.mrb[29].mxu0 }
 0xabd   : > { %v1763_v24 = vpop.f32.mrb[30].mxu0 }
 0xabe   : > { %v3494_v26 = vpop.f32.mrb[31].mxu0  ;;  %3506 = vmatmul.mubr.msk.bf16.vlgmr.msra.gmra.mrb[32].mxu0 %vm1035_vm1, %v1814_v22 }
 0xabf   : > { %3516 = vmatpush3.bf16.xpose.msra.mxu0 %v1935_v25  ;;  %3517 = vmatprep.mubr.msk.bf16.mxu0 %vm3927_vm0, %v3926_v29  ;;  %v3650_v25 = vld [vmem:[%s4184_s20] ss:$16 sps:$4 sm:$0xff]   ;;  %v3652_v26 = vld [vmem:[%s4184_s20 + $0x4] ss:$16 sps:$4 sm:$0xff]  }
 0xac0   : > { %3527 = vmatprep.subr.bf16.mxu0 %v3926_v29 }
 0xac6   : > { %3518 = vmatmul.mubr.msk.bf16.vlgmr.msra.gmra.mrb[36].mxu0 %vm1035_vm1, %v1928_v27  ;;  %v3653_v27 = vld [vmem:[%s4184_s20 + $0x8] ss:$16 sps:$4 sm:$0xff]  }
 0xac7   : > { %3529 = vmatprep.mubr.msk.bf16.mxu0 %vm3927_vm0, %v3926_v29 }
 0xb43   : > { %v1979_v30 = vpop.xlane.xlu0 %1978 }
 0xb44   : > { %v1983_v31 = vsub.f32 %v1921_v13, %v1979_v30  ;;  %v3655_v30 = vld [vmem:[%s4184_s20 + $0xc] ss:$16 sps:$4 sm:$0xff]  }
 0xb46   : > { %v1985_v32 = vmul.f32 1.442695, %v1983_v31  ;;  %v3658_v31 = vld [vmem:[%s4184_s20 + $0x24] ss:$16 sps:$4 sm:$0xff]  }
 0xb48   : > { %3754 = vpow2.f32 %v1985_v32  ;;  %v3661_v32 = vld [vmem:[%s4184_s20 + $0x2c] ss:$16 sps:$4 sm:$0xff]  }
 0xb52   : > { %v3755_v33 = vpop.eup %3754 }
 0xb53   : > { %v1989_v34 = vsel %vm1128_vm3, %v3755_v33, 0.0 }
 0xb54   : > { %1990 = vadd.xlane.f32.xlu0 %v1989_v34 }
 0xb91   : > { %v1868_v3 = vpop.f32.mrb[32].mxu0 }
 0xb92   : > { %v1875_v36 = vadd.f32 %v1868_v3, %v4452_v35  ;;  %v3507_v5 = vpop.f32.mrb[33].mxu0 }
 0xb93   : > { %v1871_v38 = vpop.f32.mrb[34].mxu0 }
 0xb94   : > { %v1876_v11 = vadd.f32 %v1871_v38, %v4454_v37  ;;  %v3508_v39 = vpop.f32.mrb[35].mxu0 }
 0xb99   : > { %v1971_v40 = vpop.f32.mrb[36].mxu0 }
 0xb9a   : > { %v3519_v41 = vpop.f32.mrb[37].mxu0  ;;  %v1980_v42 = vsel %vm1128_vm3, %v1971_v40, -inf }
 0xb9b   : > { %1981 = vmax.xlane.f32.xlu1 %v1980_v42  ;;  %v1974_v43 = vpop.f32.mrb[38].mxu0  ;;  %v3667_v41 = vld [vmem:[%s4184_s20 + $0x4c] ss:$16 sps:$4 sm:$0xff]   ;;  %v3662_v42 = vld [vmem:[%s4184_s20 + $0x40] ss:$16 sps:$4 sm:$0xff]  }
 0xb9c   : > { %v3520_v44 = vpop.f32.mrb[39].mxu0  ;;  %v3665_v43 = vld [vmem:[%s4184_s20 + $0x48] ss:$16 sps:$4 sm:$0xff]  }
 0xb9d   : > { %v3670_v44 = vld [vmem:[%s4184_s20 + $0x64] ss:$16 sps:$4 sm:$0xff]  }
 0xbac   : > { %2049 = vrot.lane.b32.xlu1 %v4348_v21, %s3930_s24 }
 0xbe1   : > { %v1991_v52 = vpop.xlane.xlu0 %1990 }
 0xc28   : > { %v1982_v45 = vpop.xlane.xlu1 %1981 }
 0xc29   : > { %v1984_v46 = vsub.f32 %v1971_v40, %v1982_v45  ;;  %v3664_v40 = vld [vmem:[%s4184_s20 + $0x44] ss:$16 sps:$4 sm:$0xff]   ;;  %v3673_v45 = vld [vmem:[%s4184_s20 + $0x6c] ss:$16 sps:$4 sm:$0xff]  }
 0xc2b   : > { %v1987_v47 = vmul.f32 1.442695, %v1984_v46  ;;  %v3668_v46 = vld [vmem:[%s4184_s20 + $0x60] ss:$16 sps:$4 sm:$0xff]  }
 0xc2c   : > { %v2050_v48 = vpop.permute.xlu1 %2049 }
 0xc2d   : > { %3756 = vpow2.f32 %v1987_v47  ;;  %v2055_v35 = vsel %vm1156_vm2, %v2050_v48, 0  ;;  %v3671_v47 = vld [vmem:[%s4184_s20 + $0x68] ss:$16 sps:$4 sm:$0xff]   ;;  %v3676_v48 = vld [vmem:[%s4184_s20 + $0x84] ss:$16 sps:$4 sm:$0xff]  }
 0xc2e   : > { %3528 = vmatpush3.bf16.msra.mxu0 %v2055_v35  ;;  %3758 = vrcp.f32 %v1991_v52  ;;  %v3679_v35 = vld [vmem:[%s4184_s20 + $0x8c] ss:$16 sps:$4 sm:$0xff]   ;;  %v3682_v52 = vld [vmem:[%s4184_s20 + $0xa4] ss:$16 sps:$4 sm:$0xff]  }
 0xc2f   : > { %2427 = vmatprep.subr.bf16.mxu0 %v3652_v26  ;;  %v3702_v26 = vld [vmem:[%s4236_s3 + $0x48] sm:$0xff]  }
 0xc37   : > { %v3757_v37 = vpop.eup %3756 }
 0xc38   : > { %v1992_v51 = vsel %vm1128_vm3, %v3757_v37, 0.0  ;;  %v3759_v53 = vpop.eup %3758 }
 0xc39   : > { %1993 = vadd.xlane.f32.xlu0 %v1992_v51  ;;  %v1997_v54 = vmul.f32 %v3759_v53, %v3755_v33  ;;  %v3656_v33 = vld [vmem:[%s4184_s20 + $0x20] ss:$16 sps:$4 sm:$0xff]   ;;  %v3677_v51 = vld [vmem:[%s4184_s20 + $0x88] ss:$16 sps:$4 sm:$0xff]   ;;  %v3685_v53 = vld [vmem:[%s4184_s20 + $0xac] ss:$16 sps:$4 sm:$0xff]  }
 0xc3b   : > { %v1999_v59 = vpack.c.bf16 %v1997_v54, %v1997_v54  ;;  %v3683_v54 = vld [vmem:[%s4184_s20 + $0xa8] ss:$16 sps:$4 sm:$0xff]  }
 0xc4f   : > { %2001 = vrot.lane.b32.xlu0 %v4346_v20, %s3930_s24 }
 0xcc6   : > { %v1994_v21 = vpop.xlane.xlu0 %1993 }
 0xcc7   : > { %3760 = vrcp.f32 %v1994_v21  ;;  %v3680_v21 = vld [vmem:[%s4184_s20 + $0xa0] ss:$16 sps:$4 sm:$0xff]  }
 0xcca   : > { %v2002_v55 = vpop.permute.xlu0 %2001 }
 0xccb   : > { %v2007_v58 = vsel %vm1156_vm2, %v2002_v55, 0  ;;  %v3686_v55 = vld [vmem:[%s4184_s20 + $0xc0] ss:$16 sps:$4 sm:$0xff]  }
 0xccc   : > { %3522 = vmatpush3.bf16.msra.mxu1 %v2007_v58  ;;  %v3688_v58 = vld [vmem:[%s4184_s20 + $0xc4] ss:$16 sps:$4 sm:$0xff]  }
 0xccd   : > { %3533 = vmatprep.subr.bf16.mxu1 %v3926_v29 }
 0xccf   : > { %3524 = vmatmul.mubr.msk.bf16.vlgmr.msra.gmra.mrb[36].mxu1 %vm1128_vm3, %v1999_v59  ;;  %v3689_v59 = vld [vmem:[%s4184_s20 + $0xc8] ss:$16 sps:$4 sm:$0xff]  }
 0xcd0   : > { %3537 = vmatprep.mubr.msk.bf16.mxu1 %vm3927_vm0, %v3926_v29  ;;  %3534 = vmatpush3.bf16.msra.mxu1 %v3648_v63  ;;  %v3692_v63 = vld [vmem:[%s4184_s20 + $0xe0] ss:$16 sps:$4 sm:$0xff]  }
 0xcd1   : > { %v3761_v20 = vpop.eup %3760  ;;  %3535 = vmatprep.subr.bf16.mxu1 %v3926_v29  ;;  %v3221_v29 = vld [vmem:[%s4752_s15] ss:$0 sm:$0xff] }
 0xcd2   : > { %v1998_v61 = vmul.f32 %v3761_v20, %v3757_v37  ;;  %v3674_v37 = vld [vmem:[%s4184_s20 + $0x80] ss:$16 sps:$4 sm:$0xff]   ;;  %v3691_v20 = vld [vmem:[%s4184_s20 + $0xcc] ss:$16 sps:$4 sm:$0xff]  }
 0xcd4   : > { %v2000_v62 = vpack.c.bf16 %v1998_v61, %v1998_v61  ;;  %3536 = vmatpush3.bf16.msra.mxu1 %v3649_v0  ;;  %v3694_v61 = vld [vmem:[%s4184_s20 + $0xe4] ss:$16 sps:$4 sm:$0xff]   ;;  %v3695_v0 = vld [vmem:[%s4184_s20 + $0xe8] ss:$16 sps:$4 sm:$0xff]  }
 0xcd5   : > { %2470 = vmatprep.subr.bf16.mxu1 %v3655_v30  ;;  %v3704_v30 = vld [vmem:[%s4236_s3 + $0x8] sm:$0xff]  }
 0xcd6   : > { %3530 = vmatmul.mubr.msk.bf16.vlgmr.msra.gmra.mrb[40].mxu0 %vm1128_vm3, %v2000_v62  ;;  %v3697_v62 = vld [vmem:[%s4184_s20 + $0xec] ss:$16 sps:$4 sm:$0xff]  }
 0xcd7   : > { %2459 = vmatprep.mubr.bf16.mxu0 %v3925_v28  ;;  %2428 = vmatpush1.bf16.msra.mxu0 %v3650_v25  ;;  %v3701_v25 = vld [vmem:[%s4236_s3 + $0x80] sm:$0xff]  }
 0xcd8   : > { %2429 = vmatprep.subr.bf16.mxu0 %v3658_v31  ;;  %v3705_v31 = vld [vmem:[%s4236_s3 + $0x88] sm:$0xff]  }
 0xcdb   : > { %2430 = vmatpush1.bf16.msra.mxu0 %v3656_v33  ;;  %v3707_v33 = vld [vmem:[%s4236_s3 + $0xd0] sm:$0xff]  }
 0xcdc   : > { %2431 = vmatprep.subr.bf16.mxu0 %v3664_v40  ;;  %v3717_v40 = vld [vmem:[%s4236_s3 + $0xa0] sm:$0xff]  }
 0xcdf   : > { %2432 = vmatpush1.bf16.msra.mxu0 %v3662_v42  ;;  %v3719_v42 = vld [vmem:[%s4236_s3 + $0xe8] sm:$0xff]  }
 0xce0   : > { %2433 = vmatprep.subr.bf16.mxu0 %v3670_v44  ;;  %v3721_v44 = vld [vmem:[%s4236_s3 + $0xa8] sm:$0xff]  }
 0xce3   : > { %2434 = vmatpush1.bf16.msra.mxu0 %v3668_v46  ;;  %v3723_v46 = vld [vmem:[%s4236_s3 + $0xf0] sm:$0xff]  }
 0xce4   : > { %2435 = vmatprep.subr.bf16.mxu0 %v3676_v48  ;;  %v3725_v48 = vld [vmem:[%s4236_s3 + $0xb0] sm:$0xff]  }
 0xce7   : > { %2436 = vmatpush1.bf16.msra.mxu0 %v3674_v37  ;;  %v3727_v37 = vld [vmem:[%s4236_s3 + $0xf8] sm:$0xff]  }
 0xce8   : > { %2437 = vmatprep.subr.bf16.mxu0 %v3682_v52  ;;  %v3729_v52 = vld [vmem:[%s4236_s3 + $0xb8] sm:$0xff]  }
 0xceb   : > { %2438 = vmatpush1.bf16.msra.mxu0 %v3680_v21  ;;  %v2261_v21 = vsub.s32 3, %v4310_v56 }
 0xcec   : > { %2439 = vmatprep.subr.bf16.mxu0 %v3688_v58 }
 0xcef   : > { %2440 = vmatpush1.bf16.msra.mxu0 %v3686_v55 }
 0xcf0   : > { %2441 = vmatprep.subr.bf16.mxu0 %v3694_v61 }
 0xcf3   : > { %2442 = vmatpush1.bf16.msra.mxu0 %v3692_v63 }
 0xda2   : > { %v2043_v2 = vpop.f32.mrb[36].mxu1 }
 0xda3   : > { %v3525_v1 = vpop.f32.mrb[37].mxu1 }
 0xda4   : > { %v2046_v4 = vpop.f32.mrb[38].mxu1 }
 0xda5   : > { %v3526_v10 = vpop.f32.mrb[39].mxu1 }
 0xda9   : > { %v2091_v6 = vpop.f32.mrb[40].mxu0 }
 0xdaa   : > { %v2097_v7 = vpack.c.bf16 %v2091_v6, %v2043_v2  ;;  %v3531_v8 = vpop.f32.mrb[41].mxu0 }
 0xdab   : > { %v2094_v9 = vpop.f32.mrb[42].mxu0 }
 0xdac   : > { %v3532_v13 = vpop.f32.mrb[43].mxu0  ;;  %3538 = vmatmul.mubr.msk.bf16.vlgmr.msra.gmra.mrb[40].mxu1 %vm1035_vm1, %v2097_v7 }
 0xdad   : > { %2502 = vmatprep.mubr.bf16.mxu1 %v3925_v28  ;;  %2471 = vmatpush1.bf16.msra.mxu1 %v3653_v27  ;;  %v3703_v27 = vld [vmem:[%s4236_s3 + $0xc8] sm:$0xff]  }
 0xdae   : > { %2472 = vmatprep.subr.bf16.mxu1 %v3661_v32  ;;  %v3706_v32 = vld [vmem:[%s4236_s3 + $0x50] sm:$0xff]  }
 0xe7f   : > { %v2151_v14 = vpop.f32.mrb[40].mxu1 }
 0xe80   : > { %v2158_v15 = vadd.f32 %v2151_v14, %v1875_v36  ;;  %v3539_v16 = vpop.f32.mrb[41].mxu1 }
 0xe81   : > { %v2154_v17 = vpop.f32.mrb[42].mxu1  ;;  %v3223_v16 = vld [vmem:[%s701_s11] ss:$0 sm:$0xff] }
 0xe82   : > { %v2167_v18 = vadd.f32 %v3221_v29, %v2158_v15  ;;  %v2159_v19 = vadd.f32 %v2154_v17, %v1876_v11  ;;  %v3540_v22 = vpop.f32.mrb[43].mxu1 }
 0xe84   : > { %v2168_v23 = vadd.f32 %v3221_v29, %v2159_v19  ;;  %v2169_v28 = vadd.f32 %v2167_v18, %v4286_v49  ;;  %v3659_v49 = vld [vmem:[%s4184_s20 + $0x28] ss:$16 sps:$4 sm:$0xff]   ;;  %s4753_s20 = scalar_lea.vmem %s4701_s7, %s4192_s14 }
 0xe85   : > { %2473 = vmatpush1.bf16.msra.mxu1 %v3659_v49  ;;  %v3222_v9 = vld [vmem:[%s4753_s20] ss:$0 sm:$0xff]  ;;  %v3708_v49 = vld [vmem:[%s4236_s3 + $0x10] sm:$0xff]  }
 0xe86   : > { %2173 = vadd.xlane.f32.xlu1 %v2169_v28  ;;  %v2170_v24 = vadd.f32 %v2168_v23, %v4291_v50  ;;  %2474 = vmatprep.subr.bf16.mxu1 %v3667_v41  ;;  %v3698_v23 = vld [vmem:[%s4236_s3 + $0x40] sm:$0xff]   ;;  %v3718_v41 = vld [vmem:[%s4236_s3 + $0x68] sm:$0xff]  }
 0xe87   : > { %3349 = vmatprep.subr.bf16.mxu0 %v3698_v23 }
 0xe88   : > { %2175 = vadd.xlane.f32.xlu0 %v2170_v24 }
 0xe89   : > { %2475 = vmatpush1.bf16.msra.mxu1 %v3665_v43  ;;  %v3720_v43 = vld [vmem:[%s4236_s3 + $0x28] sm:$0xff]  }
 0xe8a   : > { %2476 = vmatprep.subr.bf16.mxu1 %v3673_v45  ;;  %v3722_v45 = vld [vmem:[%s4236_s3 + $0x70] sm:$0xff]  }
 0xe8d   : > { %2477 = vmatpush1.bf16.msra.mxu1 %v3671_v47  ;;  %v3724_v47 = vld [vmem:[%s4236_s3 + $0x30] sm:$0xff]  }
 0xe8e   : > { %2478 = vmatprep.subr.bf16.mxu1 %v3679_v35  ;;  %v3726_v35 = vld [vmem:[%s4236_s3 + $0x78] sm:$0xff]  }
 0xe91   : > { %2479 = vmatpush1.bf16.msra.mxu1 %v3677_v51  ;;  %v3728_v51 = vld [vmem:[%s4236_s3 + $0x38] sm:$0xff]  }
 0xe92   : > { %2480 = vmatprep.subr.bf16.mxu1 %v3685_v53  ;;  %v2245_v53 = vld [vmem:[%s4222_s5] sm:$0xf] }
 0xe93   : > { %v2258_v55 = vrot.slane %v2245_v53, %v812_v12  ;;  %v2254_v58 = vrot.slane %v2245_v53, %v808_v57 }
 0xe95   : > { %2481 = vmatpush1.bf16.msra.mxu1 %v3683_v54  ;;  %v2250_v54 = vrot.slane %v2245_v53, %v804_v60 }
 0xe96   : > { %2482 = vmatprep.subr.bf16.mxu1 %v3691_v20 }
 0xe99   : > { %2483 = vmatpush1.bf16.msra.mxu1 %v3689_v59  ;;  %v2262_v59 = vrot.slane %v2245_v53, %v2261_v21 }
 0xe9a   : > { %2484 = vmatprep.subr.bf16.mxu1 %v3697_v62 }
 0xe9d   : > { %2485 = vmatpush1.bf16.msra.mxu1 %v3695_v0 }
 0xf13   : > { %v2174_v50 = vpop.xlane.xlu1 %2173 }
 0xf14   : > { %v2178_v34 = vmul.f32 0.0078125, %v2174_v50  ;;  %v3709_v50 = vld [vmem:[%s4236_s3 + $0x90] sm:$0xff]  }
 0xf15   : > { %v2176_v3 = vpop.xlane.xlu0 %2175 }
 0xf16   : > { %v4526_v36 = vsub.f32 %v2169_v28, %v2178_v34  ;;  %v2179_v5 = vmul.f32 0.0078125, %v2176_v3  ;;  %v3699_v28 = vld [vmem:[%s4236_s3 + $0xc0] sm:$0xff]   ;;  %v3710_v34 = vld [vmem:[%s4236_s3 + $0x58] sm:$0xff]  }
 0xf17   : > { %3371 = vmatprep.subr.bf16.mxu1 %v3699_v28  ;;  %v3711_v3 = vld [vmem:[%s4236_s3 + $0xd8] sm:$0xff]  }
 0xf18   : > { %v4528_v38 = vsub.f32 %v2170_v24, %v2179_v5  ;;  %v2182_v11 = vmul.f32 %v4526_v36, %v4526_v36  ;;  %v3700_v24 = vld [vmem:[%s4236_s3] sm:$0xff]   ;;  %v3713_v5 = vld [vmem:[%s4236_s3 + $0x98] sm:$0xff]  }
 0xf1a   : > { %2184 = vadd.xlane.f32.xlu0 %v2182_v11  ;;  %v2183_v39 = vmul.f32 %v4528_v38, %v4528_v38  ;;  %v3715_v11 = vld [vmem:[%s4236_s3 + $0xe0] sm:$0xff]  }
 0xf1c   : > { %2186 = vadd.xlane.f32.xlu1 %v2183_v39  ;;  %v3716_v39 = vld [vmem:[%s4236_s3 + $0x20] sm:$0xff]  }
 0xfa7   : > { %v2185_v2 = vpop.xlane.xlu0 %2184 }
 0xfa8   : > { %v2188_v1 = vmul.f32 0.0078125, %v2185_v2 }
 0xfa9   : > { %v2187_v4 = vpop.xlane.xlu1 %2186 }
 0xfaa   : > { %v2190_v10 = vadd.f32 1e-12, %v2188_v1  ;;  %v2189_v6 = vmul.f32 0.0078125, %v2187_v4 }
 0xfac   : > { %3762 = vrsqrt.f32 %v2190_v10  ;;  %v2191_v7 = vadd.f32 1e-12, %v2189_v6 }
 0xfae   : > { %3764 = vrsqrt.f32 %v2191_v7 }
 0xfb6   : > { %v3763_v8 = vpop.eup %3762 }
 0xfb7   : > { %v2194_v13 = vmul.f32 %v3763_v8, %v4526_v36  ;;  %v3712_v36 = vld [vmem:[%s4236_s3 + $0x18] sm:$0xff]  }
 0xfb8   : > { %v3765_v14 = vpop.eup %3764 }
 0xfb9   : > { %v2195_v29 = vmul.f32 %v3765_v14, %v4528_v38  ;;  %v2202_v15 = vmul.f32 %v3222_v9, %v2194_v13  ;;  %v3714_v38 = vld [vmem:[%s4236_s3 + $0x60] sm:$0xff]  }
 0xfbb   : > { %v2203_v17 = vmul.f32 %v3222_v9, %v2195_v29  ;;  %v4570_v18 = vadd.f32 %v3223_v16, %v2202_v15 }
 0xfbd   : > { %v4572_v19 = vadd.f32 %v3223_v16, %v2203_v17 }
 0xfbf   : > { %v2212_v22 = vpack.c.bf16 %v4572_v19, %v4570_v18 }
 0xfc1   : > { %2460 = vmatmul.mubr.bf16.vlgmr.msra.gmra.mrb[44].mxu0 %v2212_v22  ;;  %2503 = vmatmul.mubr.bf16.vlgmr.msra.gmra.mrb[44].mxu1 %v2212_v22 }
 0xfc2   : > { %3350 = vmatpush3.bf16.msra.mxu0 %v3700_v24  ;;  %3372 = vmatpush3.bf16.msra.mxu1 %v3701_v25 }
 0xfc3   : > { %3351 = vmatprep.subr.bf16.mxu0 %v3702_v26  ;;  %3373 = vmatprep.subr.bf16.mxu1 %v3703_v27 }
 0xfc6   : > { %3352 = vmatpush3.bf16.msra.mxu0 %v3704_v30  ;;  %3374 = vmatpush3.bf16.msra.mxu1 %v3705_v31 }
 0xfc7   : > { %3353 = vmatprep.subr.bf16.mxu0 %v3706_v32  ;;  %3375 = vmatprep.subr.bf16.mxu1 %v3707_v33 }
 0xfca   : > { %3354 = vmatpush3.bf16.msra.mxu0 %v3708_v49  ;;  %3376 = vmatpush3.bf16.msra.mxu1 %v3709_v50 }
 0xfcb   : > { %3355 = vmatprep.subr.bf16.mxu0 %v3710_v34  ;;  %3377 = vmatprep.subr.bf16.mxu1 %v3711_v3 }
 0xfce   : > { %3356 = vmatpush3.bf16.msra.mxu0 %v3712_v36  ;;  %3378 = vmatpush3.bf16.msra.mxu1 %v3713_v5 }
 0xfcf   : > { %3357 = vmatprep.subr.bf16.mxu0 %v3714_v38  ;;  %3379 = vmatprep.subr.bf16.mxu1 %v3715_v11 }
 0xfd2   : > { %3358 = vmatpush3.bf16.msra.mxu0 %v3716_v39  ;;  %3380 = vmatpush3.bf16.msra.mxu1 %v3717_v40 }
 0xfd3   : > { %3359 = vmatprep.subr.bf16.mxu0 %v3718_v41  ;;  %3381 = vmatprep.subr.bf16.mxu1 %v3719_v42 }
 0xfd6   : > { %3360 = vmatpush3.bf16.msra.mxu0 %v3720_v43  ;;  %3382 = vmatpush3.bf16.msra.mxu1 %v3721_v44 }
 0xfd7   : > { %3361 = vmatprep.subr.bf16.mxu0 %v3722_v45  ;;  %3383 = vmatprep.subr.bf16.mxu1 %v3723_v46 }
 0xfda   : > { %3362 = vmatpush3.bf16.msra.mxu0 %v3724_v47  ;;  %3384 = vmatpush3.bf16.msra.mxu1 %v3725_v48 }
 0xfdb   : > { %3363 = vmatprep.subr.bf16.mxu0 %v3726_v35  ;;  %3385 = vmatprep.subr.bf16.mxu1 %v3727_v37 }
 0xfde   : > { %3364 = vmatpush3.bf16.msra.mxu0 %v3728_v51  ;;  %3386 = vmatpush3.bf16.msra.mxu1 %v3729_v52 }
0x1094   : > { %v2461_v20 = vpop.f32.mrb[44].mxu0  ;;  %v2504_v61 = vpop.f32.mrb[44].mxu1 }
0x1095   : > { %v4616_v62 = vadd.f32 %v2461_v20, %v2250_v54  ;;  %v4618_v63 = vadd.f32 %v2504_v61, %v2258_v55  ;;  %v2463_v0 = vpop.f32.mrb[45].mxu0  ;;  %v2506_v2 = vpop.f32.mrb[45].mxu1 }
0x1096   : > { %v4620_v1 = vadd.f32 %v2463_v0, %v2254_v58  ;;  %v4622_v4 = vadd.f32 %v2506_v2, %v2262_v59  ;;  %v2465_v60 = vpop.f32.mrb[46].mxu0  ;;  %v2508_v10 = vpop.f32.mrb[46].mxu1 }
0x1097   : > { %v2521_v12 = vmul.f32 0.044715, %v4616_v62  ;;  %v2523_v56 = vmul.f32 0.044715, %v4618_v63  ;;  %v2466_v57 = vadd.f32 %v2465_v60, %v2250_v54  ;;  %v2509_v6 = vadd.f32 %v2508_v10, %v2258_v55  ;;  %v2467_v7 = vpop.f32.mrb[47].mxu0  ;;  %v2510_v8 = vpop.f32.mrb[47].mxu1 }
0x1098   : > { %v2522_v9 = vmul.f32 0.044715, %v4620_v1  ;;  %v2524_v13 = vmul.f32 0.044715, %v4622_v4  ;;  %v4628_v14 = vadd.f32 %v2467_v7, %v2254_v58  ;;  %v4630_v29 = vadd.f32 %v2510_v8, %v2262_v59 }
0x1099   : > { %v2529_v15 = vmul.f32 %v2521_v12, %v4616_v62  ;;  %v2531_v16 = vmul.f32 %v2523_v56, %v4618_v63  ;;  %v2525_v17 = vmul.f32 0.044715, %v2466_v57  ;;  %v2527_v22 = vmul.f32 0.044715, %v2509_v6 }
0x109a   : > { %v2530_v23 = vmul.f32 %v2522_v9, %v4620_v1  ;;  %v2532_v28 = vmul.f32 %v2524_v13, %v4622_v4  ;;  %v2526_v24 = vmul.f32 0.044715, %v4628_v14  ;;  %v2528_v25 = vmul.f32 0.044715, %v4630_v29 }
0x109b   : > { %v2537_v26 = vmul.f32 %v2529_v15, %v4616_v62  ;;  %v2539_v27 = vmul.f32 %v2531_v16, %v4618_v63  ;;  %v2533_v30 = vmul.f32 %v2525_v17, %v2466_v57  ;;  %v2535_v31 = vmul.f32 %v2527_v22, %v2509_v6 }
0x109c   : > { %v2538_v32 = vmul.f32 %v2530_v23, %v4620_v1  ;;  %v2540_v33 = vmul.f32 %v2532_v28, %v4622_v4  ;;  %v2534_v49 = vmul.f32 %v2526_v24, %v4628_v14  ;;  %v2536_v50 = vmul.f32 %v2528_v25, %v4630_v29 }
0x109d   : > { %v2545_v34 = vadd.f32 %v2537_v26, %v4616_v62  ;;  %v2547_v3 = vadd.f32 %v2539_v27, %v4618_v63  ;;  %v2541_v36 = vmul.f32 %v2533_v30, %v2466_v57  ;;  %v2543_v5 = vmul.f32 %v2535_v31, %v2509_v6 }
0x109e   : > { %v2542_v38 = vmul.f32 %v2534_v49, %v4628_v14  ;;  %v2544_v11 = vmul.f32 %v2536_v50, %v4630_v29  ;;  %v2546_v43 = vadd.f32 %v2538_v32, %v4620_v1  ;;  %v2548_v47 = vadd.f32 %v2540_v33, %v4622_v4 }
0x109f   : > { %v2553_v39 = vmul.f32 0.7978846, %v2545_v34  ;;  %v2555_v40 = vmul.f32 0.7978846, %v2547_v3  ;;  %v2549_v41 = vadd.f32 %v2541_v36, %v2466_v57  ;;  %v2551_v42 = vadd.f32 %v2543_v5, %v2509_v6 }
0x10a0   : > { %v2550_v44 = vadd.f32 %v2542_v38, %v4628_v14  ;;  %v2554_v48 = vmul.f32 0.7978846, %v2546_v43  ;;  %v2552_v37 = vadd.f32 %v2544_v11, %v4630_v29  ;;  %v2556_v51 = vmul.f32 0.7978846, %v2548_v47 }
0x10a1   : > { %3766 = vtanh.f32 %v2553_v39  ;;  %v2557_v45 = vmul.f32 0.7978846, %v2549_v41  ;;  %v2559_v46 = vmul.f32 0.7978846, %v2551_v42  ;;  %v2513_v20 = vmul.f32 0.5, %v4616_v62 }
0x10a2   : > { %3768 = vtanh.f32 %v2555_v40  ;;  %v2558_v35 = vmul.f32 0.7978846, %v2550_v44  ;;  %v2560_v52 = vmul.f32 0.7978846, %v2552_v37  ;;  %v2517_v61 = vmul.f32 0.5, %v2466_v57 }
0x10a3   : > { %3770 = vtanh.f32 %v2557_v45  ;;  %v2515_v60 = vmul.f32 0.5, %v4618_v63  ;;  %v2519_v10 = vmul.f32 0.5, %v2509_v6  ;;  %v2514_v7 = vmul.f32 0.5, %v4620_v1 }
0x10a4   : > { %3772 = vtanh.f32 %v2559_v46  ;;  %v2518_v16 = vmul.f32 0.5, %v4628_v14  ;;  %v2516_v57 = vmul.f32 0.5, %v4622_v4  ;;  %v2520_v28 = vmul.f32 0.5, %v4630_v29  ;;  %v3256_v4 = vld [vmem:[%s708_s26] ss:$0 sm:$0xff] }
0x10a5   : > { %3774 = vtanh.f32 %v2554_v48 }
0x10a6   : > { %3776 = vtanh.f32 %v2558_v35 }
0x10a7   : > { %3778 = vtanh.f32 %v2556_v51 }
0x10a8   : > { %3780 = vtanh.f32 %v2560_v52 }
0x10ab   : > { %v3767_v53 = vpop.eup %3766 }
0x10ac   : > { %v3769_v21 = vpop.eup %3768  ;;  %v2569_v54 = vadd.f32 1.0, %v3767_v53 }
0x10ad   : > { %v3771_v55 = vpop.eup %3770  ;;  %v2571_v58 = vadd.f32 1.0, %v3769_v21 }
0x10ae   : > { %v3773_v59 = vpop.eup %3772  ;;  %v2573_v0 = vadd.f32 1.0, %v3771_v55  ;;  %v2577_v9 = vmul.f32 %v2569_v54, %v2513_v20  ;;  %v3289_v20 = vld [vmem:[%s711_s30] ss:$0 sm:$0xff] }
0x10af   : > { %v3775_v2 = vpop.eup %3774  ;;  %v2575_v12 = vadd.f32 1.0, %v3773_v59  ;;  %v2579_v22 = vmul.f32 %v2571_v58, %v2515_v60 }
0x10b0   : > { %v3777_v56 = vpop.eup %3776  ;;  %v2570_v8 = vadd.f32 1.0, %v3775_v2  ;;  %v2581_v13 = vmul.f32 %v2573_v0, %v2517_v61  ;;  %v3290_v2 = vld [vmem:[%s714_s4] ss:$0 sm:$0xff] }
0x10b1   : > { %v3779_v15 = vpop.eup %3778  ;;  %v2574_v17 = vadd.f32 1.0, %v3777_v56  ;;  %v2583_v23 = vmul.f32 %v2575_v12, %v2519_v10 }
0x10b2   : > { %v3781_v62 = vpop.eup %3780  ;;  %v2572_v63 = vadd.f32 1.0, %v3779_v15  ;;  %v2585_v6 = vpack.c.bf16 %v2581_v13, %v2577_v9  ;;  %v2578_v24 = vmul.f32 %v2570_v8, %v2514_v7 }
0x10b3   : > { %v2582_v25 = vmul.f32 %v2574_v17, %v2518_v16  ;;  %v2576_v1 = vadd.f32 1.0, %v3781_v62  ;;  %v2587_v26 = vpack.c.bf16 %v2583_v23, %v2579_v22 }
0x10b4   : > { %v2580_v30 = vmul.f32 %v2572_v63, %v2516_v57 }
0x10b5   : > { %v2586_v27 = vpack.c.bf16 %v2582_v25, %v2578_v24  ;;  %v2584_v31 = vmul.f32 %v2576_v1, %v2520_v28 }
0x10b7   : > { %2884 = vmatprep.mubr.bf16.mxu0 %v2586_v27  ;;  %v2588_v14 = vpack.c.bf16 %v2584_v31, %v2580_v30 }
0x10b8   : > { %2885 = vmatmul.mubr.bf16.vlgmr.msra.gmra.mrb[48].mxu0 %v2585_v6 }
0x10b9   : > { %2925 = vmatprep.mubr.bf16.mxu1 %v2588_v14 }
0x10ba   : > { %2926 = vmatmul.mubr.bf16.vlgmr.msra.gmra.mrb[48].mxu1 %v2587_v26 }
0x118b   : > { %v3365_v32 = vpop.f32.mrb[48].mxu0 }
0x118c   : > { %v3366_v29 = vpop.f32.mrb[49].mxu0 }
0x118d   : > { %v3387_v33 = vpop.f32.mrb[48].mxu1  ;;  %v3367_v49 = vadd.f32 %v3366_v29, %v3365_v32  ;;  %v3368_v50 = vpop.f32.mrb[50].mxu0 }
0x118e   : > { %v3388_v34 = vpop.f32.mrb[49].mxu1  ;;  %v3369_v3 = vpop.f32.mrb[51].mxu0 }
0x118f   : > { %v2887_v36 = vadd.f32 %v3367_v49, %v3256_v4  ;;  %v3389_v5 = vadd.f32 %v3388_v34, %v3387_v33  ;;  %v3390_v38 = vpop.f32.mrb[50].mxu1  ;;  %v3370_v11 = vadd.f32 %v3369_v3, %v3368_v50 }
0x1190   : > { %v3391_v39 = vpop.f32.mrb[51].mxu1 }
0x1191   : > { %v2928_v40 = vadd.f32 %v3389_v5, %v2887_v36  ;;  %v2890_v41 = vadd.f32 %v3370_v11, %v3256_v4  ;;  %v3392_v42 = vadd.f32 %v3391_v39, %v3390_v38 }
0x1193   : > { %v2931_v43 = vadd.f32 %v3392_v42, %v2890_v41  ;;  %v2934_v44 = vadd.f32 %v2928_v40, %v4570_v18 }
0x1195   : > { %2938 = vadd.xlane.f32.xlu0 %v2934_v44  ;;  %v2935_v45 = vadd.f32 %v2931_v43, %v4572_v19 }
0x1197   : > { %2940 = vadd.xlane.f32.xlu1 %v2935_v45 }
0x1222   : > { %v2939_v46 = vpop.xlane.xlu0 %2938 }
0x1223   : > { %v2942_v47 = vmul.f32 0.0078125, %v2939_v46 }
0x1224   : > { %v2941_v48 = vpop.xlane.xlu1 %2940 }
0x1225   : > { %v2944_v35 = vsub.f32 %v2934_v44, %v2942_v47  ;;  %v2943_v37 = vmul.f32 0.0078125, %v2941_v48 }
0x1227   : > { %v2945_v51 = vsub.f32 %v2935_v45, %v2943_v37  ;;  %v2946_v52 = vmul.f32 %v2944_v35, %v2944_v35 }
0x1229   : > { %2948 = vadd.xlane.f32.xlu0 %v2946_v52  ;;  %v2947_v53 = vmul.f32 %v2945_v51, %v2945_v51 }
0x122b   : > { %2950 = vadd.xlane.f32.xlu1 %v2947_v53 }
0x12b6   : > { %v2949_v21 = vpop.xlane.xlu0 %2948 }
0x12b7   : > { %v2952_v54 = vmul.f32 0.0078125, %v2949_v21 }
0x12b8   : > { %v2951_v55 = vpop.xlane.xlu1 %2950 }
0x12b9   : > { %v2954_v18 = vadd.f32 1e-12, %v2952_v54  ;;  %v2953_v58 = vmul.f32 0.0078125, %v2951_v55 }
0x12bb   : > { %3782 = vrsqrt.f32 %v2954_v18  ;;  %v2955_v19 = vadd.f32 1e-12, %v2953_v58 }
0x12bd   : > { %3784 = vrsqrt.f32 %v2955_v19 }
0x12c5   : > { %v3783_v59 = vpop.eup %3782 }
0x12c6   : > { %v2958_v61 = vmul.f32 %v3783_v59, %v2944_v35 }
0x12c7   : > { %v3785_v0 = vpop.eup %3784 }
0x12c8   : > { %v2966_v60 = vmul.f32 %v3289_v20, %v2958_v61  ;;  %v2959_v10 = vmul.f32 %v3785_v0, %v2945_v51 }
0x12ca   : > { %v2974_v12 = vadd.f32 %v3290_v2, %v2966_v60  ;;  %v2967_v56 = vmul.f32 %v3289_v20, %v2959_v10 }
0x12cc   : > { %2976 = vst [vmem:[%s4751_s29] sm:$0xff] %v2974_v12  ;;  %v2975_v7 = vadd.f32 %v3290_v2, %v2967_v56 }
0x12ce   : > { %2977 = vst [vmem:[%s4751_s29 + $0x8] sm:$0xff] %v2975_v7 }
0x12cf PF: > { %s4755_s21 = sld [smem:[#allocation10_spill]]  ;;  %s4756_s30 = sld [smem:[#allocation9_spill]] }
0x12d0   : > { %s4757_s20 = sld [smem:[#allocation11_spill]]  ;;  %s4758_s18 = smov %s3906_s19 }
0x12d5   : > { %p28_p7 = scmp.ge.s32.totalorder %s4755_s21, 4   ;;  %s4759_s19 = smov %s4756_s30 }
0x12d7   :  { %30 = sbr.rel (!%p28_p7) target bundleno = 16 (0x10), region = 171 }
0x12de   :  { %2989 = vsyncpa [#allocation3], 1 }
0x12df   :  { %2991 = vsyncpa [#allocation3 + $0x1], 1 }
0x12e0   :  { %2992 = vsyncpa [#allocation5], 1 }
0x12e1   :  { %2994 = vsyncpa [#allocation5 + $0x1], 1 }

// kernel: seq2seq_forward.3
= control target key start
LH: loop header
LB: loop body
LE: loop exit
PB: predicated region body
PF: predicated region fallthrough
CT: control target
= control target key end

     0   :  { %v3886_v1 = vmov 0   ;;  %s4798_s1 = inlined_call_operand.vmem [shape: bf16[128,512], index: 1, kind: input, shape index: {}]   ;;  %s4799_s2 = inlined_call_operand.vmem [shape: bf16[128,512], index: 2, kind: input, shape index: {}]   ;;  %s4800_s0 = inlined_call_operand.vmem [shape: f32[16,128], index: 0, kind: input, shape index: {}]   ;;  %s4801_s3 = inlined_call_operand.vmem [shape: f32[1,512], index: 3, kind: input, shape index: {}]   ;;  %s4802_s4 = inlined_call_operand.vmem [shape: bf16[128,512], index: 4, kind: input, shape index: {}]   ;;  %s4803_s5 = inlined_call_operand.vmem [shape: f32[1,512], index: 5, kind: input, shape index: {}]   ;;  %s4804_s6 = inlined_call_operand.vmem [shape: f32[16,512], index: 6, kind: output, shape index: {}]  }
   0x1   :  { %v3566_v0 = vld [vmem:[%s4798_s1 + $0x4] ss:$16 sps:$4 sm:$0xff]   ;;  %273 = vmatprep.mubr.bf16.mxu0 %v3886_v1  ;;  %316 = vmatprep.mubr.bf16.mxu1 %v3886_v1  ;;  %v3568_v2 = vld [vmem:[%s4798_s1 + $0xc] ss:$16 sps:$4 sm:$0xff]   ;;  %v3570_v3 = vld [vmem:[%s4798_s1] ss:$16 sps:$4 sm:$0xff]  }
   0x2   :  { %241 = vmatprep.subr.bf16.mxu0 %v3566_v0  ;;  %v3571_v4 = vld [vmem:[%s4798_s1 + $0x8] ss:$16 sps:$4 sm:$0xff]   ;;  %284 = vmatprep.subr.bf16.mxu1 %v3568_v2  ;;  %v3572_v5 = vld [vmem:[%s4798_s1 + $0x24] ss:$16 sps:$4 sm:$0xff]   ;;  %v3574_v6 = vld [vmem:[%s4798_s1 + $0x2c] ss:$16 sps:$4 sm:$0xff]  }
   0x3   :  { %242 = vmatpush1.bf16.msra.mxu0 %v3570_v3  ;;  %285 = vmatpush1.bf16.msra.mxu1 %v3571_v4  ;;  %v3576_v7 = vld [vmem:[%s4798_s1 + $0x20] ss:$16 sps:$4 sm:$0xff]   ;;  %v3577_v8 = vld [vmem:[%s4798_s1 + $0x28] ss:$16 sps:$4 sm:$0xff]   ;;  %v3578_v9 = vld [vmem:[%s4798_s1 + $0x44] ss:$16 sps:$4 sm:$0xff]  }
   0x4   :  { %243 = vmatprep.subr.bf16.mxu0 %v3572_v5  ;;  %286 = vmatprep.subr.bf16.mxu1 %v3574_v6  ;;  %v3580_v10 = vld [vmem:[%s4798_s1 + $0x4c] ss:$16 sps:$4 sm:$0xff]   ;;  %v3582_v11 = vld [vmem:[%s4798_s1 + $0x40] ss:$16 sps:$4 sm:$0xff]   ;;  %v3583_v12 = vld [vmem:[%s4798_s1 + $0x48] ss:$16 sps:$4 sm:$0xff]   ;;  %v61_v5 = vlaneseq }
   0x5   :  { %v3584_v13 = vld [vmem:[%s4798_s1 + $0x64] ss:$16 sps:$4 sm:$0xff]   ;;  %v3586_v14 = vld [vmem:[%s4798_s1 + $0x6c] ss:$16 sps:$4 sm:$0xff]   ;;  %v3588_v15 = vld [vmem:[%s4798_s1 + $0x60] ss:$16 sps:$4 sm:$0xff]  }
   0x6   :  { %v3589_v16 = vld [vmem:[%s4798_s1 + $0x68] ss:$16 sps:$4 sm:$0xff]   ;;  %v3590_v17 = vld [vmem:[%s4798_s1 + $0x84] ss:$16 sps:$4 sm:$0xff]   ;;  %v3592_v18 = vld [vmem:[%s4798_s1 + $0x8c] ss:$16 sps:$4 sm:$0xff]  }
   0x7   :  { %244 = vmatpush1.bf16.msra.mxu0 %v3576_v7  ;;  %287 = vmatpush1.bf16.msra.mxu1 %v3577_v8  ;;  %v3594_v19 = vld [vmem:[%s4798_s1 + $0x80] ss:$16 sps:$4 sm:$0xff]   ;;  %v3595_v20 = vld [vmem:[%s4798_s1 + $0x88] ss:$16 sps:$4 sm:$0xff]   ;;  %v3596_v21 = vld [vmem:[%s4798_s1 + $0xa4] ss:$16 sps:$4 sm:$0xff]  }
   0x8   :  { %245 = vmatprep.subr.bf16.mxu0 %v3578_v9  ;;  %288 = vmatprep.subr.bf16.mxu1 %v3580_v10  ;;  %v3598_v22 = vld [vmem:[%s4798_s1 + $0xac] ss:$16 sps:$4 sm:$0xff]   ;;  %v3600_v23 = vld [vmem:[%s4798_s1 + $0xa0] ss:$16 sps:$4 sm:$0xff]   ;;  %v3601_v24 = vld [vmem:[%s4798_s1 + $0xa8] ss:$16 sps:$4 sm:$0xff]  }
   0x9   :  { %v3602_v25 = vld [vmem:[%s4798_s1 + $0xc4] ss:$16 sps:$4 sm:$0xff]   ;;  %v3604_v26 = vld [vmem:[%s4798_s1 + $0xcc] ss:$16 sps:$4 sm:$0xff]   ;;  %v3606_v27 = vld [vmem:[%s4798_s1 + $0xc0] ss:$16 sps:$4 sm:$0xff]  }
   0xa   :  { %v3607_v28 = vld [vmem:[%s4798_s1 + $0xc8] ss:$16 sps:$4 sm:$0xff]   ;;  %v3608_v29 = vld [vmem:[%s4798_s1 + $0xe4] ss:$16 sps:$4 sm:$0xff]   ;;  %v3610_v30 = vld [vmem:[%s4798_s1 + $0xec] ss:$16 sps:$4 sm:$0xff]  }
   0xb   :  { %246 = vmatpush1.bf16.msra.mxu0 %v3582_v11  ;;  %289 = vmatpush1.bf16.msra.mxu1 %v3583_v12  ;;  %v3612_v31 = vld [vmem:[%s4798_s1 + $0xe0] ss:$16 sps:$4 sm:$0xff]   ;;  %v3613_v32 = vld [vmem:[%s4798_s1 + $0xe8] ss:$16 sps:$4 sm:$0xff]   ;;  %v4029_v35 = vld [vmem:[%s4799_s2 + $0x4] ss:$16 sps:$4 sm:$0xff]  }
   0xc   :  { %247 = vmatprep.subr.bf16.mxu0 %v3584_v13  ;;  %290 = vmatprep.subr.bf16.mxu1 %v3586_v14  ;;  %v24_v33 = vld [vmem:[%s4800_s0] sm:$0xff]  ;;  %v25_v34 = vld [vmem:[%s4800_s0 + $0x8] sm:$0xff]  ;;  %v4258_v6 = vshrl.u32 %v61_v5, 7 }
   0xd   :  { %v4034_v36 = vld [vmem:[%s4799_s2 + $0xc] ss:$16 sps:$4 sm:$0xff]   ;;  %v26_v37 = vpack.c.bf16 %v25_v34, %v24_v33  ;;  %v4039_v38 = vld [vmem:[%s4799_s2] ss:$16 sps:$4 sm:$0xff]   ;;  %v4044_v39 = vld [vmem:[%s4799_s2 + $0x8] ss:$16 sps:$4 sm:$0xff]  }
   0xe   :  { %v4051_v40 = vld [vmem:[%s4799_s2 + $0x24] ss:$16 sps:$4 sm:$0xff]   ;;  %v4056_v41 = vld [vmem:[%s4799_s2 + $0x2c] ss:$16 sps:$4 sm:$0xff]   ;;  %v4063_v42 = vld [vmem:[%s4799_s2 + $0x20] ss:$16 sps:$4 sm:$0xff]  }
   0xf   :  { %248 = vmatpush1.bf16.msra.mxu0 %v3588_v15  ;;  %291 = vmatpush1.bf16.msra.mxu1 %v3589_v16  ;;  %v4068_v43 = vld [vmem:[%s4799_s2 + $0x28] ss:$16 sps:$4 sm:$0xff]   ;;  %v4075_v44 = vld [vmem:[%s4799_s2 + $0x44] ss:$16 sps:$4 sm:$0xff]   ;;  %v4080_v45 = vld [vmem:[%s4799_s2 + $0x4c] ss:$16 sps:$4 sm:$0xff]  }
  0x10   :  { %249 = vmatprep.subr.bf16.mxu0 %v3590_v17  ;;  %292 = vmatprep.subr.bf16.mxu1 %v3592_v18  ;;  %v4089_v46 = vld [vmem:[%s4799_s2 + $0x40] ss:$16 sps:$4 sm:$0xff]   ;;  %v4094_v47 = vld [vmem:[%s4799_s2 + $0x48] ss:$16 sps:$4 sm:$0xff]   ;;  %v4101_v48 = vld [vmem:[%s4799_s2 + $0x64] ss:$16 sps:$4 sm:$0xff]  }
  0x11   :  { %v4106_v49 = vld [vmem:[%s4799_s2 + $0x6c] ss:$16 sps:$4 sm:$0xff]   ;;  %v4111_v50 = vld [vmem:[%s4799_s2 + $0x60] ss:$16 sps:$4 sm:$0xff]   ;;  %v4116_v51 = vld [vmem:[%s4799_s2 + $0x68] ss:$16 sps:$4 sm:$0xff]  }
  0x12   :  { %v4121_v52 = vld [vmem:[%s4799_s2 + $0x84] ss:$16 sps:$4 sm:$0xff]   ;;  %v4126_v53 = vld [vmem:[%s4799_s2 + $0x8c] ss:$16 sps:$4 sm:$0xff]   ;;  %v4135_v54 = vld [vmem:[%s4799_s2 + $0x80] ss:$16 sps:$4 sm:$0xff]  }
  0x13   :  { %250 = vmatpush1.bf16.msra.mxu0 %v3594_v19  ;;  %293 = vmatpush1.bf16.msra.mxu1 %v3595_v20  ;;  %v4140_v55 = vld [vmem:[%s4799_s2 + $0x88] ss:$16 sps:$4 sm:$0xff]   ;;  %v4145_v56 = vld [vmem:[%s4799_s2 + $0xa4] ss:$16 sps:$4 sm:$0xff]   ;;  %v4150_v57 = vld [vmem:[%s4799_s2 + $0xac] ss:$16 sps:$4 sm:$0xff]  }
  0x14   :  { %251 = vmatprep.subr.bf16.mxu0 %v3596_v21  ;;  %294 = vmatprep.subr.bf16.mxu1 %v3598_v22  ;;  %v4159_v58 = vld [vmem:[%s4799_s2 + $0xa0] ss:$16 sps:$4 sm:$0xff]   ;;  %v4164_v59 = vld [vmem:[%s4799_s2 + $0xa8] ss:$16 sps:$4 sm:$0xff]   ;;  %v4169_v60 = vld [vmem:[%s4799_s2 + $0xc4] ss:$16 sps:$4 sm:$0xff]  }
  0x15   :  { %v4174_v61 = vld [vmem:[%s4799_s2 + $0xcc] ss:$16 sps:$4 sm:$0xff]   ;;  %v4185_v62 = vld [vmem:[%s4799_s2 + $0xc0] ss:$16 sps:$4 sm:$0xff]   ;;  %v4190_v63 = vld [vmem:[%s4799_s2 + $0xc8] ss:$16 sps:$4 sm:$0xff]  }
  0x16   :  { %v4197_v0 = vld [vmem:[%s4799_s2 + $0xe4] ss:$16 sps:$4 sm:$0xff]   ;;  %v4202_v2 = vld [vmem:[%s4799_s2 + $0xec] ss:$16 sps:$4 sm:$0xff]   ;;  %v4209_v3 = vld [vmem:[%s4799_s2 + $0xe0] ss:$16 sps:$4 sm:$0xff]  }
  0x17   :  { %252 = vmatpush1.bf16.msra.mxu0 %v3600_v23  ;;  %295 = vmatpush1.bf16.msra.mxu1 %v3601_v24  ;;  %v4214_v4 = vld [vmem:[%s4799_s2 + $0xe8] ss:$16 sps:$4 sm:$0xff]   ;;  %v63_v7 = vsub.s32 0, %v4258_v6  ;;  %v71_v8 = vsub.s32 2, %v4258_v6  ;;  %v59_v9 = vld [vmem:[%s4801_s3] sm:$0xf] }
  0x18   :  { %253 = vmatprep.subr.bf16.mxu0 %v3602_v25  ;;  %296 = vmatprep.subr.bf16.mxu1 %v3604_v26  ;;  %v67_v10 = vsub.s32 1, %v4258_v6  ;;  %v75_v11 = vsub.s32 3, %v4258_v6 }
  0x19   :  { %v64_v12 = vrot.slane %v59_v9, %v63_v7  ;;  %v72_v13 = vrot.slane %v59_v9, %v71_v8 }
  0x1a   :  { %v68_v14 = vrot.slane %v59_v9, %v67_v10  ;;  %v76_v15 = vrot.slane %v59_v9, %v75_v11 }
  0x1b   :  { %254 = vmatpush1.bf16.msra.mxu0 %v3606_v27  ;;  %297 = vmatpush1.bf16.msra.mxu1 %v3607_v28 }
  0x1c   :  { %255 = vmatprep.subr.bf16.mxu0 %v3608_v29  ;;  %298 = vmatprep.subr.bf16.mxu1 %v3610_v30 }
  0x1f   :  { %256 = vmatpush1.bf16.msra.mxu0 %v3612_v31  ;;  %299 = vmatpush1.bf16.msra.mxu1 %v3613_v32 }
  0x20   :  { %531 = vmatprep.subr.bf16.mxu0 %v4029_v35  ;;  %572 = vmatprep.subr.bf16.mxu1 %v4034_v36 }
  0x22   :  { %274 = vmatmul.mubr.bf16.vlgmr.msra.gmra.mrb[0].mxu0 %v26_v37  ;;  %317 = vmatmul.mubr.bf16.vlgmr.msra.gmra.mrb[0].mxu1 %v26_v37 }
  0x23   :  { %532 = vmatpush1.bf16.msra.mxu0 %v4039_v38  ;;  %573 = vmatpush1.bf16.msra.mxu1 %v4044_v39 }
  0x24   :  { %533 = vmatprep.subr.bf16.mxu0 %v4051_v40  ;;  %574 = vmatprep.subr.bf16.mxu1 %v4056_v41 }
  0x25   :  { %563 = vmatprep.mubr.bf16.mxu0 %v3886_v1  ;;  %604 = vmatprep.mubr.bf16.mxu1 %v3886_v1 }
  0x27   :  { %534 = vmatpush1.bf16.msra.mxu0 %v4063_v42  ;;  %575 = vmatpush1.bf16.msra.mxu1 %v4068_v43 }
  0x28   :  { %535 = vmatprep.subr.bf16.mxu0 %v4075_v44  ;;  %576 = vmatprep.subr.bf16.mxu1 %v4080_v45 }
  0x2b   :  { %536 = vmatpush1.bf16.msra.mxu0 %v4089_v46  ;;  %577 = vmatpush1.bf16.msra.mxu1 %v4094_v47 }
  0x2c   :  { %537 = vmatprep.subr.bf16.mxu0 %v4101_v48  ;;  %578 = vmatprep.subr.bf16.mxu1 %v4106_v49 }
  0x2f   :  { %538 = vmatpush1.bf16.msra.mxu0 %v4111_v50  ;;  %579 = vmatpush1.bf16.msra.mxu1 %v4116_v51 }
  0x30   :  { %539 = vmatprep.subr.bf16.mxu0 %v4121_v52  ;;  %580 = vmatprep.subr.bf16.mxu1 %v4126_v53 }
  0x33   :  { %540 = vmatpush1.bf16.msra.mxu0 %v4135_v54  ;;  %581 = vmatpush1.bf16.msra.mxu1 %v4140_v55 }
  0x34   :  { %541 = vmatprep.subr.bf16.mxu0 %v4145_v56  ;;  %582 = vmatprep.subr.bf16.mxu1 %v4150_v57 }
  0x37   :  { %542 = vmatpush1.bf16.msra.mxu0 %v4159_v58  ;;  %583 = vmatpush1.bf16.msra.mxu1 %v4164_v59 }
  0x38   :  { %543 = vmatprep.subr.bf16.mxu0 %v4169_v60  ;;  %584 = vmatprep.subr.bf16.mxu1 %v4174_v61 }
  0x3b   :  { %544 = vmatpush1.bf16.msra.mxu0 %v4185_v62  ;;  %585 = vmatpush1.bf16.msra.mxu1 %v4190_v63 }
  0x3c   :  { %545 = vmatprep.subr.bf16.mxu0 %v4197_v0  ;;  %586 = vmatprep.subr.bf16.mxu1 %v4202_v2 }
  0x3f   :  { %546 = vmatpush1.bf16.msra.mxu0 %v4209_v3  ;;  %587 = vmatpush1.bf16.msra.mxu1 %v4214_v4 }
  0x40   :  { %839 = vmatprep.subr.bf16.mxu0 %v4029_v35  ;;  %880 = vmatprep.subr.bf16.mxu1 %v4034_v36 }
  0x42   :  { %564 = vmatmul.mubr.bf16.vlgmr.msra.gmra.mrb[4].mxu0 %v3886_v1  ;;  %605 = vmatmul.mubr.bf16.vlgmr.msra.gmra.mrb[4].mxu1 %v3886_v1 }
  0x43   :  { %840 = vmatpush1.bf16.msra.mxu0 %v4039_v38  ;;  %881 = vmatpush1.bf16.msra.mxu1 %v4044_v39 }
  0x44   :  { %841 = vmatprep.subr.bf16.mxu0 %v4051_v40  ;;  %882 = vmatprep.subr.bf16.mxu1 %v4056_v41 }
  0x45   :  { %871 = vmatprep.mubr.bf16.mxu0 %v3886_v1  ;;  %912 = vmatprep.mubr.bf16.mxu1 %v3886_v1 }
  0x47   :  { %842 = vmatpush1.bf16.msra.mxu0 %v4063_v42  ;;  %883 = vmatpush1.bf16.msra.mxu1 %v4068_v43 }
  0x48   :  { %843 = vmatprep.subr.bf16.mxu0 %v4075_v44  ;;  %884 = vmatprep.subr.bf16.mxu1 %v4080_v45 }
  0x4b   :  { %844 = vmatpush1.bf16.msra.mxu0 %v4089_v46  ;;  %885 = vmatpush1.bf16.msra.mxu1 %v4094_v47 }
  0x4c   :  { %845 = vmatprep.subr.bf16.mxu0 %v4101_v48  ;;  %886 = vmatprep.subr.bf16.mxu1 %v4106_v49 }
  0x4f   :  { %846 = vmatpush1.bf16.msra.mxu0 %v4111_v50  ;;  %887 = vmatpush1.bf16.msra.mxu1 %v4116_v51 }
  0x50   :  { %847 = vmatprep.subr.bf16.mxu0 %v4121_v52  ;;  %888 = vmatprep.subr.bf16.mxu1 %v4126_v53 }
  0x53   :  { %848 = vmatpush1.bf16.msra.mxu0 %v4135_v54  ;;  %889 = vmatpush1.bf16.msra.mxu1 %v4140_v55 }
  0x54   :  { %849 = vmatprep.subr.bf16.mxu0 %v4145_v56  ;;  %890 = vmatprep.subr.bf16.mxu1 %v4150_v57 }
  0x57   :  { %850 = vmatpush1.bf16.msra.mxu0 %v4159_v58  ;;  %891 = vmatpush1.bf16.msra.mxu1 %v4164_v59 }
  0x58   :  { %851 = vmatprep.subr.bf16.mxu0 %v4169_v60  ;;  %892 = vmatprep.subr.bf16.mxu1 %v4174_v61 }
  0x5b   :  { %852 = vmatpush1.bf16.msra.mxu0 %v4185_v62  ;;  %893 = vmatpush1.bf16.msra.mxu1 %v4190_v63 }
  0x5c   :  { %853 = vmatprep.subr.bf16.mxu0 %v4197_v0  ;;  %894 = vmatprep.subr.bf16.mxu1 %v4202_v2 }
  0x5f   :  { %854 = vmatpush1.bf16.msra.mxu0 %v4209_v3  ;;  %895 = vmatpush1.bf16.msra.mxu1 %v4214_v4 }
  0x60   :  { %1165 = vmatprep.subr.bf16.mxu0 %v4029_v35  ;;  %1206 = vmatprep.subr.bf16.mxu1 %v4034_v36 }
  0xf5   :  { %v275_v16 = vpop.f32.mrb[0].mxu0  ;;  %v318_v17 = vpop.f32.mrb[0].mxu1 }
  0xf6   :  { %v276_v18 = vadd.f32 %v275_v16, %v64_v12  ;;  %v277_v19 = vpop.f32.mrb[1].mxu0  ;;  %v319_v20 = vadd.f32 %v318_v17, %v72_v13  ;;  %v320_v21 = vpop.f32.mrb[1].mxu1 }
  0xf7   :  { %v278_v22 = vadd.f32 %v277_v19, %v68_v14  ;;  %v279_v23 = vpop.f32.mrb[2].mxu0  ;;  %v321_v24 = vadd.f32 %v320_v21, %v76_v15  ;;  %v322_v25 = vpop.f32.mrb[2].mxu1 }
  0xf8   :  { %327 = vst [vmem:[#allocation2] sm:$0xff] %v276_v18  ;;  %v280_v26 = vadd.f32 %v279_v23, %v64_v12  ;;  %v281_v27 = vpop.f32.mrb[3].mxu0  ;;  %329 = vst [vmem:[#allocation2 + $0x10] sm:$0xff] %v319_v20  ;;  %v323_v28 = vadd.f32 %v322_v25, %v72_v13  ;;  %v324_v29 = vpop.f32.mrb[3].mxu1 }
  0xf9   :  { %328 = vst [vmem:[#allocation2 + $0x8] sm:$0xff] %v278_v22  ;;  %v282_v30 = vadd.f32 %v281_v27, %v68_v14  ;;  %330 = vst [vmem:[#allocation2 + $0x18] sm:$0xff] %v321_v24  ;;  %v325_v31 = vadd.f32 %v324_v29, %v76_v15 }
  0xfa   :  { %331 = vst [vmem:[#allocation2 + $0x20] sm:$0xff] %v280_v26  ;;  %333 = vst [vmem:[#allocation2 + $0x30] sm:$0xff] %v323_v28 }
  0xfb   :  { %332 = vst [vmem:[#allocation2 + $0x28] sm:$0xff] %v282_v30  ;;  %334 = vst [vmem:[#allocation2 + $0x38] sm:$0xff] %v325_v31 }
  0xff   :  { %v335_v32 = vld [vmem:[#allocation2] sm:$0x3]  ;;  %v337_v22 = vld [vmem:[#allocation2 + $0x10] sm:$0x3] }
 0x100   :  { %v336_v5 = vld [vmem:[#allocation2 + $0x8] sm:$0x3]  ;;  %v338_v15 = vld [vmem:[#allocation2 + $0x18] sm:$0x3] }
 0x115   :  { %v565_v33 = vpop.f32.mrb[4].mxu0  ;;  %v606_v34 = vpop.f32.mrb[4].mxu1 }
 0x116   :  { %v613_v37 = vadd.f32 %v565_v33, %v335_v32  ;;  %v567_v9 = vpop.f32.mrb[5].mxu0  ;;  %v608_v16 = vpop.f32.mrb[5].mxu1  ;;  %v615_v24 = vadd.f32 %v606_v34, %v337_v22 }
 0x117   :  { %v614_v12 = vadd.f32 %v567_v9, %v336_v5  ;;  %v569_v17 = vpop.f32.mrb[6].mxu0  ;;  %v610_v18 = vpop.f32.mrb[6].mxu1  ;;  %v616_v21 = vadd.f32 %v608_v16, %v338_v15  ;;  %v642_v15 = vld [vmem:[#allocation2] sm:$0xc] }
 0x118   :  { %v3285_v13 = vmul.f32 -1.442695, %v613_v37  ;;  %v570_v19 = vpop.f32.mrb[7].mxu0  ;;  %v611_v20 = vpop.f32.mrb[7].mxu1 }
 0x119   :  { %v3286_v14 = vmul.f32 -1.442695, %v614_v12  ;;  %v3287_v23 = vmul.f32 -1.442695, %v616_v21 }
 0x11a   :  { %3758 = vpow2.f32 %v3285_v13 }
 0x11b   :  { %3760 = vpow2.f32 %v3286_v14 }
 0x11c   :  { %3762 = vpow2.f32 %v3287_v23 }
 0x11d   :  { %3764 = vtanh.f32 %v615_v24 }
 0x124   :  { %v3759_v25 = vpop.eup %3758 }
 0x125   :  { %v3761_v26 = vpop.eup %3760  ;;  %v620_v27 = vadd.f32 1.0, %v3759_v25  ;;  %v643_v25 = vld [vmem:[#allocation2 + $0x8] sm:$0xc] }
 0x126   :  { %v626_v28 = vadd.f32 1.0, %v3761_v26  ;;  %v3763_v29 = vpop.eup %3762 }
 0x127   :  { %3766 = vrcp.f32 %v620_v27  ;;  %v3765_v30 = vpop.eup %3764  ;;  %v633_v37 = vadd.f32 1.0, %v3763_v29 }
 0x128   :  { %3768 = vrcp.f32 %v626_v28 }
 0x129   :  { %3770 = vrcp.f32 %v633_v37 }
 0x131   :  { %v3767_v31 = vpop.eup %3766 }
 0x132   :  { %v3769_v32 = vpop.eup %3768  ;;  %v637_v33 = vmul.f32 %v3767_v31, %v3765_v30 }
 0x133   :  { %v636_v5 = vmul.f32 0.0, %v3769_v32  ;;  %v3771_v34 = vpop.eup %3770 }
 0x135   :  { %v4275_v9 = vadd.f32 %v637_v33, %v636_v5  ;;  %v644_v33 = vld [vmem:[#allocation2 + $0x10] sm:$0xc] }
 0x137   :  { %3772 = vtanh.f32 %v4275_v9 }
 0x141   :  { %v3773_v16 = vpop.eup %3772 }
 0x142   :  { %v640_v12 = vmul.f32 %v3773_v16, %v3771_v34 }
 0x144   :  { %641 = vst [vmem:[#allocation3] sm:$0x3] %v640_v12  ;;  %v646_v17 = vpack.c.bf16 %v640_v12, %v640_v12 }
 0x146   :  { %872 = vmatmul.mubr.bf16.vlgmr.msra.gmra.mrb[8].mxu0 %v646_v17  ;;  %913 = vmatmul.mubr.bf16.vlgmr.msra.gmra.mrb[8].mxu1 %v646_v17 }
 0x147   :  { %1166 = vmatpush1.bf16.msra.mxu0 %v4039_v38  ;;  %1207 = vmatpush1.bf16.msra.mxu1 %v4044_v39 }
 0x148   :  { %1167 = vmatprep.subr.bf16.mxu0 %v4051_v40  ;;  %1208 = vmatprep.subr.bf16.mxu1 %v4056_v41 }
 0x149   :  { %1197 = vmatprep.mubr.bf16.mxu0 %v3886_v1  ;;  %1238 = vmatprep.mubr.bf16.mxu1 %v3886_v1 }
 0x14b   :  { %1168 = vmatpush1.bf16.msra.mxu0 %v4063_v42  ;;  %1209 = vmatpush1.bf16.msra.mxu1 %v4068_v43 }
 0x14c   :  { %1169 = vmatprep.subr.bf16.mxu0 %v4075_v44  ;;  %1210 = vmatprep.subr.bf16.mxu1 %v4080_v45 }
 0x14f   :  { %1170 = vmatpush1.bf16.msra.mxu0 %v4089_v46  ;;  %1211 = vmatpush1.bf16.msra.mxu1 %v4094_v47 }
 0x150   :  { %1171 = vmatprep.subr.bf16.mxu0 %v4101_v48  ;;  %1212 = vmatprep.subr.bf16.mxu1 %v4106_v49 }
 0x153   :  { %1172 = vmatpush1.bf16.msra.mxu0 %v4111_v50  ;;  %1213 = vmatpush1.bf16.msra.mxu1 %v4116_v51 }
 0x154   :  { %1173 = vmatprep.subr.bf16.mxu0 %v4121_v52  ;;  %1214 = vmatprep.subr.bf16.mxu1 %v4126_v53 }
 0x157   :  { %1174 = vmatpush1.bf16.msra.mxu0 %v4135_v54  ;;  %1215 = vmatpush1.bf16.msra.mxu1 %v4140_v55 }
 0x158   :  { %1175 = vmatprep.subr.bf16.mxu0 %v4145_v56  ;;  %1216 = vmatprep.subr.bf16.mxu1 %v4150_v57 }
 0x15b   :  { %1176 = vmatpush1.bf16.msra.mxu0 %v4159_v58  ;;  %1217 = vmatpush1.bf16.msra.mxu1 %v4164_v59 }
 0x15c   :  { %1177 = vmatprep.subr.bf16.mxu0 %v4169_v60  ;;  %1218 = vmatprep.subr.bf16.mxu1 %v4174_v61 }
 0x15f   :  { %1178 = vmatpush1.bf16.msra.mxu0 %v4185_v62  ;;  %1219 = vmatpush1.bf16.msra.mxu1 %v4190_v63 }
 0x160   :  { %1179 = vmatprep.subr.bf16.mxu0 %v4197_v0  ;;  %1220 = vmatprep.subr.bf16.mxu1 %v4202_v2 }
 0x163   :  { %1180 = vmatpush1.bf16.msra.mxu0 %v4209_v3  ;;  %1221 = vmatpush1.bf16.msra.mxu1 %v4214_v4 }
 0x164   :  { %1491 = vmatprep.subr.bf16.mxu0 %v4029_v35  ;;  %1532 = vmatprep.subr.bf16.mxu1 %v4034_v36  ;;  %v645_v35 = vld [vmem:[#allocation2 + $0x18] sm:$0xc] }
 0x219   :  { %v873_v18 = vpop.f32.mrb[8].mxu0  ;;  %v914_v13 = vpop.f32.mrb[8].mxu1 }
 0x21a   :  { %v925_v19 = vrot.slane %v873_v18, 6  ;;  %v875_v20 = vpop.f32.mrb[9].mxu0  ;;  %v916_v14 = vpop.f32.mrb[9].mxu1  ;;  %v927_v32 = vrot.slane %v914_v13, 6 }
 0x21b   :  { %v926_v21 = vrot.slane %v875_v20, 6  ;;  %v877_v22 = vpop.f32.mrb[10].mxu0  ;;  %v918_v23 = vpop.f32.mrb[10].mxu1  ;;  %v928_v31 = vrot.slane %v916_v14, 6  ;;  %v957_v14 = vrot.slane %v4275_v9, 6 }
 0x21c   :  { %v933_v24 = vadd.f32 %v925_v19, %v642_v15  ;;  %v878_v26 = vpop.f32.mrb[11].mxu0  ;;  %v919_v27 = vpop.f32.mrb[11].mxu1  ;;  %v935_v5 = vadd.f32 %v927_v32, %v644_v33 }
 0x21d   :  { %v934_v28 = vadd.f32 %v926_v21, %v643_v25  ;;  %v936_v36 = vadd.f32 %v928_v31, %v645_v35 }
 0x21e   :  { %v3320_v29 = vmul.f32 -1.442695, %v933_v24 }
 0x21f   :  { %v3321_v30 = vmul.f32 -1.442695, %v934_v28  ;;  %v3322_v37 = vmul.f32 -1.442695, %v936_v36 }
 0x220   :  { %3774 = vpow2.f32 %v3320_v29 }
 0x221   :  { %3776 = vpow2.f32 %v3321_v30 }
 0x222   :  { %3778 = vpow2.f32 %v3322_v37 }
 0x223   :  { %3780 = vtanh.f32 %v935_v5 }
 0x22a   :  { %v3775_v34 = vpop.eup %3774 }
 0x22b   :  { %v3777_v16 = vpop.eup %3776  ;;  %v940_v12 = vadd.f32 1.0, %v3775_v34 }
 0x22c   :  { %v946_v17 = vadd.f32 1.0, %v3777_v16  ;;  %v3779_v18 = vpop.eup %3778  ;;  %v4357_v16 = vld [vmem:[%s4799_s2 + $0x4] ss:$16 sps:$4 sm:$0xff]  }
 0x22d   :  { %3782 = vrcp.f32 %v940_v12  ;;  %v3781_v19 = vpop.eup %3780  ;;  %v953_v22 = vadd.f32 1.0, %v3779_v18  ;;  %v4362_v12 = vld [vmem:[%s4799_s2 + $0xc] ss:$16 sps:$4 sm:$0xff]   ;;  %v4372_v18 = vld [vmem:[%s4799_s2 + $0x8] ss:$16 sps:$4 sm:$0xff]  }
 0x22e   :  { %3784 = vrcp.f32 %v946_v17  ;;  %v4367_v17 = vld [vmem:[%s4799_s2] ss:$16 sps:$4 sm:$0xff]  }
 0x22f   :  { %3786 = vrcp.f32 %v953_v22  ;;  %v4410_v22 = vld [vmem:[%s4799_s2 + $0x4c] ss:$16 sps:$4 sm:$0xff]  }
 0x237   :  { %v3783_v20 = vpop.eup %3782 }
 0x238   :  { %v3785_v15 = vpop.eup %3784  ;;  %v960_v21 = vmul.f32 %v3783_v20, %v3781_v19  ;;  %v4381_v19 = vld [vmem:[%s4799_s2 + $0x24] ss:$16 sps:$4 sm:$0xff]   ;;  %v4386_v20 = vld [vmem:[%s4799_s2 + $0x2c] ss:$16 sps:$4 sm:$0xff]  }
 0x239   :  { %v959_v13 = vmul.f32 %v3785_v15, %v957_v14  ;;  %v3787_v24 = vpop.eup %3786  ;;  %v4391_v14 = vld [vmem:[%s4799_s2 + $0x20] ss:$16 sps:$4 sm:$0xff]   ;;  %v4396_v15 = vld [vmem:[%s4799_s2 + $0x28] ss:$16 sps:$4 sm:$0xff]  }
 0x23b   :  { %v4313_v23 = vadd.f32 %v960_v21, %v959_v13  ;;  %v4405_v21 = vld [vmem:[%s4799_s2 + $0x44] ss:$16 sps:$4 sm:$0xff]   ;;  %v4415_v13 = vld [vmem:[%s4799_s2 + $0x40] ss:$16 sps:$4 sm:$0xff]  }
 0x23d   :  { %3788 = vtanh.f32 %v4313_v23  ;;  %v1283_v9 = vrot.slane %v4313_v23, 6  ;;  %v4420_v23 = vld [vmem:[%s4799_s2 + $0x48] ss:$16 sps:$4 sm:$0xff]  }
 0x247   :  { %v3789_v25 = vpop.eup %3788 }
 0x248   :  { %v963_v26 = vmul.f32 %v3789_v25, %v3787_v24  ;;  %v4429_v24 = vld [vmem:[%s4799_s2 + $0x60] ss:$16 sps:$4 sm:$0xff]   ;;  %v4434_v25 = vld [vmem:[%s4799_s2 + $0x64] ss:$16 sps:$4 sm:$0xff]  }
 0x24a   :  { %964 = vst [vmem:[#allocation3] sm:$0xc] %v963_v26  ;;  %v969_v27 = vpack.c.bf16 %v963_v26, %v963_v26  ;;  %v4439_v26 = vld [vmem:[%s4799_s2 + $0x68] ss:$16 sps:$4 sm:$0xff]  }
 0x24c   :  { %v1003_v28 = vrot.slane %v969_v27, 1  ;;  %v4444_v27 = vld [vmem:[%s4799_s2 + $0x6c] ss:$16 sps:$4 sm:$0xff]  }
 0x24e   :  { %1198 = vmatmul.mubr.bf16.vlgmr.msra.gmra.mrb[12].mxu0 %v1003_v28  ;;  %1239 = vmatmul.mubr.bf16.vlgmr.msra.gmra.mrb[12].mxu1 %v1003_v28  ;;  %v4449_v28 = vld [vmem:[%s4799_s2 + $0x84] ss:$16 sps:$4 sm:$0xff]  }
 0x24f   :  { %1492 = vmatpush1.bf16.msra.mxu0 %v4039_v38  ;;  %1533 = vmatpush1.bf16.msra.mxu1 %v4044_v39 }
 0x250   :  { %1493 = vmatprep.subr.bf16.mxu0 %v4051_v40  ;;  %1534 = vmatprep.subr.bf16.mxu1 %v4056_v41 }
 0x251   :  { %1523 = vmatprep.mubr.bf16.mxu0 %v3886_v1  ;;  %1564 = vmatprep.mubr.bf16.mxu1 %v3886_v1 }
 0x253   :  { %1494 = vmatpush1.bf16.msra.mxu0 %v4063_v42  ;;  %1535 = vmatpush1.bf16.msra.mxu1 %v4068_v43  ;;  %v965_v43 = vld [vmem:[#allocation2] sm:$0x30] }
 0x254   :  { %1495 = vmatprep.subr.bf16.mxu0 %v4075_v44  ;;  %1536 = vmatprep.subr.bf16.mxu1 %v4080_v45 }
 0x257   :  { %1496 = vmatpush1.bf16.msra.mxu0 %v4089_v46  ;;  %1537 = vmatpush1.bf16.msra.mxu1 %v4094_v47 }
 0x258   :  { %1497 = vmatprep.subr.bf16.mxu0 %v4101_v48  ;;  %1538 = vmatprep.subr.bf16.mxu1 %v4106_v49  ;;  %v966_v48 = vld [vmem:[#allocation2 + $0x8] sm:$0x30] }
 0x25b   :  { %1498 = vmatpush1.bf16.msra.mxu0 %v4111_v50  ;;  %1539 = vmatpush1.bf16.msra.mxu1 %v4116_v51 }
 0x25c   :  { %1499 = vmatprep.subr.bf16.mxu0 %v4121_v52  ;;  %1540 = vmatprep.subr.bf16.mxu1 %v4126_v53 }
 0x25f   :  { %1500 = vmatpush1.bf16.msra.mxu0 %v4135_v54  ;;  %1541 = vmatpush1.bf16.msra.mxu1 %v4140_v55  ;;  %v968_v55 = vld [vmem:[#allocation2 + $0x18] sm:$0x30] }
 0x260   :  { %1501 = vmatprep.subr.bf16.mxu0 %v4145_v56  ;;  %1542 = vmatprep.subr.bf16.mxu1 %v4150_v57 }
 0x263   :  { %1502 = vmatpush1.bf16.msra.mxu0 %v4159_v58  ;;  %1543 = vmatpush1.bf16.msra.mxu1 %v4164_v59  ;;  %v967_v58 = vld [vmem:[#allocation2 + $0x10] sm:$0x30] }
 0x264   :  { %1503 = vmatprep.subr.bf16.mxu0 %v4169_v60  ;;  %1544 = vmatprep.subr.bf16.mxu1 %v4174_v61 }
 0x267   :  { %1504 = vmatpush1.bf16.msra.mxu0 %v4185_v62  ;;  %1545 = vmatpush1.bf16.msra.mxu1 %v4190_v63 }
 0x268   :  { %1505 = vmatprep.subr.bf16.mxu0 %v4197_v0  ;;  %1546 = vmatprep.subr.bf16.mxu1 %v4202_v2 }
 0x26b   :  { %1506 = vmatpush1.bf16.msra.mxu0 %v4209_v3  ;;  %1547 = vmatpush1.bf16.msra.mxu1 %v4214_v4 }
 0x26c   :  { %1817 = vmatprep.subr.bf16.mxu0 %v4357_v16  ;;  %1858 = vmatprep.subr.bf16.mxu1 %v4362_v12 }
 0x321   :  { %v1199_v38 = vpop.f32.mrb[12].mxu0  ;;  %v1240_v39 = vpop.f32.mrb[12].mxu1 }
 0x322   :  { %v1251_v40 = vrot.slane %v1199_v38, 4  ;;  %v1201_v41 = vpop.f32.mrb[13].mxu0  ;;  %v1242_v42 = vpop.f32.mrb[13].mxu1  ;;  %v1253_v57 = vrot.slane %v1240_v39, 4  ;;  %v4455_v38 = vld [vmem:[%s4799_s2 + $0x8c] ss:$16 sps:$4 sm:$0xff]  }
 0x323   :  { %v1252_v44 = vrot.slane %v1201_v41, 4  ;;  %v1203_v45 = vpop.f32.mrb[14].mxu0  ;;  %v1244_v46 = vpop.f32.mrb[14].mxu1  ;;  %v1254_v54 = vrot.slane %v1242_v42, 4  ;;  %v4462_v39 = vld [vmem:[%s4799_s2 + $0x80] ss:$16 sps:$4 sm:$0xff]  }
 0x324   :  { %v1259_v47 = vadd.f32 %v1251_v40, %v965_v43  ;;  %v1204_v49 = vpop.f32.mrb[15].mxu0  ;;  %v1245_v50 = vpop.f32.mrb[15].mxu1  ;;  %v1261_v60 = vadd.f32 %v1253_v57, %v967_v58  ;;  %v4469_v40 = vld [vmem:[%s4799_s2 + $0x88] ss:$16 sps:$4 sm:$0xff]   ;;  %v4474_v41 = vld [vmem:[%s4799_s2 + $0xa4] ss:$16 sps:$4 sm:$0xff]  }
 0x325   :  { %v1260_v51 = vadd.f32 %v1252_v44, %v966_v48  ;;  %v1262_v56 = vadd.f32 %v1254_v54, %v968_v55  ;;  %v4480_v42 = vld [vmem:[%s4799_s2 + $0xac] ss:$16 sps:$4 sm:$0xff]   ;;  %v4486_v43 = vld [vmem:[%s4799_s2 + $0xa0] ss:$16 sps:$4 sm:$0xff]   ;;  %v4493_v44 = vld [vmem:[%s4799_s2 + $0xa8] ss:$16 sps:$4 sm:$0xff]  }
 0x326   :  { %v3355_v52 = vmul.f32 -1.442695, %v1259_v47  ;;  %v4498_v45 = vld [vmem:[%s4799_s2 + $0xc4] ss:$16 sps:$4 sm:$0xff]   ;;  %v4504_v46 = vld [vmem:[%s4799_s2 + $0xcc] ss:$16 sps:$4 sm:$0xff]  }
 0x327   :  { %v3356_v53 = vmul.f32 -1.442695, %v1260_v51  ;;  %v3357_v59 = vmul.f32 -1.442695, %v1262_v56  ;;  %v4510_v47 = vld [vmem:[%s4799_s2 + $0xc0] ss:$16 sps:$4 sm:$0xff]  }
 0x328   :  { %3790 = vpow2.f32 %v3355_v52  ;;  %v4517_v48 = vld [vmem:[%s4799_s2 + $0xc8] ss:$16 sps:$4 sm:$0xff]   ;;  %v4522_v49 = vld [vmem:[%s4799_s2 + $0xe4] ss:$16 sps:$4 sm:$0xff]   ;;  %v4528_v50 = vld [vmem:[%s4799_s2 + $0xec] ss:$16 sps:$4 sm:$0xff]  }
 0x329   :  { %3792 = vpow2.f32 %v3356_v53  ;;  %v4534_v51 = vld [vmem:[%s4799_s2 + $0xe0] ss:$16 sps:$4 sm:$0xff]   ;;  %v4541_v52 = vld [vmem:[%s4799_s2 + $0xe8] ss:$16 sps:$4 sm:$0xff]   ;;  %v1291_v58 = vld [vmem:[#allocation2] sm:$0xc0] }
 0x32a   :  { %3794 = vpow2.f32 %v3357_v59 }
 0x32b   :  { %3796 = vtanh.f32 %v1261_v60 }
 0x332   :  { %v3791_v61 = vpop.eup %3790 }
 0x333   :  { %v3793_v62 = vpop.eup %3792  ;;  %v1266_v63 = vadd.f32 1.0, %v3791_v61 }
 0x334   :  { %v1272_v0 = vadd.f32 1.0, %v3793_v62  ;;  %v3795_v2 = vpop.eup %3794 }
 0x335   :  { %3798 = vrcp.f32 %v1266_v63  ;;  %v3797_v3 = vpop.eup %3796  ;;  %v1279_v31 = vadd.f32 1.0, %v3795_v2  ;;  %v1292_v63 = vld [vmem:[#allocation2 + $0x8] sm:$0xc0] }
 0x336   :  { %3800 = vrcp.f32 %v1272_v0 }
 0x337   :  { %3802 = vrcp.f32 %v1279_v31 }
 0x33f   :  { %v3799_v4 = vpop.eup %3798 }
 0x340   :  { %v3801_v29 = vpop.eup %3800  ;;  %v1286_v30 = vmul.f32 %v3799_v4, %v3797_v3 }
 0x341   :  { %v1285_v35 = vmul.f32 %v3801_v29, %v1283_v9  ;;  %v3803_v32 = vpop.eup %3802 }
 0x343   :  { %v4349_v36 = vadd.f32 %v1286_v30, %v1285_v35  ;;  %v1294_v30 = vld [vmem:[#allocation2 + $0x18] sm:$0xc0] }
 0x345   :  { %3804 = vtanh.f32 %v4349_v36 }
 0x34f   :  { %v3805_v33 = vpop.eup %3804 }
 0x350   :  { %v1289_v37 = vmul.f32 %v3805_v33, %v3803_v32  ;;  %v1293_v32 = vld [vmem:[#allocation2 + $0x10] sm:$0xc0] }
 0x352   :  { %1290 = vst [vmem:[#allocation3] sm:$0x30] %v1289_v37  ;;  %v1295_v5 = vpack.c.bf16 %v1289_v37, %v1289_v37 }
 0x354   :  { %v1329_v34 = vrot.slane %v1295_v5, 2 }
 0x356   :  { %1524 = vmatmul.mubr.bf16.vlgmr.msra.gmra.mrb[16].mxu0 %v1329_v34  ;;  %1565 = vmatmul.mubr.bf16.vlgmr.msra.gmra.mrb[16].mxu1 %v1329_v34 }
 0x357   :  { %1849 = vmatprep.mubr.bf16.mxu0 %v3886_v1  ;;  %1890 = vmatprep.mubr.bf16.mxu1 %v3886_v1 }
 0x358   :  { %1818 = vmatpush1.bf16.msra.mxu0 %v4367_v17  ;;  %1859 = vmatpush1.bf16.msra.mxu1 %v4372_v18 }
 0x359   :  { %1819 = vmatprep.subr.bf16.mxu0 %v4381_v19  ;;  %1860 = vmatprep.subr.bf16.mxu1 %v4386_v20 }
 0x35c   :  { %1820 = vmatpush1.bf16.msra.mxu0 %v4391_v14  ;;  %1861 = vmatpush1.bf16.msra.mxu1 %v4396_v15 }
 0x35d   :  { %1821 = vmatprep.subr.bf16.mxu0 %v4405_v21  ;;  %1862 = vmatprep.subr.bf16.mxu1 %v4410_v22 }
 0x360   :  { %1822 = vmatpush1.bf16.msra.mxu0 %v4415_v13  ;;  %1863 = vmatpush1.bf16.msra.mxu1 %v4420_v23 }
 0x361   :  { %1823 = vmatprep.subr.bf16.mxu0 %v4434_v25  ;;  %1864 = vmatprep.subr.bf16.mxu1 %v4444_v27 }
 0x364   :  { %1824 = vmatpush1.bf16.msra.mxu0 %v4429_v24  ;;  %1865 = vmatpush1.bf16.msra.mxu1 %v4439_v26 }
 0x365   :  { %1825 = vmatprep.subr.bf16.mxu0 %v4449_v28  ;;  %1866 = vmatprep.subr.bf16.mxu1 %v4455_v38 }
 0x368   :  { %1826 = vmatpush1.bf16.msra.mxu0 %v4462_v39  ;;  %1867 = vmatpush1.bf16.msra.mxu1 %v4469_v40 }
 0x369   :  { %1827 = vmatprep.subr.bf16.mxu0 %v4474_v41  ;;  %1868 = vmatprep.subr.bf16.mxu1 %v4480_v42 }
 0x36c   :  { %1828 = vmatpush1.bf16.msra.mxu0 %v4486_v43  ;;  %1869 = vmatpush1.bf16.msra.mxu1 %v4493_v44 }
 0x36d   :  { %1829 = vmatprep.subr.bf16.mxu0 %v4498_v45  ;;  %1870 = vmatprep.subr.bf16.mxu1 %v4504_v46 }
 0x370   :  { %1830 = vmatpush1.bf16.msra.mxu0 %v4510_v47  ;;  %1871 = vmatpush1.bf16.msra.mxu1 %v4517_v48 }
 0x371   :  { %1831 = vmatprep.subr.bf16.mxu0 %v4522_v49  ;;  %1872 = vmatprep.subr.bf16.mxu1 %v4528_v50 }
 0x374   :  { %1832 = vmatpush1.bf16.msra.mxu0 %v4534_v51  ;;  %1873 = vmatpush1.bf16.msra.mxu1 %v4541_v52 }
 0x375   :  { %2128 = vmatprep.subr.bf16.mxu0 %v4357_v16  ;;  %2169 = vmatprep.subr.bf16.mxu1 %v4362_v12 }
 0x429   :  { %v1525_v53 = vpop.f32.mrb[16].mxu0  ;;  %v1566_v54 = vpop.f32.mrb[16].mxu1 }
 0x42a   :  { %v1577_v55 = vrot.slane %v1525_v53, 2  ;;  %v1527_v56 = vpop.f32.mrb[17].mxu0  ;;  %v1568_v57 = vpop.f32.mrb[17].mxu1  ;;  %v1579_v35 = vrot.slane %v1566_v54, 2 }
 0x42b   :  { %v1578_v59 = vrot.slane %v1527_v56, 2  ;;  %v1529_v60 = vpop.f32.mrb[18].mxu0  ;;  %v1570_v61 = vpop.f32.mrb[18].mxu1  ;;  %v1580_v29 = vrot.slane %v1568_v57, 2  ;;  %v1609_v57 = vrot.slane %v4349_v36, 6 }
 0x42c   :  { %v1585_v62 = vadd.f32 %v1577_v55, %v1291_v58  ;;  %v1530_v0 = vpop.f32.mrb[19].mxu0  ;;  %v1571_v2 = vpop.f32.mrb[19].mxu1  ;;  %v1587_v37 = vadd.f32 %v1579_v35, %v1293_v32  ;;  %v1617_v36 = vld [vmem:[#allocation2 + $0x20] sm:$0x3]  ;;  %v1618_v35 = vld [vmem:[#allocation2 + $0x28] sm:$0x3] }
 0x42d   :  { %v1586_v3 = vadd.f32 %v1578_v59, %v1292_v63  ;;  %v1588_v31 = vadd.f32 %v1580_v29, %v1294_v30 }
 0x42e   :  { %v3390_v4 = vmul.f32 -1.442695, %v1585_v62 }
 0x42f   :  { %v3391_v9 = vmul.f32 -1.442695, %v1586_v3  ;;  %v3392_v33 = vmul.f32 -1.442695, %v1588_v31 }
 0x430   :  { %3806 = vpow2.f32 %v3390_v4 }
 0x431   :  { %3808 = vpow2.f32 %v3391_v9 }
 0x432   :  { %3810 = vpow2.f32 %v3392_v33 }
 0x433   :  { %3812 = vtanh.f32 %v1587_v37 }
 0x43a   :  { %v3807_v5 = vpop.eup %3806 }
 0x43b   :  { %v3809_v34 = vpop.eup %3808  ;;  %v1592_v53 = vadd.f32 1.0, %v3807_v5 }
 0x43c   :  { %v1598_v55 = vadd.f32 1.0, %v3809_v34  ;;  %v3811_v56 = vpop.eup %3810 }
 0x43d   :  { %3814 = vrcp.f32 %v1592_v53  ;;  %v3813_v58 = vpop.eup %3812  ;;  %v1605_v62 = vadd.f32 1.0, %v3811_v56 }
 0x43e   :  { %3816 = vrcp.f32 %v1598_v55 }
 0x43f   :  { %3818 = vrcp.f32 %v1605_v62 }
 0x447   :  { %v3815_v59 = vpop.eup %3814 }
 0x448   :  { %v3817_v60 = vpop.eup %3816  ;;  %v1612_v61 = vmul.f32 %v3815_v59, %v3813_v58  ;;  %v1620_v59 = vld [vmem:[#allocation2 + $0x38] sm:$0x3] }
 0x449   :  { %v1611_v54 = vmul.f32 %v3817_v60, %v1609_v57  ;;  %v3819_v0 = vpop.eup %3818  ;;  %v1619_v60 = vld [vmem:[#allocation2 + $0x30] sm:$0x3] }
 0x44b   :  { %v4549_v63 = vadd.f32 %v1612_v61, %v1611_v54 }
 0x44d   :  { %3820 = vtanh.f32 %v4549_v63 }
 0x457   :  { %v3821_v2 = vpop.eup %3820 }
 0x458   :  { %v1615_v3 = vmul.f32 %v3821_v2, %v3819_v0 }
 0x45a   :  { %1616 = vst [vmem:[#allocation3] sm:$0xc0] %v1615_v3  ;;  %v1621_v4 = vpack.c.bf16 %v1615_v3, %v1615_v3 }
 0x45c   :  { %v1655_v9 = vrot.slane %v1621_v4, 3 }
 0x45e   :  { %1850 = vmatmul.mubr.bf16.vlgmr.msra.gmra.mrb[20].mxu0 %v1655_v9  ;;  %1891 = vmatmul.mubr.bf16.vlgmr.msra.gmra.mrb[20].mxu1 %v1655_v9 }
 0x45f   :  { %2129 = vmatpush1.bf16.msra.mxu0 %v4367_v17  ;;  %2170 = vmatpush1.bf16.msra.mxu1 %v4372_v18 }
 0x460   :  { %2130 = vmatprep.subr.bf16.mxu0 %v4381_v19  ;;  %2171 = vmatprep.subr.bf16.mxu1 %v4386_v20 }
 0x461   :  { %2160 = vmatprep.mubr.bf16.mxu0 %v3886_v1  ;;  %2201 = vmatprep.mubr.bf16.mxu1 %v3886_v1 }
 0x463   :  { %2131 = vmatpush1.bf16.msra.mxu0 %v4391_v14  ;;  %2172 = vmatpush1.bf16.msra.mxu1 %v4396_v15 }
 0x464   :  { %2132 = vmatprep.subr.bf16.mxu0 %v4405_v21  ;;  %2173 = vmatprep.subr.bf16.mxu1 %v4410_v22 }
 0x467   :  { %2133 = vmatpush1.bf16.msra.mxu0 %v4415_v13  ;;  %2174 = vmatpush1.bf16.msra.mxu1 %v4420_v23 }
 0x468   :  { %2134 = vmatprep.subr.bf16.mxu0 %v4434_v25  ;;  %2175 = vmatprep.subr.bf16.mxu1 %v4444_v27 }
 0x46b   :  { %2135 = vmatpush1.bf16.msra.mxu0 %v4429_v24  ;;  %2176 = vmatpush1.bf16.msra.mxu1 %v4439_v26 }
 0x46c   :  { %2136 = vmatprep.subr.bf16.mxu0 %v4449_v28  ;;  %2177 = vmatprep.subr.bf16.mxu1 %v4455_v38 }
 0x46f   :  { %2137 = vmatpush1.bf16.msra.mxu0 %v4462_v39  ;;  %2178 = vmatpush1.bf16.msra.mxu1 %v4469_v40 }
 0x470   :  { %2138 = vmatprep.subr.bf16.mxu0 %v4474_v41  ;;  %2179 = vmatprep.subr.bf16.mxu1 %v4480_v42 }
 0x473   :  { %2139 = vmatpush1.bf16.msra.mxu0 %v4486_v43  ;;  %2180 = vmatpush1.bf16.msra.mxu1 %v4493_v44 }
 0x474   :  { %2140 = vmatprep.subr.bf16.mxu0 %v4498_v45  ;;  %2181 = vmatprep.subr.bf16.mxu1 %v4504_v46 }
 0x477   :  { %2141 = vmatpush1.bf16.msra.mxu0 %v4510_v47  ;;  %2182 = vmatpush1.bf16.msra.mxu1 %v4517_v48 }
 0x478   :  { %2142 = vmatprep.subr.bf16.mxu0 %v4522_v49  ;;  %2183 = vmatprep.subr.bf16.mxu1 %v4528_v50 }
 0x47b   :  { %2143 = vmatpush1.bf16.msra.mxu0 %v4534_v51  ;;  %2184 = vmatpush1.bf16.msra.mxu1 %v4541_v52 }
 0x47c   :  { %2454 = vmatprep.subr.bf16.mxu0 %v4357_v16  ;;  %2495 = vmatprep.subr.bf16.mxu1 %v4362_v12 }
 0x531   :  { %v1851_v29 = vpop.f32.mrb[20].mxu0  ;;  %v1892_v30 = vpop.f32.mrb[20].mxu1 }
 0x532   :  { %v1899_v31 = vadd.f32 %v1851_v29, %v1617_v36  ;;  %v1853_v32 = vpop.f32.mrb[21].mxu0  ;;  %v1894_v33 = vpop.f32.mrb[21].mxu1  ;;  %v1901_v62 = vadd.f32 %v1892_v30, %v1619_v60  ;;  %v1923_v29 = vrot.slane %v4549_v63, 6 }
 0x533   :  { %v1900_v37 = vadd.f32 %v1853_v32, %v1618_v35  ;;  %v1855_v5 = vpop.f32.mrb[22].mxu0  ;;  %v1896_v34 = vpop.f32.mrb[22].mxu1  ;;  %v1902_v57 = vadd.f32 %v1894_v33, %v1620_v59 }
 0x534   :  { %v3425_v53 = vmul.f32 -1.442695, %v1899_v31  ;;  %v1856_v55 = vpop.f32.mrb[23].mxu0  ;;  %v1897_v56 = vpop.f32.mrb[23].mxu1 }
 0x535   :  { %v3426_v58 = vmul.f32 -1.442695, %v1900_v37  ;;  %v3427_v61 = vmul.f32 -1.442695, %v1902_v57  ;;  %v1931_v57 = vld [vmem:[#allocation2 + $0x20] sm:$0xc] }
 0x536   :  { %3822 = vpow2.f32 %v3425_v53 }
 0x537   :  { %3824 = vpow2.f32 %v3426_v58 }
 0x538   :  { %3826 = vpow2.f32 %v3427_v61 }
 0x539   :  { %3828 = vtanh.f32 %v1901_v62 }
 0x540   :  { %v3823_v54 = vpop.eup %3822 }
 0x541   :  { %v3825_v0 = vpop.eup %3824  ;;  %v1906_v2 = vadd.f32 1.0, %v3823_v54 }
 0x542   :  { %v1912_v3 = vadd.f32 1.0, %v3825_v0  ;;  %v3827_v4 = vpop.eup %3826  ;;  %v1932_v0 = vld [vmem:[#allocation2 + $0x28] sm:$0xc] }
 0x543   :  { %3830 = vrcp.f32 %v1906_v2  ;;  %v3829_v9 = vpop.eup %3828  ;;  %v1919_v32 = vadd.f32 1.0, %v3827_v4 }
 0x544   :  { %3832 = vrcp.f32 %v1912_v3 }
 0x545   :  { %3834 = vrcp.f32 %v1919_v32 }
 0x54d   :  { %v3831_v36 = vpop.eup %3830 }
 0x54e   :  { %v3833_v31 = vpop.eup %3832  ;;  %v1926_v35 = vmul.f32 %v3831_v36, %v3829_v9 }
 0x54f   :  { %v1925_v33 = vmul.f32 %v3833_v31, %v1923_v29  ;;  %v3835_v30 = vpop.eup %3834 }
 0x551   :  { %v4587_v37 = vadd.f32 %v1926_v35, %v1925_v33  ;;  %v1933_v35 = vld [vmem:[#allocation2 + $0x30] sm:$0xc] }
 0x553   :  { %3836 = vtanh.f32 %v4587_v37 }
 0x55d   :  { %v3837_v5 = vpop.eup %3836 }
 0x55e   :  { %v1929_v34 = vmul.f32 %v3837_v5, %v3835_v30 }
 0x560   :  { %1930 = vst [vmem:[#allocation3 + $0x8] sm:$0x3] %v1929_v34  ;;  %v1935_v53 = vpack.c.bf16 %v1929_v34, %v1929_v34 }
 0x562   :  { %2161 = vmatmul.mubr.bf16.vlgmr.msra.gmra.mrb[24].mxu0 %v1935_v53  ;;  %2202 = vmatmul.mubr.bf16.vlgmr.msra.gmra.mrb[24].mxu1 %v1935_v53 }
 0x563   :  { %2455 = vmatpush1.bf16.msra.mxu0 %v4367_v17  ;;  %2496 = vmatpush1.bf16.msra.mxu1 %v4372_v18 }
 0x564   :  { %2456 = vmatprep.subr.bf16.mxu0 %v4381_v19  ;;  %2497 = vmatprep.subr.bf16.mxu1 %v4386_v20 }
 0x565   :  { %2486 = vmatprep.mubr.bf16.mxu0 %v3886_v1  ;;  %2527 = vmatprep.mubr.bf16.mxu1 %v3886_v1 }
 0x567   :  { %2457 = vmatpush1.bf16.msra.mxu0 %v4391_v14  ;;  %2498 = vmatpush1.bf16.msra.mxu1 %v4396_v15 }
 0x568   :  { %2458 = vmatprep.subr.bf16.mxu0 %v4405_v21  ;;  %2499 = vmatprep.subr.bf16.mxu1 %v4410_v22 }
 0x56b   :  { %2459 = vmatpush1.bf16.msra.mxu0 %v4415_v13  ;;  %2500 = vmatpush1.bf16.msra.mxu1 %v4420_v23 }
 0x56c   :  { %2460 = vmatprep.subr.bf16.mxu0 %v4434_v25  ;;  %2501 = vmatprep.subr.bf16.mxu1 %v4444_v27 }
 0x56f   :  { %2461 = vmatpush1.bf16.msra.mxu0 %v4429_v24  ;;  %2502 = vmatpush1.bf16.msra.mxu1 %v4439_v26 }
 0x570   :  { %2462 = vmatprep.subr.bf16.mxu0 %v4449_v28  ;;  %2503 = vmatprep.subr.bf16.mxu1 %v4455_v38 }
 0x573   :  { %2463 = vmatpush1.bf16.msra.mxu0 %v4462_v39  ;;  %2504 = vmatpush1.bf16.msra.mxu1 %v4469_v40 }
 0x574   :  { %2464 = vmatprep.subr.bf16.mxu0 %v4474_v41  ;;  %2505 = vmatprep.subr.bf16.mxu1 %v4480_v42 }
 0x577   :  { %2465 = vmatpush1.bf16.msra.mxu0 %v4486_v43  ;;  %2506 = vmatpush1.bf16.msra.mxu1 %v4493_v44 }
 0x578   :  { %2466 = vmatprep.subr.bf16.mxu0 %v4498_v45  ;;  %2507 = vmatprep.subr.bf16.mxu1 %v4504_v46 }
 0x57b   :  { %2467 = vmatpush1.bf16.msra.mxu0 %v4510_v47  ;;  %2508 = vmatpush1.bf16.msra.mxu1 %v4517_v48 }
 0x57c   :  { %2468 = vmatprep.subr.bf16.mxu0 %v4522_v49  ;;  %2509 = vmatprep.subr.bf16.mxu1 %v4528_v50 }
 0x57f   :  { %2469 = vmatpush1.bf16.msra.mxu0 %v4534_v51  ;;  %2510 = vmatpush1.bf16.msra.mxu1 %v4541_v52 }
 0x580   :  { %2780 = vmatprep.subr.bf16.mxu0 %v4357_v16  ;;  %2821 = vmatprep.subr.bf16.mxu1 %v4362_v12  ;;  %v1934_v16 = vld [vmem:[#allocation2 + $0x38] sm:$0xc] }
 0x635   :  { %v2162_v63 = vpop.f32.mrb[24].mxu0  ;;  %v2203_v55 = vpop.f32.mrb[24].mxu1 }
 0x636   :  { %v2214_v56 = vrot.slane %v2162_v63, 6  ;;  %v2164_v58 = vpop.f32.mrb[25].mxu0  ;;  %v2205_v59 = vpop.f32.mrb[25].mxu1  ;;  %v2216_v31 = vrot.slane %v2203_v55, 6 }
 0x637   :  { %v2215_v60 = vrot.slane %v2164_v58, 6  ;;  %v2166_v61 = vpop.f32.mrb[26].mxu0  ;;  %v2207_v62 = vpop.f32.mrb[26].mxu1  ;;  %v2217_v29 = vrot.slane %v2205_v59, 6  ;;  %v2246_v59 = vrot.slane %v4587_v37, 6 }
 0x638   :  { %v2222_v54 = vadd.f32 %v2214_v56, %v1931_v57  ;;  %v2167_v2 = vpop.f32.mrb[27].mxu0  ;;  %v2208_v3 = vpop.f32.mrb[27].mxu1  ;;  %v2224_v33 = vadd.f32 %v2216_v31, %v1933_v35 }
 0x639   :  { %v2223_v4 = vadd.f32 %v2215_v60, %v1932_v0  ;;  %v2225_v12 = vadd.f32 %v2217_v29, %v1934_v16 }
 0x63a   :  { %v3460_v9 = vmul.f32 -1.442695, %v2222_v54 }
 0x63b   :  { %v3461_v36 = vmul.f32 -1.442695, %v2223_v4  ;;  %v3462_v32 = vmul.f32 -1.442695, %v2225_v12 }
 0x63c   :  { %3838 = vpow2.f32 %v3460_v9 }
 0x63d   :  { %3840 = vpow2.f32 %v3461_v36 }
 0x63e   :  { %3842 = vpow2.f32 %v3462_v32 }
 0x63f   :  { %3844 = vtanh.f32 %v2224_v33 }
 0x646   :  { %v3839_v30 = vpop.eup %3838 }
 0x647   :  { %v3841_v5 = vpop.eup %3840  ;;  %v2229_v34 = vadd.f32 1.0, %v3839_v30 }
 0x648   :  { %v2235_v53 = vadd.f32 1.0, %v3841_v5  ;;  %v3843_v63 = vpop.eup %3842  ;;  %v3712_v5 = vld [vmem:[%s4802_s4 + $0x4] ss:$16 sps:$4 sm:$0xff]  }
 0x649   :  { %3846 = vrcp.f32 %v2229_v34  ;;  %v3845_v56 = vpop.eup %3844  ;;  %v2242_v61 = vadd.f32 1.0, %v3843_v63  ;;  %v3710_v34 = vld [vmem:[%s4802_s4] ss:$16 sps:$4 sm:$0xff]   ;;  %v3715_v63 = vld [vmem:[%s4802_s4 + $0xc] ss:$16 sps:$4 sm:$0xff]  }
 0x64a   :  { %3848 = vrcp.f32 %v2235_v53  ;;  %v3713_v53 = vld [vmem:[%s4802_s4 + $0x8] ss:$16 sps:$4 sm:$0xff]  }
 0x64b   :  { %3850 = vrcp.f32 %v2242_v61  ;;  %v3722_v61 = vld [vmem:[%s4802_s4 + $0x40] ss:$16 sps:$4 sm:$0xff]  }
 0x653   :  { %v3847_v58 = vpop.eup %3846 }
 0x654   :  { %v3849_v57 = vpop.eup %3848  ;;  %v2249_v60 = vmul.f32 %v3847_v58, %v3845_v56  ;;  %v3721_v56 = vld [vmem:[%s4802_s4 + $0x2c] ss:$16 sps:$4 sm:$0xff]   ;;  %v3716_v58 = vld [vmem:[%s4802_s4 + $0x20] ss:$16 sps:$4 sm:$0xff]  }
 0x655   :  { %v2248_v55 = vmul.f32 %v3849_v57, %v2246_v59  ;;  %v3851_v54 = vpop.eup %3850  ;;  %v3719_v59 = vld [vmem:[%s4802_s4 + $0x28] ss:$16 sps:$4 sm:$0xff]   ;;  %v3724_v57 = vld [vmem:[%s4802_s4 + $0x44] ss:$16 sps:$4 sm:$0xff]  }
 0x657   :  { %v4625_v62 = vadd.f32 %v2249_v60, %v2248_v55  ;;  %v3727_v60 = vld [vmem:[%s4802_s4 + $0x4c] ss:$16 sps:$4 sm:$0xff]   ;;  %v3725_v55 = vld [vmem:[%s4802_s4 + $0x48] ss:$16 sps:$4 sm:$0xff]  }
 0x659   :  { %3852 = vtanh.f32 %v4625_v62  ;;  %v2572_v37 = vrot.slane %v4625_v62, 6  ;;  %v3730_v62 = vld [vmem:[%s4802_s4 + $0x64] ss:$16 sps:$4 sm:$0xff]  }
 0x663   :  { %v3853_v0 = vpop.eup %3852 }
 0x664   :  { %v2252_v2 = vmul.f32 %v3853_v0, %v3851_v54  ;;  %v3733_v54 = vld [vmem:[%s4802_s4 + $0x6c] ss:$16 sps:$4 sm:$0xff]   ;;  %v3728_v0 = vld [vmem:[%s4802_s4 + $0x60] ss:$16 sps:$4 sm:$0xff]  }
 0x666   :  { %2253 = vst [vmem:[#allocation3 + $0x8] sm:$0xc] %v2252_v2  ;;  %v2258_v3 = vpack.c.bf16 %v2252_v2, %v2252_v2  ;;  %v3731_v2 = vld [vmem:[%s4802_s4 + $0x68] ss:$16 sps:$4 sm:$0xff]  }
 0x668   :  { %v2292_v4 = vrot.slane %v2258_v3, 1  ;;  %v3736_v3 = vld [vmem:[%s4802_s4 + $0x84] ss:$16 sps:$4 sm:$0xff]  }
 0x66a   :  { %2487 = vmatmul.mubr.bf16.vlgmr.msra.gmra.mrb[28].mxu0 %v2292_v4  ;;  %2528 = vmatmul.mubr.bf16.vlgmr.msra.gmra.mrb[28].mxu1 %v2292_v4  ;;  %v3739_v4 = vld [vmem:[%s4802_s4 + $0x8c] ss:$16 sps:$4 sm:$0xff]  }
 0x66b   :  { %2781 = vmatpush1.bf16.msra.mxu0 %v4367_v17  ;;  %2822 = vmatpush1.bf16.msra.mxu1 %v4372_v18 }
 0x66c   :  { %2782 = vmatprep.subr.bf16.mxu0 %v4381_v19  ;;  %2823 = vmatprep.subr.bf16.mxu1 %v4386_v20 }
 0x66d   :  { %2812 = vmatprep.mubr.bf16.mxu0 %v3886_v1  ;;  %2853 = vmatprep.mubr.bf16.mxu1 %v3886_v1 }
 0x66f   :  { %2783 = vmatpush1.bf16.msra.mxu0 %v4391_v14  ;;  %2824 = vmatpush1.bf16.msra.mxu1 %v4396_v15  ;;  %v2254_v15 = vld [vmem:[#allocation2 + $0x20] sm:$0x30] }
 0x670   :  { %2784 = vmatprep.subr.bf16.mxu0 %v4405_v21  ;;  %2825 = vmatprep.subr.bf16.mxu1 %v4410_v22 }
 0x673   :  { %2785 = vmatpush1.bf16.msra.mxu0 %v4415_v13  ;;  %2826 = vmatpush1.bf16.msra.mxu1 %v4420_v23 }
 0x674   :  { %2786 = vmatprep.subr.bf16.mxu0 %v4434_v25  ;;  %2827 = vmatprep.subr.bf16.mxu1 %v4444_v27 }
 0x677   :  { %2787 = vmatpush1.bf16.msra.mxu0 %v4429_v24  ;;  %2828 = vmatpush1.bf16.msra.mxu1 %v4439_v26  ;;  %v2255_v24 = vld [vmem:[#allocation2 + $0x28] sm:$0x30] }
 0x678   :  { %2788 = vmatprep.subr.bf16.mxu0 %v4449_v28  ;;  %2829 = vmatprep.subr.bf16.mxu1 %v4455_v38 }
 0x67b   :  { %2789 = vmatpush1.bf16.msra.mxu0 %v4462_v39  ;;  %2830 = vmatpush1.bf16.msra.mxu1 %v4469_v40  ;;  %v2257_v40 = vld [vmem:[#allocation2 + $0x38] sm:$0x30] }
 0x67c   :  { %2790 = vmatprep.subr.bf16.mxu0 %v4474_v41  ;;  %2831 = vmatprep.subr.bf16.mxu1 %v4480_v42 }
 0x67f   :  { %2791 = vmatpush1.bf16.msra.mxu0 %v4486_v43  ;;  %2832 = vmatpush1.bf16.msra.mxu1 %v4493_v44  ;;  %v2256_v43 = vld [vmem:[#allocation2 + $0x30] sm:$0x30] }
 0x680   :  { %2792 = vmatprep.subr.bf16.mxu0 %v4498_v45  ;;  %2833 = vmatprep.subr.bf16.mxu1 %v4504_v46 }
 0x683   :  { %2793 = vmatpush1.bf16.msra.mxu0 %v4510_v47  ;;  %2834 = vmatpush1.bf16.msra.mxu1 %v4517_v48 }
 0x684   :  { %2794 = vmatprep.subr.bf16.mxu0 %v4522_v49  ;;  %2835 = vmatprep.subr.bf16.mxu1 %v4528_v50 }
 0x687   :  { %2795 = vmatpush1.bf16.msra.mxu0 %v4534_v51  ;;  %2836 = vmatpush1.bf16.msra.mxu1 %v4541_v52 }
 0x688   :  { %3123 = vmatprep.subr.bf16.mxu0 %v3712_v5  ;;  %3166 = vmatprep.subr.bf16.mxu1 %v3715_v63 }
 0x73d   :  { %v2488_v17 = vpop.f32.mrb[28].mxu0  ;;  %v2529_v18 = vpop.f32.mrb[28].mxu1 }
 0x73e   :  { %v2540_v19 = vrot.slane %v2488_v17, 4  ;;  %v2490_v20 = vpop.f32.mrb[29].mxu0  ;;  %v2531_v14 = vpop.f32.mrb[29].mxu1  ;;  %v2542_v42 = vrot.slane %v2529_v18, 4  ;;  %v3734_v17 = vld [vmem:[%s4802_s4 + $0x80] ss:$16 sps:$4 sm:$0xff]  }
 0x73f   :  { %v2541_v21 = vrot.slane %v2490_v20, 4  ;;  %v2492_v22 = vpop.f32.mrb[30].mxu0  ;;  %v2533_v13 = vpop.f32.mrb[30].mxu1  ;;  %v2543_v39 = vrot.slane %v2531_v14, 4  ;;  %v3737_v18 = vld [vmem:[%s4802_s4 + $0x88] ss:$16 sps:$4 sm:$0xff]  }
 0x740   :  { %v2548_v23 = vadd.f32 %v2540_v19, %v2254_v15  ;;  %v2493_v25 = vpop.f32.mrb[31].mxu0  ;;  %v2534_v26 = vpop.f32.mrb[31].mxu1  ;;  %v2550_v45 = vadd.f32 %v2542_v42, %v2256_v43  ;;  %v3742_v19 = vld [vmem:[%s4802_s4 + $0xa4] ss:$16 sps:$4 sm:$0xff]   ;;  %v3745_v20 = vld [vmem:[%s4802_s4 + $0xac] ss:$16 sps:$4 sm:$0xff]  }
 0x741   :  { %v2549_v27 = vadd.f32 %v2541_v21, %v2255_v24  ;;  %v2551_v41 = vadd.f32 %v2543_v39, %v2257_v40  ;;  %v3740_v14 = vld [vmem:[%s4802_s4 + $0xa0] ss:$16 sps:$4 sm:$0xff]   ;;  %v3748_v15 = vld [vmem:[%s4802_s4 + $0xc4] ss:$16 sps:$4 sm:$0xff]   ;;  %v3743_v21 = vld [vmem:[%s4802_s4 + $0xa8] ss:$16 sps:$4 sm:$0xff]  }
 0x742   :  { %v3495_v28 = vmul.f32 -1.442695, %v2548_v23  ;;  %v3751_v22 = vld [vmem:[%s4802_s4 + $0xcc] ss:$16 sps:$4 sm:$0xff]   ;;  %v3746_v13 = vld [vmem:[%s4802_s4 + $0xc0] ss:$16 sps:$4 sm:$0xff]  }
 0x743   :  { %v3496_v38 = vmul.f32 -1.442695, %v2549_v27  ;;  %v3497_v44 = vmul.f32 -1.442695, %v2551_v41  ;;  %v3754_v23 = vld [vmem:[%s4802_s4 + $0xe4] ss:$16 sps:$4 sm:$0xff]  }
 0x744   :  { %3854 = vpow2.f32 %v3495_v28  ;;  %v3749_v24 = vld [vmem:[%s4802_s4 + $0xc8] ss:$16 sps:$4 sm:$0xff]   ;;  %v3757_v25 = vld [vmem:[%s4802_s4 + $0xec] ss:$16 sps:$4 sm:$0xff]   ;;  %v3752_v26 = vld [vmem:[%s4802_s4 + $0xe0] ss:$16 sps:$4 sm:$0xff]  }
 0x745   :  { %3856 = vpow2.f32 %v3496_v38  ;;  %v3755_v27 = vld [vmem:[%s4802_s4 + $0xe8] ss:$16 sps:$4 sm:$0xff]   ;;  %v2580_v42 = vld [vmem:[#allocation2 + $0x20] sm:$0xc0] }
 0x746   :  { %3858 = vpow2.f32 %v3497_v44 }
 0x747   :  { %3860 = vtanh.f32 %v2550_v45 }
 0x74e   :  { %v3855_v46 = vpop.eup %3854 }
 0x74f   :  { %v3857_v47 = vpop.eup %3856  ;;  %v2555_v48 = vadd.f32 1.0, %v3855_v46 }
 0x750   :  { %v2561_v49 = vadd.f32 1.0, %v3857_v47  ;;  %v3859_v50 = vpop.eup %3858  ;;  %v2581_v47 = vld [vmem:[#allocation2 + $0x28] sm:$0xc0] }
 0x751   :  { %3862 = vrcp.f32 %v2555_v48  ;;  %v3861_v51 = vpop.eup %3860  ;;  %v2568_v29 = vadd.f32 1.0, %v3859_v50 }
 0x752   :  { %3864 = vrcp.f32 %v2561_v49 }
 0x753   :  { %3866 = vrcp.f32 %v2568_v29 }
 0x75b   :  { %v3863_v52 = vpop.eup %3862 }
 0x75c   :  { %v3865_v9 = vpop.eup %3864  ;;  %v2575_v36 = vmul.f32 %v3863_v52, %v3861_v51 }
 0x75d   :  { %v2574_v16 = vmul.f32 %v3865_v9, %v2572_v37  ;;  %v3867_v31 = vpop.eup %3866  ;;  %v2583_v9 = vld [vmem:[#allocation2 + $0x38] sm:$0xc0] }
 0x75f   :  { %v4661_v12 = vadd.f32 %v2575_v36, %v2574_v16  ;;  %v2582_v16 = vld [vmem:[#allocation2 + $0x30] sm:$0xc0] }
 0x761   :  { %3868 = vtanh.f32 %v4661_v12 }
 0x76b   :  { %v3869_v35 = vpop.eup %3868 }
 0x76c   :  { %v2578_v32 = vmul.f32 %v3869_v35, %v3867_v31 }
 0x76e   :  { %2579 = vst [vmem:[#allocation3 + $0x8] sm:$0x30] %v2578_v32  ;;  %v2584_v33 = vpack.c.bf16 %v2578_v32, %v2578_v32 }
 0x770   :  { %v2618_v30 = vrot.slane %v2584_v33, 2 }
 0x772   :  { %2813 = vmatmul.mubr.bf16.vlgmr.msra.gmra.mrb[32].mxu0 %v2618_v30  ;;  %2854 = vmatmul.mubr.bf16.vlgmr.msra.gmra.mrb[32].mxu1 %v2618_v30 }
 0x773   :  { %3155 = vmatprep.mubr.bf16.mxu0 %v3886_v1  ;;  %3198 = vmatprep.mubr.bf16.mxu1 %v3886_v1  ;;  %v3718_v1 = vld [vmem:[%s4802_s4 + $0x24] ss:$16 sps:$4 sm:$0xff]  }
 0x774   :  { %3124 = vmatpush1.bf16.msra.mxu0 %v3710_v34  ;;  %3167 = vmatpush1.bf16.msra.mxu1 %v3713_v53 }
 0x775   :  { %3125 = vmatprep.subr.bf16.mxu0 %v3718_v1  ;;  %3168 = vmatprep.subr.bf16.mxu1 %v3721_v56  ;;  %v2898_v1 = vrot.slane %v4661_v12, 6  ;;  %v2941_v12 = vld [vmem:[%s4803_s5] sm:$0xf] }
 0x778   :  { %3126 = vmatpush1.bf16.msra.mxu0 %v3716_v58  ;;  %3169 = vmatpush1.bf16.msra.mxu1 %v3719_v59 }
 0x779   :  { %3127 = vmatprep.subr.bf16.mxu0 %v3724_v57  ;;  %3170 = vmatprep.subr.bf16.mxu1 %v3727_v60 }
 0x77c   :  { %3128 = vmatpush1.bf16.msra.mxu0 %v3722_v61  ;;  %3171 = vmatpush1.bf16.msra.mxu1 %v3725_v55 }
 0x77d   :  { %3129 = vmatprep.subr.bf16.mxu0 %v3730_v62  ;;  %3172 = vmatprep.subr.bf16.mxu1 %v3733_v54  ;;  %v2906_v54 = vld [vmem:[#allocation3] sm:$0xff] }
 0x780   :  { %3130 = vmatpush1.bf16.msra.mxu0 %v3728_v0  ;;  %3173 = vmatpush1.bf16.msra.mxu1 %v3731_v2 }
 0x781   :  { %3131 = vmatprep.subr.bf16.mxu0 %v3736_v3  ;;  %3174 = vmatprep.subr.bf16.mxu1 %v3739_v4  ;;  %v2946_v3 = vrot.slane %v2941_v12, %v63_v7  ;;  %v2954_v4 = vrot.slane %v2941_v12, %v71_v8 }
 0x784   :  { %3132 = vmatpush1.bf16.msra.mxu0 %v3734_v17  ;;  %3175 = vmatpush1.bf16.msra.mxu1 %v3737_v18  ;;  %v2950_v17 = vrot.slane %v2941_v12, %v67_v10  ;;  %v2958_v18 = vrot.slane %v2941_v12, %v75_v11 }
 0x785   :  { %3133 = vmatprep.subr.bf16.mxu0 %v3742_v19  ;;  %3176 = vmatprep.subr.bf16.mxu1 %v3745_v20 }
 0x788   :  { %3134 = vmatpush1.bf16.msra.mxu0 %v3740_v14  ;;  %3177 = vmatpush1.bf16.msra.mxu1 %v3743_v21 }
 0x789   :  { %3135 = vmatprep.subr.bf16.mxu0 %v3748_v15  ;;  %3178 = vmatprep.subr.bf16.mxu1 %v3751_v22 }
 0x78c   :  { %3136 = vmatpush1.bf16.msra.mxu0 %v3746_v13  ;;  %3179 = vmatpush1.bf16.msra.mxu1 %v3749_v24 }
 0x78d   :  { %3137 = vmatprep.subr.bf16.mxu0 %v3754_v23  ;;  %3180 = vmatprep.subr.bf16.mxu1 %v3757_v25 }
 0x790   :  { %3138 = vmatpush1.bf16.msra.mxu0 %v3752_v26  ;;  %3181 = vmatpush1.bf16.msra.mxu1 %v3755_v27 }
 0x845   :  { %v2814_v28 = vpop.f32.mrb[32].mxu0  ;;  %v2855_v38 = vpop.f32.mrb[32].mxu1 }
 0x846   :  { %v2866_v39 = vrot.slane %v2814_v28, 2  ;;  %v2816_v40 = vpop.f32.mrb[33].mxu0  ;;  %v2857_v41 = vpop.f32.mrb[33].mxu1  ;;  %v2868_v29 = vrot.slane %v2855_v38, 2 }
 0x847   :  { %v2867_v43 = vrot.slane %v2816_v40, 2  ;;  %v2818_v44 = vpop.f32.mrb[34].mxu0  ;;  %v2859_v45 = vpop.f32.mrb[34].mxu1  ;;  %v2869_v37 = vrot.slane %v2857_v41, 2 }
 0x848   :  { %v2874_v46 = vadd.f32 %v2866_v39, %v2580_v42  ;;  %v2819_v48 = vpop.f32.mrb[35].mxu0  ;;  %v2860_v49 = vpop.f32.mrb[35].mxu1  ;;  %v2876_v35 = vadd.f32 %v2868_v29, %v2582_v16 }
 0x849   :  { %v2875_v50 = vadd.f32 %v2867_v43, %v2581_v47  ;;  %v2877_v36 = vadd.f32 %v2869_v37, %v2583_v9 }
 0x84a   :  { %v3530_v51 = vmul.f32 -1.442695, %v2874_v46 }
 0x84b   :  { %v3531_v52 = vmul.f32 -1.442695, %v2875_v50  ;;  %v3532_v31 = vmul.f32 -1.442695, %v2877_v36 }
 0x84c   :  { %3870 = vpow2.f32 %v3530_v51 }
 0x84d   :  { %3872 = vpow2.f32 %v3531_v52 }
 0x84e   :  { %3874 = vpow2.f32 %v3532_v31 }
 0x84f   :  { %3876 = vtanh.f32 %v2876_v35 }
 0x856   :  { %v3871_v32 = vpop.eup %3870 }
 0x857   :  { %v3873_v33 = vpop.eup %3872  ;;  %v2881_v30 = vadd.f32 1.0, %v3871_v32 }
 0x858   :  { %v2887_v5 = vadd.f32 1.0, %v3873_v33  ;;  %v3875_v34 = vpop.eup %3874 }
 0x859   :  { %3878 = vrcp.f32 %v2881_v30  ;;  %v3877_v53 = vpop.eup %3876  ;;  %v2894_v59 = vadd.f32 1.0, %v3875_v34 }
 0x85a   :  { %3880 = vrcp.f32 %v2887_v5 }
 0x85b   :  { %3882 = vrcp.f32 %v2894_v59 }
 0x863   :  { %v3879_v63 = vpop.eup %3878 }
 0x864   :  { %v3881_v56 = vpop.eup %3880  ;;  %v2901_v58 = vmul.f32 %v3879_v63, %v3877_v53 }
 0x865   :  { %v2900_v57 = vmul.f32 %v3881_v56, %v2898_v1  ;;  %v3883_v61 = vpop.eup %3882 }
 0x867   :  { %v2902_v60 = vadd.f32 %v2901_v58, %v2900_v57 }
 0x869   :  { %3884 = vtanh.f32 %v2902_v60 }
 0x873   :  { %v3885_v55 = vpop.eup %3884 }
 0x874   :  { %v2904_v62 = vmul.f32 %v3885_v55, %v3883_v61 }
 0x876   :  { %2905 = vst [vmem:[#allocation3 + $0x8] sm:$0xc0] %v2904_v62 }
 0x87d   :  { %v2907_v0 = vld [vmem:[#allocation3 + $0x8] sm:$0xff] }
 0x87e   :  { %v2908_v2 = vpack.c.bf16 %v2907_v0, %v2906_v54 }
 0x880   :  { %3156 = vmatmul.mubr.bf16.vlgmr.msra.gmra.mrb[36].mxu0 %v2908_v2  ;;  %3199 = vmatmul.mubr.bf16.vlgmr.msra.gmra.mrb[36].mxu1 %v2908_v2 }
 0x953   :  { %v3157_v19 = vpop.f32.mrb[36].mxu0  ;;  %v3200_v20 = vpop.f32.mrb[36].mxu1 }
 0x954   :  { %v3158_v14 = vadd.f32 %v3157_v19, %v2946_v3  ;;  %v3201_v15 = vadd.f32 %v3200_v20, %v2954_v4  ;;  %v3159_v21 = vpop.f32.mrb[37].mxu0  ;;  %v3202_v22 = vpop.f32.mrb[37].mxu1 }
 0x955   :  { %v3160_v13 = vadd.f32 %v3159_v21, %v2950_v17  ;;  %v3203_v23 = vadd.f32 %v3202_v22, %v2958_v18  ;;  %v3161_v24 = vpop.f32.mrb[38].mxu0  ;;  %v3204_v25 = vpop.f32.mrb[38].mxu1 }
 0x956   :  { %3209 = vst [vmem:[%s4804_s6] sm:$0xff] %v3158_v14  ;;  %3211 = vst [vmem:[%s4804_s6 + $0x10] sm:$0xff] %v3201_v15  ;;  %v3162_v6 = vadd.f32 %v3161_v24, %v2946_v3  ;;  %v3205_v7 = vadd.f32 %v3204_v25, %v2954_v4  ;;  %v3163_v8 = vpop.f32.mrb[39].mxu0  ;;  %v3206_v10 = vpop.f32.mrb[39].mxu1 }
 0x957   :  { %3210 = vst [vmem:[%s4804_s6 + $0x8] sm:$0xff] %v3160_v13  ;;  %3212 = vst [vmem:[%s4804_s6 + $0x18] sm:$0xff] %v3203_v23  ;;  %v3164_v11 = vadd.f32 %v3163_v8, %v2950_v17  ;;  %v3207_v26 = vadd.f32 %v3206_v10, %v2958_v18 }
 0x958   :  { %3213 = vst [vmem:[%s4804_s6 + $0x20] sm:$0xff] %v3162_v6  ;;  %3215 = vst [vmem:[%s4804_s6 + $0x30] sm:$0xff] %v3205_v7 }
 0x959   :  { %3214 = vst [vmem:[%s4804_s6 + $0x28] sm:$0xff] %v3164_v11  ;;  %3216 = vst [vmem:[%s4804_s6 + $0x38] sm:$0xff] %v3207_v26 }

</bundles_post_ra>
